<compile_context>
chip_gen: v5e
topology: v5e:2x2
jax: 0.10.0
libtpu: 0.0.40
codegen_flags: <defaults>
</compile_context>

<pallas_src>
import functools
import math

import jax
import jax.numpy as jnp
from jax.experimental import pallas as pl
from jax.experimental.pallas import tpu as pltpu

BN_EPS = 1e-5


def _round_up(x, m):
    return -(-x // m) * m


# ----------------------------------------------------------------------------
# Phase 1: 3x3 conv on the flattened padded image (9 accumulating dots, each
# with K = active channel width) + per-image BN partial stats (sum, sum-sq).
# Grid = (batch,).  Weights use a constant index_map -> resident in VMEM.
# ----------------------------------------------------------------------------
def _conv_stats_kernel(x_ref, w_ref, mask_ref, conv_ref, stats_ref, *, h, wp):
    hwp = h * wp
    acc = None
    for k in range(9):
        dy, dx = divmod(k, 3)
        off = dy * wp + dx                       # static row offset of tap k
        tap = x_ref[0, off:off + hwp, :]         # (hwp, Cblk) bf16
        d = jnp.dot(tap, w_ref[k], preferred_element_type=jnp.float32)
        acc = d if acc is None else acc + d
    conv_ref[0] = acc
    m = acc * mask_ref[...]                      # zero the padded-column rows
    stats_ref[0, 0:1, :] = jnp.sum(m, axis=0, keepdims=True)
    stats_ref[0, 1:2, :] = jnp.sum(m * m, axis=0, keepdims=True)


def _conv_pass(feat, w9, colmask, *, n, h, wp, g, c_blk):
    hwp = h * wp
    R = feat.shape[1]
    kernel = functools.partial(_conv_stats_kernel, h=h, wp=wp)
    flops = 2 * n * hwp * 9 * c_blk * g
    bytes_accessed = (n * R * c_blk * 2          # activations (bf16)
                      + 9 * c_blk * g * 2        # weights (bf16, resident)
                      + n * hwp * g * 4          # conv output (f32)
                      + n * 2 * g * 4 + hwp * 4)
    return pl.pallas_call(
        kernel,
        out_shape=(jax.ShapeDtypeStruct((n, hwp, g), jnp.float32),
                   jax.ShapeDtypeStruct((n, 2, g), jnp.float32)),
        grid=(n,),
        in_specs=[
            pl.BlockSpec((1, R, c_blk), lambda i: (i, 0, 0)),
            pl.BlockSpec((9, c_blk, g), lambda i: (0, 0, 0)),
            pl.BlockSpec((hwp, 1), lambda i: (0, 0)),
        ],
        out_specs=(
            pl.BlockSpec((1, hwp, g), lambda i: (i, 0, 0)),
            pl.BlockSpec((1, 2, g), lambda i: (i, 0, 0)),
        ),
        compiler_params=pltpu.CompilerParams(
            dimension_semantics=("parallel",),
            vmem_limit_bytes=32 * 1024 * 1024),
        cost_estimate=pl.CostEstimate(
            flops=flops, transcendentals=0, bytes_accessed=bytes_accessed),
    )(feat, w9, colmask)


# ----------------------------------------------------------------------------
# Phase 2: y = ReLU(conv * scale + shift), masked on the padded-column rows.
# ----------------------------------------------------------------------------
def _bn_relu_kernel(conv_ref, scale_ref, shift_ref, mask_ref, y_ref):
    y = conv_ref[0] * scale_ref[...] + shift_ref[...]
    y_ref[0] = jnp.maximum(y, 0.0) * mask_ref[...]


def _bn_relu_pass(conv_out, scale, shift, colmask, *, n, hwp, g):
    return pl.pallas_call(
        _bn_relu_kernel,
        out_shape=jax.ShapeDtypeStruct((n, hwp, g), jnp.float32),
        grid=(n,),
        in_specs=[
            pl.BlockSpec((1, hwp, g), lambda i: (i, 0, 0)),
            pl.BlockSpec((1, g), lambda i: (0, 0)),
            pl.BlockSpec((1, g), lambda i: (0, 0)),
            pl.BlockSpec((hwp, 1), lambda i: (0, 0)),
        ],
        out_specs=pl.BlockSpec((1, hwp, g), lambda i: (i, 0, 0)),
        compiler_params=pltpu.CompilerParams(
            dimension_semantics=("parallel",),
            vmem_limit_bytes=32 * 1024 * 1024),
    )(conv_out, scale, shift, colmask)


def dense_block_forward(x_nchw, params):
    """DenseBlock forward. Input/output NCHW (PyTorch convention)."""
    n, c0, h, w = x_nchw.shape
    num_layers = len(params)
    g = params[0][0].shape[-1]                  # growth rate
    wp = _round_up(w + 2, 8)                    # padded row width (sublane-aligned)
    hwp = h * wp
    hpwp = (h + 2) * wp
    R = _round_up(hpwp + 2, 8)                  # + slack rows so all 9 taps fit
    C = c0 + num_layers * g                     # total channel width of the concat

    # Channels-contiguous, spatially zero-padded feature buffer (bf16).
    x_nhwc = jnp.transpose(x_nchw, (0, 2, 3, 1))
    x_pad = jnp.pad(x_nhwc.astype(jnp.bfloat16),
                    ((0, 0), (1, 1), (1, wp - w - 1), (0, 0)))
    feat = jnp.pad(x_pad.reshape(n, hpwp, c0),
                   ((0, 0), (0, R - hpwp), (0, C - c0)))

    # validity mask over the flattened (h, wp) conv output rows
    col = jnp.arange(hwp, dtype=jnp.int32) % wp
    colmask = (col < w).astype(jnp.float32).reshape(hwp, 1)

    cnt = float(n * h * w)
    outs = []
    for l, (w_hwio, gamma, beta) in enumerate(params):
        c_in = c0 + l * g
        # channel window read by this layer: multiple of 128 lanes, or full C
        c_blk = min(C, _round_up(c_in, 128))
        w9 = w_hwio.reshape(9, c_in, g)
        w9 = jnp.pad(w9, ((0, 0), (0, c_blk - c_in), (0, 0))).astype(jnp.bfloat16)

        conv_out, stats = _conv_pass(feat, w9, colmask,
                                     n=n, h=h, wp=wp, g=g, c_blk=c_blk)
        tot = jnp.sum(stats, axis=0)            # (2, g): global sum / sum-sq
        mean = tot[0] / cnt
        var = jnp.maximum(tot[1] / cnt - mean * mean, 0.0)
        inv = jax.lax.rsqrt(var + BN_EPS)
        scale = (gamma * inv).reshape(1, g)
        shift = (beta - mean * gamma * inv).reshape(1, g)

        y = _bn_relu_pass(conv_out, scale, shift, colmask, n=n, hwp=hwp, g=g)
        outs.append(y.reshape(n, h, wp, g)[:, :, :w, :])
        # write this layer's channel slot in place; borders stay zero
        feat = feat.at[:, wp + 1:wp + 1 + hwp, c_in:c_in + g].set(
            y.astype(jnp.bfloat16))

    out_nhwc = jnp.concatenate(
        [x_nhwc] + [o.astype(x_nchw.dtype) for o in outs], axis=-1)
    return jnp.transpose(out_nhwc, (0, 3, 1, 2))


def init_dense_block_params(key, num_layers, input_channels, growth_rate):
    """Mirror PyTorch init: xavier_uniform(gain=sqrt(2)) conv, BN gamma=1/beta=0."""
    params = []
    g = growth_rate
    gain = math.sqrt(2.0)
    for i in range(num_layers):
        c_in = input_channels + i * g
        fan_in, fan_out = c_in * 9, g * 9
        bound = gain * math.sqrt(6.0 / (fan_in + fan_out))
        key, sub = jax.random.split(key)
        w_oihw = jax.random.uniform(sub, (g, c_in, 3, 3), jnp.float32,
                                    minval=-bound, maxval=bound)
        w_hwio = jnp.transpose(w_oihw, (2, 3, 1, 0))     # (3,3,Cin,G)
        gamma = jnp.ones((g,), jnp.float32)
        beta = jnp.zeros((g,), jnp.float32)
        params.append((w_hwio, gamma, beta))
    return params


def _reference_dense_block(x_nchw, params):
    """Pure-JAX reference (lax.conv + train-mode BN + ReLU), bf16 activations."""
    n, c0, h, w = x_nchw.shape
    x_nhwc = jnp.transpose(x_nchw, (0, 2, 3, 1))
    feat = x_nhwc.astype(jnp.bfloat16)
    outs = []
    for (w_hwio, gamma, beta) in params:
        conv = jax.lax.conv_general_dilated(
            feat, w_hwio.astype(jnp.bfloat16), (1, 1), "SAME",
            dimension_numbers=("NHWC", "HWIO", "NHWC"),
            preferred_element_type=jnp.float32)
        mean = jnp.mean(conv, axis=(0, 1, 2))
        var = jnp.mean(jnp.square(conv - mean), axis=(0, 1, 2))
        y = (conv - mean) * jax.lax.rsqrt(var + BN_EPS) * gamma + beta
        y = jnp.maximum(y, 0.0)
        outs.append(y)
        feat = jnp.concatenate([feat, y.astype(jnp.bfloat16)], axis=-1)
    out = jnp.concatenate([x_nhwc] + outs, axis=-1)
    return jnp.transpose(out, (0, 3, 1, 2))


if __name__ == "__main__":
    num_layers = 3
    input_channels = 4
    growth_rate = 4
    N, H, W = 2, 16, 16

    key = jax.random.PRNGKey(0)
    key, xk, pk = jax.random.split(key, 3)
    x = jax.random.normal(xk, (N, input_channels, H, W), jnp.float32)  # NCHW
    params = init_dense_block_params(pk, num_layers, input_channels, growth_rate)

    fwd = jax.jit(dense_block_forward)
    out = jax.block_until_ready(fwd(x, params))

    expected_channels = input_channels + num_layers * growth_rate
    assert out.shape == (N, expected_channels, H, W), out.shape

    ref = jax.block_until_ready(_reference_dense_block(x, params))
    max_err = float(jnp.max(jnp.abs(out - ref)))
    assert jnp.allclose(out, ref, atol=5e-3, rtol=5e-3), max_err

    print("KERNEL_OK")
</pallas_src>

<mosaic_0001>
module attributes {stable_mosaic.version = 11 : i64} {
  func.func @_conv_stats_kernel(%arg0: i32, %arg1: memref<1x440x16xbf16, #tpu.memory_space<vmem>>, %arg2: memref<9x16x4xbf16, #tpu.memory_space<vmem>>, %arg3: memref<384x1xf32, #tpu.memory_space<vmem>>, %arg4: memref<1x384x4xf32, #tpu.memory_space<vmem>>, %arg5: memref<1x2x4xf32, #tpu.memory_space<vmem>>) attributes {dimension_semantics = [#tpu.dimension_semantics<parallel>], iteration_bounds = array<i64: 2>, scalar_prefetch = 0 : i64, scratch_operands = 0 : i64, tpu.core_type = #tpu.core_type<tc>, window_params = [{transform_indices = @transform_0, window_bounds = array<i64: 1, 440, 16>}, {pipeline_mode = #tpu.pipeline_mode<synchronous>, transform_indices = @transform_1, window_bounds = array<i64: 9, 16, 4>}, {pipeline_mode = #tpu.pipeline_mode<synchronous>, transform_indices = @transform_2, window_bounds = array<i64: 384, 1>}, {transform_indices = @transform_3, window_bounds = array<i64: 1, 384, 4>}, {transform_indices = @transform_4, window_bounds = array<i64: 1, 2, 4>}]} {
    %c0 = arith.constant 0 : index
    %c0_0 = arith.constant 0 : index
    %c0_1 = arith.constant 0 : index
    %0 = vector.load %arg1[%c0, %c0_0, %c0_1] : memref<1x440x16xbf16, #tpu.memory_space<vmem>>, vector<1x384x16xbf16>
    %1 = vector.shape_cast %0 : vector<1x384x16xbf16> to vector<384x16xbf16>
    %c0_2 = arith.constant 0 : index
    %c0_3 = arith.constant 0 : index
    %c0_4 = arith.constant 0 : index
    %2 = vector.load %arg2[%c0_2, %c0_3, %c0_4] : memref<9x16x4xbf16, #tpu.memory_space<vmem>>, vector<1x16x4xbf16>
    %3 = vector.shape_cast %2 : vector<1x16x4xbf16> to vector<16x4xbf16>
    %cst = arith.constant dense<0.000000e+00> : vector<384x4xf32>
    %4 = tpu.matmul %1, %3, %cst {dimension_numbers = #tpu.dot_dimension_numbers<[1], [0], [0], [1], [0, 0, 1, 1], [], []>} : vector<384x16xbf16>, vector<16x4xbf16>, vector<384x4xf32> -> vector<384x4xf32>
    %c0_5 = arith.constant 0 : index
    %c1 = arith.constant 1 : index
    %c0_6 = arith.constant 0 : index
    %5 = vector.load %arg1[%c0_5, %c1, %c0_6] : memref<1x440x16xbf16, #tpu.memory_space<vmem>>, vector<1x384x16xbf16>
    %6 = vector.shape_cast %5 : vector<1x384x16xbf16> to vector<384x16xbf16>
    %c1_7 = arith.constant 1 : index
    %c0_8 = arith.constant 0 : index
    %c0_9 = arith.constant 0 : index
    %7 = vector.load %arg2[%c1_7, %c0_8, %c0_9] : memref<9x16x4xbf16, #tpu.memory_space<vmem>>, vector<1x16x4xbf16>
    %8 = vector.shape_cast %7 : vector<1x16x4xbf16> to vector<16x4xbf16>
    %cst_10 = arith.constant dense<0.000000e+00> : vector<384x4xf32>
    %9 = tpu.matmul %6, %8, %cst_10 {dimension_numbers = #tpu.dot_dimension_numbers<[1], [0], [0], [1], [0, 0, 1, 1], [], []>} : vector<384x16xbf16>, vector<16x4xbf16>, vector<384x4xf32> -> vector<384x4xf32>
    %10 = arith.addf %4, %9 : vector<384x4xf32>
    %c0_11 = arith.constant 0 : index
    %c2 = arith.constant 2 : index
    %c0_12 = arith.constant 0 : index
    %11 = vector.load %arg1[%c0_11, %c2, %c0_12] : memref<1x440x16xbf16, #tpu.memory_space<vmem>>, vector<1x384x16xbf16>
    %12 = vector.shape_cast %11 : vector<1x384x16xbf16> to vector<384x16xbf16>
    %c2_13 = arith.constant 2 : index
    %c0_14 = arith.constant 0 : index
    %c0_15 = arith.constant 0 : index
    %13 = vector.load %arg2[%c2_13, %c0_14, %c0_15] : memref<9x16x4xbf16, #tpu.memory_space<vmem>>, vector<1x16x4xbf16>
    %14 = vector.shape_cast %13 : vector<1x16x4xbf16> to vector<16x4xbf16>
    %cst_16 = arith.constant dense<0.000000e+00> : vector<384x4xf32>
    %15 = tpu.matmul %12, %14, %cst_16 {dimension_numbers = #tpu.dot_dimension_numbers<[1], [0], [0], [1], [0, 0, 1, 1], [], []>} : vector<384x16xbf16>, vector<16x4xbf16>, vector<384x4xf32> -> vector<384x4xf32>
    %16 = arith.addf %10, %15 : vector<384x4xf32>
    %c0_17 = arith.constant 0 : index
    %c24 = arith.constant 24 : index
    %c0_18 = arith.constant 0 : index
    %17 = vector.load %arg1[%c0_17, %c24, %c0_18] : memref<1x440x16xbf16, #tpu.memory_space<vmem>>, vector<1x384x16xbf16>
    %18 = vector.shape_cast %17 : vector<1x384x16xbf16> to vector<384x16xbf16>
    %c3 = arith.constant 3 : index
    %c0_19 = arith.constant 0 : index
    %c0_20 = arith.constant 0 : index
    %19 = vector.load %arg2[%c3, %c0_19, %c0_20] : memref<9x16x4xbf16, #tpu.memory_space<vmem>>, vector<1x16x4xbf16>
    %20 = vector.shape_cast %19 : vector<1x16x4xbf16> to vector<16x4xbf16>
    %cst_21 = arith.constant dense<0.000000e+00> : vector<384x4xf32>
    %21 = tpu.matmul %18, %20, %cst_21 {dimension_numbers = #tpu.dot_dimension_numbers<[1], [0], [0], [1], [0, 0, 1, 1], [], []>} : vector<384x16xbf16>, vector<16x4xbf16>, vector<384x4xf32> -> vector<384x4xf32>
    %22 = arith.addf %16, %21 : vector<384x4xf32>
    %c0_22 = arith.constant 0 : index
    %c25 = arith.constant 25 : index
    %c0_23 = arith.constant 0 : index
    %23 = vector.load %arg1[%c0_22, %c25, %c0_23] : memref<1x440x16xbf16, #tpu.memory_space<vmem>>, vector<1x384x16xbf16>
    %24 = vector.shape_cast %23 : vector<1x384x16xbf16> to vector<384x16xbf16>
    %c4 = arith.constant 4 : index
    %c0_24 = arith.constant 0 : index
    %c0_25 = arith.constant 0 : index
    %25 = vector.load %arg2[%c4, %c0_24, %c0_25] : memref<9x16x4xbf16, #tpu.memory_space<vmem>>, vector<1x16x4xbf16>
    %26 = vector.shape_cast %25 : vector<1x16x4xbf16> to vector<16x4xbf16>
    %cst_26 = arith.constant dense<0.000000e+00> : vector<384x4xf32>
    %27 = tpu.matmul %24, %26, %cst_26 {dimension_numbers = #tpu.dot_dimension_numbers<[1], [0], [0], [1], [0, 0, 1, 1], [], []>} : vector<384x16xbf16>, vector<16x4xbf16>, vector<384x4xf32> -> vector<384x4xf32>
    %28 = arith.addf %22, %27 : vector<384x4xf32>
    %c0_27 = arith.constant 0 : index
    %c26 = arith.constant 26 : index
    %c0_28 = arith.constant 0 : index
    %29 = vector.load %arg1[%c0_27, %c26, %c0_28] : memref<1x440x16xbf16, #tpu.memory_space<vmem>>, vector<1x384x16xbf16>
    %30 = vector.shape_cast %29 : vector<1x384x16xbf16> to vector<384x16xbf16>
    %c5 = arith.constant 5 : index
    %c0_29 = arith.constant 0 : index
    %c0_30 = arith.constant 0 : index
    %31 = vector.load %arg2[%c5, %c0_29, %c0_30] : memref<9x16x4xbf16, #tpu.memory_space<vmem>>, vector<1x16x4xbf16>
    %32 = vector.shape_cast %31 : vector<1x16x4xbf16> to vector<16x4xbf16>
    %cst_31 = arith.constant dense<0.000000e+00> : vector<384x4xf32>
    %33 = tpu.matmul %30, %32, %cst_31 {dimension_numbers = #tpu.dot_dimension_numbers<[1], [0], [0], [1], [0, 0, 1, 1], [], []>} : vector<384x16xbf16>, vector<16x4xbf16>, vector<384x4xf32> -> vector<384x4xf32>
    %34 = arith.addf %28, %33 : vector<384x4xf32>
    %c0_32 = arith.constant 0 : index
    %c48 = arith.constant 48 : index
    %c0_33 = arith.constant 0 : index
    %35 = vector.load %arg1[%c0_32, %c48, %c0_33] : memref<1x440x16xbf16, #tpu.memory_space<vmem>>, vector<1x384x16xbf16>
    %36 = vector.shape_cast %35 : vector<1x384x16xbf16> to vector<384x16xbf16>
    %c6 = arith.constant 6 : index
    %c0_34 = arith.constant 0 : index
    %c0_35 = arith.constant 0 : index
    %37 = vector.load %arg2[%c6, %c0_34, %c0_35] : memref<9x16x4xbf16, #tpu.memory_space<vmem>>, vector<1x16x4xbf16>
    %38 = vector.shape_cast %37 : vector<1x16x4xbf16> to vector<16x4xbf16>
    %cst_36 = arith.constant dense<0.000000e+00> : vector<384x4xf32>
    %39 = tpu.matmul %36, %38, %cst_36 {dimension_numbers = #tpu.dot_dimension_numbers<[1], [0], [0], [1], [0, 0, 1, 1], [], []>} : vector<384x16xbf16>, vector<16x4xbf16>, vector<384x4xf32> -> vector<384x4xf32>
    %40 = arith.addf %34, %39 : vector<384x4xf32>
    %c0_37 = arith.constant 0 : index
    %c49 = arith.constant 49 : index
    %c0_38 = arith.constant 0 : index
    %41 = vector.load %arg1[%c0_37, %c49, %c0_38] : memref<1x440x16xbf16, #tpu.memory_space<vmem>>, vector<1x384x16xbf16>
    %42 = vector.shape_cast %41 : vector<1x384x16xbf16> to vector<384x16xbf16>
    %c7 = arith.constant 7 : index
    %c0_39 = arith.constant 0 : index
    %c0_40 = arith.constant 0 : index
    %43 = vector.load %arg2[%c7, %c0_39, %c0_40] : memref<9x16x4xbf16, #tpu.memory_space<vmem>>, vector<1x16x4xbf16>
    %44 = vector.shape_cast %43 : vector<1x16x4xbf16> to vector<16x4xbf16>
    %cst_41 = arith.constant dense<0.000000e+00> : vector<384x4xf32>
    %45 = tpu.matmul %42, %44, %cst_41 {dimension_numbers = #tpu.dot_dimension_numbers<[1], [0], [0], [1], [0, 0, 1, 1], [], []>} : vector<384x16xbf16>, vector<16x4xbf16>, vector<384x4xf32> -> vector<384x4xf32>
    %46 = arith.addf %40, %45 : vector<384x4xf32>
    %c0_42 = arith.constant 0 : index
    %c50 = arith.constant 50 : index
    %c0_43 = arith.constant 0 : index
    %47 = vector.load %arg1[%c0_42, %c50, %c0_43] : memref<1x440x16xbf16, #tpu.memory_space<vmem>>, vector<1x384x16xbf16>
    %48 = vector.shape_cast %47 : vector<1x384x16xbf16> to vector<384x16xbf16>
    %c8 = arith.constant 8 : index
    %c0_44 = arith.constant 0 : index
    %c0_45 = arith.constant 0 : index
    %49 = vector.load %arg2[%c8, %c0_44, %c0_45] : memref<9x16x4xbf16, #tpu.memory_space<vmem>>, vector<1x16x4xbf16>
    %50 = vector.shape_cast %49 : vector<1x16x4xbf16> to vector<16x4xbf16>
    %cst_46 = arith.constant dense<0.000000e+00> : vector<384x4xf32>
    %51 = tpu.matmul %48, %50, %cst_46 {dimension_numbers = #tpu.dot_dimension_numbers<[1], [0], [0], [1], [0, 0, 1, 1], [], []>} : vector<384x16xbf16>, vector<16x4xbf16>, vector<384x4xf32> -> vector<384x4xf32>
    %52 = arith.addf %46, %51 : vector<384x4xf32>
    %c0_47 = arith.constant 0 : index
    %c0_48 = arith.constant 0 : index
    %c0_49 = arith.constant 0 : index
    %53 = vector.load %arg4[%c0_47, %c0_48, %c0_49] : memref<1x384x4xf32, #tpu.memory_space<vmem>>, vector<1x384x4xf32>
    %54 = vector.shape_cast %53 : vector<1x384x4xf32> to vector<384x4xf32>
    %55 = vector.shape_cast %52 : vector<384x4xf32> to vector<1x384x4xf32>
    tpu.vector_store %arg4[%c0_47, %c0_48, %c0_49], %55 {strides = array<i32>} : memref<1x384x4xf32, #tpu.memory_space<vmem>>, vector<1x384x4xf32>,
    %c0_50 = arith.constant 0 : index
    %c0_51 = arith.constant 0 : index
    %56 = vector.load %arg3[%c0_50, %c0_51] : memref<384x1xf32, #tpu.memory_space<vmem>>, vector<384x1xf32>
    %57 = vector.broadcast %56 : vector<384x1xf32> to vector<384x4xf32>
    %58 = arith.mulf %52, %57 : vector<384x4xf32>
    %cst_52 = arith.constant dense<0.000000e+00> : vector<4xf32>
    %59 = vector.multi_reduction <add>, %58, %cst_52 [0] : vector<384x4xf32> to vector<4xf32>
    %60 = vector.shape_cast %59 : vector<4xf32> to vector<1x4xf32>
    %c0_53 = arith.constant 0 : index
    %c0_54 = arith.constant 0 : index
    %c0_55 = arith.constant 0 : index
    %61 = vector.load %arg5[%c0_53, %c0_54, %c0_55] : memref<1x2x4xf32, #tpu.memory_space<vmem>>, vector<1x1x4xf32>
    %62 = vector.shape_cast %61 : vector<1x1x4xf32> to vector<1x4xf32>
    %63 = vector.shape_cast %60 : vector<1x4xf32> to vector<1x1x4xf32>
    tpu.vector_store %arg5[%c0_53, %c0_54, %c0_55], %63 {strides = array<i32>} : memref<1x2x4xf32, #tpu.memory_space<vmem>>, vector<1x1x4xf32>,
    %64 = arith.mulf %58, %58 : vector<384x4xf32>
    %cst_56 = arith.constant dense<0.000000e+00> : vector<4xf32>
    %65 = vector.multi_reduction <add>, %64, %cst_56 [0] : vector<384x4xf32> to vector<4xf32>
    %66 = vector.shape_cast %65 : vector<4xf32> to vector<1x4xf32>
    %c0_57 = arith.constant 0 : index
    %c1_58 = arith.constant 1 : index
    %c0_59 = arith.constant 0 : index
    %67 = vector.load %arg5[%c0_57, %c1_58, %c0_59] : memref<1x2x4xf32, #tpu.memory_space<vmem>>, vector<1x1x4xf32>
    %68 = vector.shape_cast %67 : vector<1x1x4xf32> to vector<1x4xf32>
    %69 = vector.shape_cast %66 : vector<1x4xf32> to vector<1x1x4xf32>
    tpu.vector_store %arg5[%c0_57, %c1_58, %c0_59], %69 {strides = array<i32>} : memref<1x2x4xf32, #tpu.memory_space<vmem>>, vector<1x1x4xf32>,
    return
  }
  func.func @transform_0(%arg0: i32) -> (i32, i32, i32) {
    %c0_i32 = arith.constant 0 : i32
    %c0_i32_0 = arith.constant 0 : i32
    %c0_i32_1 = arith.constant 0 : i32
    return %arg0, %c0_i32, %c0_i32_0 : i32, i32, i32
  }
  func.func @transform_1(%arg0: i32) -> (i32, i32, i32) {
    %c0_i32 = arith.constant 0 : i32
    %c0_i32_0 = arith.constant 0 : i32
    %c0_i32_1 = arith.constant 0 : i32
    %c0_i32_2 = arith.constant 0 : i32
    return %c0_i32, %c0_i32_0, %c0_i32_1 : i32, i32, i32
  }
  func.func @transform_2(%arg0: i32) -> (i32, i32) {
    %c0_i32 = arith.constant 0 : i32
    %c0_i32_0 = arith.constant 0 : i32
    %c0_i32_1 = arith.constant 0 : i32
    return %c0_i32, %c0_i32_0 : i32, i32
  }
  func.func @transform_3(%arg0: i32) -> (i32, i32, i32) {
    %c0_i32 = arith.constant 0 : i32
    %c0_i32_0 = arith.constant 0 : i32
    %c0_i32_1 = arith.constant 0 : i32
    return %arg0, %c0_i32, %c0_i32_0 : i32, i32, i32
  }
  func.func @transform_4(%arg0: i32) -> (i32, i32, i32) {
    %c0_i32 = arith.constant 0 : i32
    %c0_i32_0 = arith.constant 0 : i32
    %c0_i32_1 = arith.constant 0 : i32
    return %arg0, %c0_i32, %c0_i32_0 : i32, i32, i32
  }
}

module attributes {stable_mosaic.version = 11 : i64} {
  func.func @_bn_relu_kernel(%arg0: i32, %arg1: memref<1x384x4xf32, #tpu.memory_space<vmem>>, %arg2: memref<1x4xf32, #tpu.memory_space<vmem>>, %arg3: memref<1x4xf32, #tpu.memory_space<vmem>>, %arg4: memref<384x1xf32, #tpu.memory_space<vmem>>, %arg5: memref<1x384x4xf32, #tpu.memory_space<vmem>>) attributes {dimension_semantics = [#tpu.dimension_semantics<parallel>], iteration_bounds = array<i64: 2>, scalar_prefetch = 0 : i64, scratch_operands = 0 : i64, tpu.core_type = #tpu.core_type<tc>, window_params = [{transform_indices = @transform_0, window_bounds = array<i64: 1, 384, 4>}, {pipeline_mode = #tpu.pipeline_mode<synchronous>, transform_indices = @transform_1, window_bounds = array<i64: 1, 4>}, {pipeline_mode = #tpu.pipeline_mode<synchronous>, transform_indices = @transform_2, window_bounds = array<i64: 1, 4>}, {pipeline_mode = #tpu.pipeline_mode<synchronous>, transform_indices = @transform_3, window_bounds = array<i64: 384, 1>}, {transform_indices = @transform_4, window_bounds = array<i64: 1, 384, 4>}]} {
    %c0 = arith.constant 0 : index
    %c0_0 = arith.constant 0 : index
    %c0_1 = arith.constant 0 : index
    %0 = vector.load %arg1[%c0, %c0_0, %c0_1] : memref<1x384x4xf32, #tpu.memory_space<vmem>>, vector<1x384x4xf32>
    %1 = vector.shape_cast %0 : vector<1x384x4xf32> to vector<384x4xf32>
    %c0_2 = arith.constant 0 : index
    %c0_3 = arith.constant 0 : index
    %2 = vector.load %arg2[%c0_2, %c0_3] : memref<1x4xf32, #tpu.memory_space<vmem>>, vector<1x4xf32>
    %3 = vector.broadcast %2 : vector<1x4xf32> to vector<384x4xf32>
    %4 = arith.mulf %1, %3 : vector<384x4xf32>
    %c0_4 = arith.constant 0 : index
    %c0_5 = arith.constant 0 : index
    %5 = vector.load %arg3[%c0_4, %c0_5] : memref<1x4xf32, #tpu.memory_space<vmem>>, vector<1x4xf32>
    %6 = vector.broadcast %5 : vector<1x4xf32> to vector<384x4xf32>
    %7 = arith.addf %4, %6 : vector<384x4xf32>
    %cst = arith.constant 0.000000e+00 : f32
    %8 = vector.broadcast %cst : f32 to vector<384x4xf32>
    %9 = arith.maximumf %7, %8 : vector<384x4xf32>
    %c0_6 = arith.constant 0 : index
    %c0_7 = arith.constant 0 : index
    %10 = vector.load %arg4[%c0_6, %c0_7] : memref<384x1xf32, #tpu.memory_space<vmem>>, vector<384x1xf32>
    %11 = vector.broadcast %10 : vector<384x1xf32> to vector<384x4xf32>
    %12 = arith.mulf %9, %11 : vector<384x4xf32>
    %c0_8 = arith.constant 0 : index
    %c0_9 = arith.constant 0 : index
    %c0_10 = arith.constant 0 : index
    %13 = vector.load %arg5[%c0_8, %c0_9, %c0_10] : memref<1x384x4xf32, #tpu.memory_space<vmem>>, vector<1x384x4xf32>
    %14 = vector.shape_cast %13 : vector<1x384x4xf32> to vector<384x4xf32>
    %15 = vector.shape_cast %12 : vector<384x4xf32> to vector<1x384x4xf32>
    tpu.vector_store %arg5[%c0_8, %c0_9, %c0_10], %15 {strides = array<i32>} : memref<1x384x4xf32, #tpu.memory_space<vmem>>, vector<1x384x4xf32>,
    return
  }
  func.func @transform_0(%arg0: i32) -> (i32, i32, i32) {
    %c0_i32 = arith.constant 0 : i32
    %c0_i32_0 = arith.constant 0 : i32
    %c0_i32_1 = arith.constant 0 : i32
    return %arg0, %c0_i32, %c0_i32_0 : i32, i32, i32
  }
  func.func @transform_1(%arg0: i32) -> (i32, i32) {
    %c0_i32 = arith.constant 0 : i32
    %c0_i32_0 = arith.constant 0 : i32
    %c0_i32_1 = arith.constant 0 : i32
    return %c0_i32, %c0_i32_0 : i32, i32
  }
  func.func @transform_2(%arg0: i32) -> (i32, i32) {
    %c0_i32 = arith.constant 0 : i32
    %c0_i32_0 = arith.constant 0 : i32
    %c0_i32_1 = arith.constant 0 : i32
    return %c0_i32, %c0_i32_0 : i32, i32
  }
  func.func @transform_3(%arg0: i32) -> (i32, i32) {
    %c0_i32 = arith.constant 0 : i32
    %c0_i32_0 = arith.constant 0 : i32
    %c0_i32_1 = arith.constant 0 : i32
    return %c0_i32, %c0_i32_0 : i32, i32
  }
  func.func @transform_4(%arg0: i32) -> (i32, i32, i32) {
    %c0_i32 = arith.constant 0 : i32
    %c0_i32_0 = arith.constant 0 : i32
    %c0_i32_1 = arith.constant 0 : i32
    return %arg0, %c0_i32, %c0_i32_0 : i32, i32, i32
  }
}

</mosaic_0001>

<bundles_post_ra>
// kernel: dense_block_forward.7
= control target key start
LH: loop header
LB: loop body
LE: loop exit
PB: predicated region body
PF: predicated region fallthrough
CT: control target
= control target key end

     0   :  { %s896_s15 = smov 0   ;;  %s1322_s0 = inlined_call_operand.vmem [shape: f32[2,384,4], index: 0, kind: input, shape index: {}]   ;;  %s1323_s1 = inlined_call_operand.vmem [shape: f32[1,4], index: 1, kind: input, shape index: {}]   ;;  %s1324_s2 = inlined_call_operand.vmem [shape: f32[1,4], index: 2, kind: input, shape index: {}]   ;;  %s1325_s3 = inlined_call_operand.vmem [shape: f32[384,1], index: 3, kind: input, shape index: {}]   ;;  %s1326_s4 = inlined_call_operand.vmem [shape: f32[2,384,4], index: 4, kind: output, shape index: {}]  }
   0x1 LB: > { %s838_s16 = sadd.s32 4294967295, %s868_s15   ;;  %p842_p0 = scmp.ge.s32.totalorder %s868_s15, 1  ;;  %s868_s15 = sphi %s896_s15, %s14_s15  }
   0x2   : > { %p162_p1 = scmp.lt.s32.totalorder %s868_s15, 3 }
   0x4   : > { %p163_p2 = pnand %p842_p0, %p162_p1 }
   0x5   : > { %p188_p3 = scmp.lt.s32.totalorder (!%p163_p2), %s838_s16, 1 }
   0x6   : > { %166 = sbr.rel (%p163_p2) target bundleno = 253 (0xfd), region = 36 }
   0xb   : > { %v402_v0 = vld [vmem:[%s1325_s3 + $0x20] sm:$0xff]  ;;  %v400_v1 = vld [vmem:[%s1325_s3 + $0x10] sm:$0xff]  ;;  %v870_v3 = vmov 0   ;;  %v403_v4 = vld [vmem:[%s1325_s3 + $0x28] sm:$0xff]  ;;  %s1328_s16 = smov (!%p188_p3, %s838_s16), 1  ;;  %vm734_vm0 = vcmask 31744  }
   0xc   : > { %v398_v2 = vld [vmem:[%s1325_s3] sm:$0xff]  ;;  %859 = vset.pattern.permute.xlu2 %v870_v3  ;;  %858 = vset.pattern.permute.xlu1 %v870_v3  ;;  %v401_v5 = vld [vmem:[%s1325_s3 + $0x18] sm:$0xff]  ;;  %v399_v6 = vld [vmem:[%s1325_s3 + $0x8] sm:$0xff]  ;;  %s847_s25 = smul.u32 384, %s1328_s16 }
   0xd   : > { %857 = vset.pattern.permute.xlu0 %v870_v3  ;;  %468 = vperm.xlu2 %859, %v402_v0   ;;  %v406_v7 = vld [vmem:[%s1325_s3 + $0x40] sm:$0xff]  ;;  %v405_v8 = vld [vmem:[%s1325_s3 + $0x38] sm:$0xff]  ;;  %v404_v9 = vld [vmem:[%s1325_s3 + $0x30] sm:$0xff] }
   0xe   : > { %458 = vperm.xlu1 %858, %v400_v1   ;;  %448 = vperm.xlu0 %857, %v398_v2   ;;  %v409_v10 = vld [vmem:[%s1325_s3 + $0x58] sm:$0xff]  ;;  %v408_v11 = vld [vmem:[%s1325_s3 + $0x50] sm:$0xff]  ;;  %v407_v12 = vld [vmem:[%s1325_s3 + $0x48] sm:$0xff]  ;;  %s1006_s6 = scalar_lea.vmem %s1322_s0, %s847_s25  ;;  %s1046_s28 = scalar_lea.vmem %s1326_s4, %s847_s25 }
   0xf   : > { %v412_v13 = vld [vmem:[%s1325_s3 + $0x70] sm:$0xff]  ;;  %v411_v14 = vld [vmem:[%s1325_s3 + $0x68] sm:$0xff]  ;;  %v410_v15 = vld [vmem:[%s1325_s3 + $0x60] sm:$0xff] }
  0x10   : > { %v415_v16 = vld [vmem:[%s1325_s3 + $0x88] sm:$0xff]  ;;  %v414_v17 = vld [vmem:[%s1325_s3 + $0x80] sm:$0xff]  ;;  %v413_v18 = vld [vmem:[%s1325_s3 + $0x78] sm:$0xff] }
  0x11   : > { %v418_v19 = vld [vmem:[%s1325_s3 + $0xa0] sm:$0xff]  ;;  %v417_v20 = vld [vmem:[%s1325_s3 + $0x98] sm:$0xff]  ;;  %v416_v21 = vld [vmem:[%s1325_s3 + $0x90] sm:$0xff] }
  0x12   : > { %v421_v22 = vld [vmem:[%s1325_s3 + $0xb8] sm:$0xff]  ;;  %v420_v23 = vld [vmem:[%s1325_s3 + $0xb0] sm:$0xff]  ;;  %v419_v24 = vld [vmem:[%s1325_s3 + $0xa8] sm:$0xff] }
  0x13   : > { %v424_v25 = vld [vmem:[%s1325_s3 + $0xd0] sm:$0xff]  ;;  %v423_v26 = vld [vmem:[%s1325_s3 + $0xc8] sm:$0xff]  ;;  %v422_v27 = vld [vmem:[%s1325_s3 + $0xc0] sm:$0xff] }
  0x14   : > { %v427_v28 = vld [vmem:[%s1325_s3 + $0xe8] sm:$0xff]  ;;  %v426_v29 = vld [vmem:[%s1325_s3 + $0xe0] sm:$0xff]  ;;  %v425_v30 = vld [vmem:[%s1325_s3 + $0xd8] sm:$0xff] }
  0x15   : > { %473 = vperm.xlu2 %859, %v403_v4   ;;  %v1011_v31 = vld [vmem:[%s1323_s1] ss:$0 sm:$0xff]  ;;  %v429_v34 = vld [vmem:[%s1325_s3 + $0xf8] sm:$0xff]  ;;  %v428_v35 = vld [vmem:[%s1325_s3 + $0xf0] sm:$0xff] }
  0x16   : > { %463 = vperm.xlu1 %858, %v401_v5   ;;  %453 = vperm.xlu0 %857, %v399_v6   ;;  %v202_v32 = vld [vmem:[%s1006_s6 + $0x20] sm:$0xff]  ;;  %v203_v39 = vld [vmem:[%s1006_s6 + $0x28] sm:$0xff]  ;;  %v433_v40 = vld [vmem:[%s1325_s3 + $0x118] sm:$0xff] }
  0x17   : > { %v430_v33 = vld [vmem:[%s1325_s3 + $0x100] sm:$0xff]  ;;  %v254_v36 = vmul.f32 %v1011_v31, %v202_v32  ;;  %v432_v41 = vld [vmem:[%s1325_s3 + $0x110] sm:$0xff]  ;;  %v431_v42 = vld [vmem:[%s1325_s3 + $0x108] sm:$0xff]  ;;  %v255_v44 = vmul.f32 %v1011_v31, %v203_v39 }
  0x18   : > { %v1027_v37 = vld [vmem:[%s1324_s2] ss:$0 sm:$0xff]  ;;  %v436_v49 = vld [vmem:[%s1325_s3 + $0x130] sm:$0xff]  ;;  %v435_v50 = vld [vmem:[%s1325_s3 + $0x128] sm:$0xff] }
  0x19   : > { %v306_v38 = vadd.f32 %v1027_v37, %v254_v36  ;;  %v307_v47 = vadd.f32 %v1027_v37, %v255_v44  ;;  %v206_v48 = vld [vmem:[%s1006_s6 + $0x40] sm:$0xff]  ;;  %v209_v57 = vld [vmem:[%s1006_s6 + $0x58] sm:$0xff]  ;;  %v439_v58 = vld [vmem:[%s1325_s3 + $0x148] sm:$0xff] }
  0x1a   : > { %v434_v51 = vld [vmem:[%s1325_s3 + $0x120] sm:$0xff]  ;;  %v258_v53 = vmul.f32 %v1011_v31, %v206_v48  ;;  %v200_v59 = vld [vmem:[%s1006_s6 + $0x10] sm:$0xff]  ;;  %v437_v62 = vld [vmem:[%s1325_s3 + $0x138] sm:$0xff]  ;;  %v261_v0 = vmul.f32 %v1011_v31, %v209_v57 }
  0x1b   : > { %v354_v43 = vmax.f32 %v306_v38, 0.0  ;;  %v355_v52 = vmax.f32 %v307_v47, 0.0  ;;  %v198_v60 = vld [vmem:[%s1006_s6] sm:$0xff]  ;;  %v252_v1 = vmul.f32 %v1011_v31, %v200_v59  ;;  %v205_v32 = vld [vmem:[%s1006_s6 + $0x38] sm:$0xff] }
  0x1c   : > { %v310_v56 = vadd.f32 %v1027_v37, %v258_v53  ;;  %v438_v61 = vld [vmem:[%s1325_s3 + $0x140] sm:$0xff]  ;;  %v250_v2 = vmul.f32 %v1011_v31, %v198_v60  ;;  %v313_v5 = vadd.f32 %v1027_v37, %v261_v0  ;;  %v208_v53 = vld [vmem:[%s1006_s6 + $0x50] sm:$0xff] }
  0x1d   : > { %488 = vperm.xlu2 %859, %v406_v7   ;;  %v304_v6 = vadd.f32 %v1027_v37, %v252_v1  ;;  %v260_v59 = vmul.f32 %v1011_v31, %v208_v53 }
  0x1e   : > { %483 = vperm.xlu1 %858, %v405_v8   ;;  %478 = vperm.xlu0 %857, %v404_v9   ;;  %v358_v63 = vmax.f32 %v310_v56, 0.0  ;;  %v302_v7 = vadd.f32 %v1027_v37, %v250_v2  ;;  %v212_v8 = vld [vmem:[%s1006_s6 + $0x70] sm:$0xff]  ;;  %v442_v9 = vld [vmem:[%s1325_s3 + $0x160] sm:$0xff] }
  0x25   : > { %503 = vperm.xlu2 %859, %v409_v10   ;;  %v201_v10 = vld [vmem:[%s1006_s6 + $0x18] sm:$0xff] }
  0x26   : > { %498 = vperm.xlu1 %858, %v408_v11   ;;  %493 = vperm.xlu0 %857, %v407_v12   ;;  %v199_v11 = vld [vmem:[%s1006_s6 + $0x8] sm:$0xff]  ;;  %v441_v12 = vld [vmem:[%s1325_s3 + $0x158] sm:$0xff] }
  0x2d   : > { %518 = vperm.xlu2 %859, %v412_v13   ;;  %v440_v13 = vld [vmem:[%s1325_s3 + $0x150] sm:$0xff] }
  0x2e   : > { %513 = vperm.xlu1 %858, %v411_v14   ;;  %508 = vperm.xlu0 %857, %v410_v15   ;;  %v361_v14 = vmax.f32 %v313_v5, 0.0  ;;  %v264_v15 = vmul.f32 %v1011_v31, %v212_v8  ;;  %v210_v8 = vld [vmem:[%s1006_s6 + $0x60] sm:$0xff] }
  0x35   : > { %533 = vperm.xlu2 %859, %v415_v16   ;;  %v352_v16 = vmax.f32 %v304_v6, 0.0  ;;  %v221_v6 = vld [vmem:[%s1006_s6 + $0xb8] sm:$0xff] }
  0x36   : > { %528 = vperm.xlu1 %858, %v414_v17   ;;  %523 = vperm.xlu0 %857, %v413_v18   ;;  %v350_v17 = vmax.f32 %v302_v7, 0.0  ;;  %v253_v18 = vmul.f32 %v1011_v31, %v201_v10  ;;  %v211_v7 = vld [vmem:[%s1006_s6 + $0x68] sm:$0xff]  ;;  %v273_v10 = vmul.f32 %v1011_v31, %v221_v6 }
  0x3d   : > { %548 = vperm.xlu2 %859, %v418_v19   ;;  %v251_v19 = vmul.f32 %v1011_v31, %v199_v11 }
  0x3e   : > { %543 = vperm.xlu1 %858, %v417_v20   ;;  %538 = vperm.xlu0 %857, %v416_v21  }
  0x45   : > { %563 = vperm.xlu2 %859, %v421_v22  }
  0x46   : > { %558 = vperm.xlu1 %858, %v420_v23   ;;  %553 = vperm.xlu0 %857, %v419_v24   ;;  %v316_v24 = vadd.f32 %v1027_v37, %v264_v15 }
  0x48   : > { %v364_v36 = vmax.f32 %v316_v24, 0.0  ;;  %v224_v24 = vld [vmem:[%s1006_s6 + $0xd0] sm:$0xff] }
  0x4d   : > { %578 = vperm.xlu2 %859, %v424_v25  }
  0x4e   : > { %573 = vperm.xlu1 %858, %v423_v26   ;;  %568 = vperm.xlu0 %857, %v422_v27   ;;  %v305_v27 = vadd.f32 %v1027_v37, %v253_v18 }
  0x50   : > { %v353_v39 = vmax.f32 %v305_v27, 0.0 }
  0x55   : > { %593 = vperm.xlu2 %859, %v427_v28   ;;  %v303_v28 = vadd.f32 %v1027_v37, %v251_v19  ;;  %v325_v19 = vadd.f32 %v1027_v37, %v273_v10 }
  0x56   : > { %588 = vperm.xlu1 %858, %v426_v29   ;;  %583 = vperm.xlu0 %857, %v425_v30   ;;  %v215_v29 = vld [vmem:[%s1006_s6 + $0x88] sm:$0xff]  ;;  %v445_v30 = vld [vmem:[%s1325_s3 + $0x178] sm:$0xff] }
  0x57   : > { %v267_v38 = vmul.f32 %v1011_v31, %v215_v29  ;;  %v373_v27 = vmax.f32 %v325_v19, 0.0 }
  0x59   : > { %v319_v47 = vadd.f32 %v1027_v37, %v267_v38 }
  0x5d   : > { %608 = vperm.xlu2 %859, %v430_v33   ;;  %v204_v33 = vld [vmem:[%s1006_s6 + $0x30] sm:$0xff] }
  0x5e   : > { %603 = vperm.xlu1 %858, %v429_v34   ;;  %598 = vperm.xlu0 %857, %v428_v35   ;;  %v444_v34 = vld [vmem:[%s1325_s3 + $0x170] sm:$0xff]  ;;  %v443_v35 = vld [vmem:[%s1325_s3 + $0x168] sm:$0xff] }
  0x65   : > { %623 = vperm.xlu2 %859, %v433_v40   ;;  %v351_v40 = vmax.f32 %v303_v28, 0.0  ;;  %v276_v28 = vmul.f32 %v1011_v31, %v224_v24 }
  0x66   : > { %618 = vperm.xlu1 %858, %v432_v41   ;;  %613 = vperm.xlu0 %857, %v431_v42   ;;  %v257_v41 = vmul.f32 %v1011_v31, %v205_v32  ;;  %v256_v42 = vmul.f32 %v1011_v31, %v204_v33 }
  0x67   : > { %v469_v45 = vpop.permute.xlu2 %468 }
  0x68   : > { %v690_v46 = vmul.f32 %v469_v45, %v354_v43 }
  0x6a   : > { %739 = vst.msk [vmem:[%s1046_s28 + $0x20] sm:$0xff] %vm734_vm0, %v690_v46 }
  0x6d   : > { %638 = vperm.xlu2 %859, %v436_v49  }
  0x6e   : > { %633 = vperm.xlu1 %858, %v435_v50   ;;  %628 = vperm.xlu0 %857, %v434_v51   ;;  %v309_v50 = vadd.f32 %v1027_v37, %v257_v41  ;;  %v308_v51 = vadd.f32 %v1027_v37, %v256_v42 }
  0x6f   : > { %v474_v54 = vpop.permute.xlu2 %473 }
  0x70   : > { %v691_v55 = vmul.f32 %v474_v54, %v355_v52  ;;  %v218_v52 = vld [vmem:[%s1006_s6 + $0xa0] sm:$0xff]  ;;  %v207_v54 = vld [vmem:[%s1006_s6 + $0x48] sm:$0xff]  ;;  %v357_v57 = vmax.f32 %v309_v50, 0.0 }
  0x71   : > { %v270_v56 = vmul.f32 %v1011_v31, %v218_v52  ;;  %v259_v60 = vmul.f32 %v1011_v31, %v207_v54 }
  0x72   : > { %740 = vst.msk [vmem:[%s1046_s28 + $0x28] sm:$0xff] %vm734_vm0, %v691_v55  ;;  %v367_v55 = vmax.f32 %v319_v47, 0.0 }
  0x73   : > { %v322_v1 = vadd.f32 %v1027_v37, %v270_v56  ;;  %v311_v5 = vadd.f32 %v1027_v37, %v259_v60 }
  0x75   : > { %653 = vperm.xlu2 %859, %v439_v58   ;;  %v356_v58 = vmax.f32 %v308_v51, 0.0 }
  0x76   : > { %648 = vperm.xlu1 %858, %v438_v61   ;;  %643 = vperm.xlu0 %857, %v437_v62  }
  0x77   : > { %v489_v3 = vpop.permute.xlu2 %488 }
  0x78   : > { %v694_v4 = vmul.f32 %v489_v3, %v358_v63 }
  0x7a   : > { %743 = vst.msk [vmem:[%s1046_s28 + $0x40] sm:$0xff] %vm734_vm0, %v694_v4  ;;  %v312_v4 = vadd.f32 %v1027_v37, %v260_v59 }
  0x7c   : > { %v360_v11 = vmax.f32 %v312_v4, 0.0 }
  0x7d   : > { %668 = vperm.xlu2 %859, %v442_v9   ;;  %v370_v9 = vmax.f32 %v322_v1, 0.0 }
  0x7e   : > { %663 = vperm.xlu1 %858, %v441_v12   ;;  %658 = vperm.xlu0 %857, %v440_v13   ;;  %v359_v12 = vmax.f32 %v311_v5, 0.0  ;;  %v263_v13 = vmul.f32 %v1011_v31, %v211_v7 }
  0x7f   : > { %v504_v20 = vpop.permute.xlu2 %503 }
  0x80   : > { %v697_v21 = vmul.f32 %v504_v20, %v361_v14  ;;  %v459_v22 = vpop.permute.xlu1 %458  ;;  %v449_v23 = vpop.permute.xlu0 %448  ;;  %v262_v14 = vmul.f32 %v1011_v31, %v210_v8 }
  0x81   : > { %v688_v25 = vmul.f32 %v459_v22, %v352_v16  ;;  %v686_v26 = vmul.f32 %v449_v23, %v350_v17  ;;  %v315_v22 = vadd.f32 %v1027_v37, %v263_v13 }
  0x82   : > { %746 = vst.msk [vmem:[%s1046_s28 + $0x58] sm:$0xff] %vm734_vm0, %v697_v21  ;;  %v314_v23 = vadd.f32 %v1027_v37, %v262_v14 }
  0x83   : > { %737 = vst.msk [vmem:[%s1046_s28 + $0x10] sm:$0xff] %vm734_vm0, %v688_v25  ;;  %v214_v25 = vld [vmem:[%s1006_s6 + $0x80] sm:$0xff]  ;;  %v363_v29 = vmax.f32 %v315_v22, 0.0 }
  0x84   : > { %735 = vst.msk [vmem:[%s1046_s28] sm:$0xff] %vm734_vm0, %v686_v26  ;;  %v213_v26 = vld [vmem:[%s1006_s6 + $0x78] sm:$0xff]  ;;  %v266_v32 = vmul.f32 %v1011_v31, %v214_v25 }
  0x85   : > { %683 = vperm.xlu2 %859, %v445_v30   ;;  %v362_v30 = vmax.f32 %v314_v23, 0.0  ;;  %v265_v33 = vmul.f32 %v1011_v31, %v213_v26 }
  0x86   : > { %678 = vperm.xlu1 %858, %v444_v34   ;;  %673 = vperm.xlu0 %857, %v443_v35   ;;  %v318_v42 = vadd.f32 %v1027_v37, %v266_v32 }
  0x87   : > { %v519_v43 = vpop.permute.xlu2 %518 }
  0x88   : > { %v700_v44 = vmul.f32 %v519_v43, %v364_v36  ;;  %v464_v45 = vpop.permute.xlu1 %463  ;;  %v454_v46 = vpop.permute.xlu0 %453  ;;  %v317_v43 = vadd.f32 %v1027_v37, %v265_v33 }
  0x89   : > { %v689_v48 = vmul.f32 %v464_v45, %v353_v39  ;;  %v687_v49 = vmul.f32 %v454_v46, %v351_v40  ;;  %v328_v39 = vadd.f32 %v1027_v37, %v276_v28  ;;  %v217_v45 = vld [vmem:[%s1006_s6 + $0x98] sm:$0xff]  ;;  %v216_v46 = vld [vmem:[%s1006_s6 + $0x90] sm:$0xff] }
  0x8a   : > { %749 = vst.msk [vmem:[%s1046_s28 + $0x70] sm:$0xff] %vm734_vm0, %v700_v44  ;;  %v227_v44 = vld [vmem:[%s1006_s6 + $0xe8] sm:$0xff]  ;;  %v365_v50 = vmax.f32 %v317_v43, 0.0  ;;  %v269_v51 = vmul.f32 %v1011_v31, %v217_v45  ;;  %v268_v52 = vmul.f32 %v1011_v31, %v216_v46 }
  0x8b   : > { %738 = vst.msk [vmem:[%s1046_s28 + $0x18] sm:$0xff] %vm734_vm0, %v689_v48  ;;  %v376_v47 = vmax.f32 %v328_v39, 0.0  ;;  %v279_v48 = vmul.f32 %v1011_v31, %v227_v44 }
  0x8c   : > { %736 = vst.msk [vmem:[%s1046_s28 + $0x8] sm:$0xff] %vm734_vm0, %v687_v49  ;;  %v366_v49 = vmax.f32 %v318_v42, 0.0  ;;  %v321_v60 = vadd.f32 %v1027_v37, %v269_v51 }
  0x8f   : > { %v534_v61 = vpop.permute.xlu2 %533 }
  0x90   : > { %v703_v62 = vmul.f32 %v534_v61, %v367_v55  ;;  %v484_v63 = vpop.permute.xlu1 %483  ;;  %v479_v0 = vpop.permute.xlu0 %478  ;;  %v320_v61 = vadd.f32 %v1027_v37, %v268_v52 }
  0x91   : > { %v693_v2 = vmul.f32 %v484_v63, %v357_v57  ;;  %v692_v3 = vmul.f32 %v479_v0, %v356_v58  ;;  %v331_v57 = vadd.f32 %v1027_v37, %v279_v48  ;;  %v220_v63 = vld [vmem:[%s1006_s6 + $0xb0] sm:$0xff]  ;;  %v219_v0 = vld [vmem:[%s1006_s6 + $0xa8] sm:$0xff] }
  0x92   : > { %752 = vst.msk [vmem:[%s1046_s28 + $0x88] sm:$0xff] %vm734_vm0, %v703_v62  ;;  %v230_v62 = vld [vmem:[%s1006_s6 + $0x100] sm:$0xff]  ;;  %v368_v4 = vmax.f32 %v320_v61, 0.0  ;;  %v272_v5 = vmul.f32 %v1011_v31, %v220_v63  ;;  %v271_v6 = vmul.f32 %v1011_v31, %v219_v0 }
  0x93   : > { %742 = vst.msk [vmem:[%s1046_s28 + $0x38] sm:$0xff] %vm734_vm0, %v693_v2  ;;  %v379_v1 = vmax.f32 %v331_v57, 0.0  ;;  %v282_v2 = vmul.f32 %v1011_v31, %v230_v62 }
  0x94   : > { %741 = vst.msk [vmem:[%s1046_s28 + $0x30] sm:$0xff] %vm734_vm0, %v692_v3  ;;  %v369_v3 = vmax.f32 %v321_v60, 0.0  ;;  %v324_v14 = vadd.f32 %v1027_v37, %v272_v5 }
  0x97   : > { %v549_v15 = vpop.permute.xlu2 %548 }
  0x98   : > { %v706_v16 = vmul.f32 %v549_v15, %v370_v9  ;;  %v499_v17 = vpop.permute.xlu1 %498  ;;  %v494_v18 = vpop.permute.xlu0 %493  ;;  %v323_v15 = vadd.f32 %v1027_v37, %v271_v6 }
  0x99   : > { %v696_v20 = vmul.f32 %v499_v17, %v360_v11  ;;  %v695_v21 = vmul.f32 %v494_v18, %v359_v12  ;;  %v334_v11 = vadd.f32 %v1027_v37, %v282_v2  ;;  %v223_v17 = vld [vmem:[%s1006_s6 + $0xc8] sm:$0xff]  ;;  %v222_v18 = vld [vmem:[%s1006_s6 + $0xc0] sm:$0xff] }
  0x9a   : > { %755 = vst.msk [vmem:[%s1046_s28 + $0xa0] sm:$0xff] %vm734_vm0, %v706_v16  ;;  %v233_v16 = vld [vmem:[%s1006_s6 + $0x118] sm:$0xff]  ;;  %v371_v22 = vmax.f32 %v323_v15, 0.0  ;;  %v275_v23 = vmul.f32 %v1011_v31, %v223_v17  ;;  %v274_v24 = vmul.f32 %v1011_v31, %v222_v18 }
  0x9b   : > { %745 = vst.msk [vmem:[%s1046_s28 + $0x50] sm:$0xff] %vm734_vm0, %v696_v20  ;;  %v382_v19 = vmax.f32 %v334_v11, 0.0  ;;  %v285_v20 = vmul.f32 %v1011_v31, %v233_v16 }
  0x9c   : > { %744 = vst.msk [vmem:[%s1046_s28 + $0x48] sm:$0xff] %vm734_vm0, %v695_v21  ;;  %v372_v21 = vmax.f32 %v324_v14, 0.0  ;;  %v327_v33 = vadd.f32 %v1027_v37, %v275_v23 }
  0x9f   : > { %v564_v34 = vpop.permute.xlu2 %563 }
  0xa0   : > { %v709_v35 = vmul.f32 %v564_v34, %v373_v27  ;;  %v514_v36 = vpop.permute.xlu1 %513  ;;  %v509_v38 = vpop.permute.xlu0 %508  ;;  %v326_v34 = vadd.f32 %v1027_v37, %v274_v24 }
  0xa1   : > { %v699_v40 = vmul.f32 %v514_v36, %v363_v29  ;;  %v698_v41 = vmul.f32 %v509_v38, %v362_v30  ;;  %v337_v29 = vadd.f32 %v1027_v37, %v285_v20  ;;  %v226_v36 = vld [vmem:[%s1006_s6 + $0xe0] sm:$0xff]  ;;  %v225_v38 = vld [vmem:[%s1006_s6 + $0xd8] sm:$0xff] }
  0xa2   : > { %758 = vst.msk [vmem:[%s1046_s28 + $0xb8] sm:$0xff] %vm734_vm0, %v709_v35  ;;  %v236_v35 = vld [vmem:[%s1006_s6 + $0x130] sm:$0xff]  ;;  %v374_v42 = vmax.f32 %v326_v34, 0.0  ;;  %v278_v43 = vmul.f32 %v1011_v31, %v226_v36  ;;  %v277_v44 = vmul.f32 %v1011_v31, %v225_v38 }
  0xa3   : > { %748 = vst.msk [vmem:[%s1046_s28 + $0x68] sm:$0xff] %vm734_vm0, %v699_v40  ;;  %v385_v39 = vmax.f32 %v337_v29, 0.0  ;;  %v288_v40 = vmul.f32 %v1011_v31, %v236_v35 }
  0xa4   : > { %747 = vst.msk [vmem:[%s1046_s28 + $0x60] sm:$0xff] %vm734_vm0, %v698_v41  ;;  %v375_v41 = vmax.f32 %v327_v33, 0.0  ;;  %v330_v52 = vadd.f32 %v1027_v37, %v278_v43 }
  0xa7   : > { %v579_v53 = vpop.permute.xlu2 %578 }
  0xa8   : > { %v712_v54 = vmul.f32 %v579_v53, %v376_v47  ;;  %v529_v55 = vpop.permute.xlu1 %528  ;;  %v524_v56 = vpop.permute.xlu0 %523  ;;  %v329_v53 = vadd.f32 %v1027_v37, %v277_v44 }
  0xa9   : > { %v702_v58 = vmul.f32 %v529_v55, %v366_v49  ;;  %v701_v59 = vmul.f32 %v524_v56, %v365_v50  ;;  %v340_v49 = vadd.f32 %v1027_v37, %v288_v40  ;;  %v229_v55 = vld [vmem:[%s1006_s6 + $0xf8] sm:$0xff]  ;;  %v228_v56 = vld [vmem:[%s1006_s6 + $0xf0] sm:$0xff] }
  0xaa   : > { %761 = vst.msk [vmem:[%s1046_s28 + $0xd0] sm:$0xff] %vm734_vm0, %v712_v54  ;;  %v239_v54 = vld [vmem:[%s1006_s6 + $0x148] sm:$0xff]  ;;  %v377_v60 = vmax.f32 %v329_v53, 0.0  ;;  %v281_v61 = vmul.f32 %v1011_v31, %v229_v55  ;;  %v280_v62 = vmul.f32 %v1011_v31, %v228_v56 }
  0xab   : > { %751 = vst.msk [vmem:[%s1046_s28 + $0x80] sm:$0xff] %vm734_vm0, %v702_v58  ;;  %v388_v57 = vmax.f32 %v340_v49, 0.0  ;;  %v291_v58 = vmul.f32 %v1011_v31, %v239_v54 }
  0xac   : > { %750 = vst.msk [vmem:[%s1046_s28 + $0x78] sm:$0xff] %vm734_vm0, %v701_v59  ;;  %v378_v59 = vmax.f32 %v330_v52, 0.0  ;;  %v333_v6 = vadd.f32 %v1027_v37, %v281_v61  ;;  %v241_v61 = vld [vmem:[%s1006_s6 + $0x158] sm:$0xff] }
  0xaf   : > { %v594_v7 = vpop.permute.xlu2 %593 }
  0xb0   : > { %v715_v8 = vmul.f32 %v594_v7, %v379_v1  ;;  %v544_v9 = vpop.permute.xlu1 %543  ;;  %v539_v10 = vpop.permute.xlu0 %538  ;;  %v332_v7 = vadd.f32 %v1027_v37, %v280_v62  ;;  %v240_v62 = vld [vmem:[%s1006_s6 + $0x150] sm:$0xff] }
  0xb1   : > { %v705_v12 = vmul.f32 %v544_v9, %v369_v3  ;;  %v704_v13 = vmul.f32 %v539_v10, %v368_v4  ;;  %v343_v3 = vadd.f32 %v1027_v37, %v291_v58  ;;  %v232_v9 = vld [vmem:[%s1006_s6 + $0x110] sm:$0xff]  ;;  %v231_v10 = vld [vmem:[%s1006_s6 + $0x108] sm:$0xff] }
  0xb2   : > { %764 = vst.msk [vmem:[%s1046_s28 + $0xe8] sm:$0xff] %vm734_vm0, %v715_v8  ;;  %v242_v8 = vld [vmem:[%s1006_s6 + $0x160] sm:$0xff]  ;;  %v380_v14 = vmax.f32 %v332_v7, 0.0  ;;  %v284_v15 = vmul.f32 %v1011_v31, %v232_v9  ;;  %v283_v16 = vmul.f32 %v1011_v31, %v231_v10  ;;  %v244_v9 = vld [vmem:[%s1006_s6 + $0x170] sm:$0xff]  ;;  %v243_v10 = vld [vmem:[%s1006_s6 + $0x168] sm:$0xff] }
  0xb3   : > { %754 = vst.msk [vmem:[%s1046_s28 + $0x98] sm:$0xff] %vm734_vm0, %v705_v12  ;;  %v391_v11 = vmax.f32 %v343_v3, 0.0  ;;  %v294_v12 = vmul.f32 %v1011_v31, %v242_v8 }
  0xb4   : > { %753 = vst.msk [vmem:[%s1046_s28 + $0x90] sm:$0xff] %vm734_vm0, %v704_v13  ;;  %v381_v13 = vmax.f32 %v333_v6, 0.0  ;;  %v336_v24 = vadd.f32 %v1027_v37, %v284_v15 }
  0xb7   : > { %v609_v25 = vpop.permute.xlu2 %608 }
  0xb8   : > { %v718_v26 = vmul.f32 %v609_v25, %v382_v19  ;;  %v559_v27 = vpop.permute.xlu1 %558  ;;  %v554_v28 = vpop.permute.xlu0 %553  ;;  %v335_v25 = vadd.f32 %v1027_v37, %v283_v16 }
  0xb9   : > { %v708_v30 = vmul.f32 %v559_v27, %v372_v21  ;;  %v707_v32 = vmul.f32 %v554_v28, %v371_v22  ;;  %v346_v21 = vadd.f32 %v1027_v37, %v294_v12  ;;  %v235_v27 = vld [vmem:[%s1006_s6 + $0x128] sm:$0xff]  ;;  %v234_v28 = vld [vmem:[%s1006_s6 + $0x120] sm:$0xff] }
  0xba   : > { %767 = vst.msk [vmem:[%s1046_s28 + $0x100] sm:$0xff] %vm734_vm0, %v718_v26  ;;  %v245_v26 = vld [vmem:[%s1006_s6 + $0x178] sm:$0xff]  ;;  %v383_v33 = vmax.f32 %v335_v25, 0.0  ;;  %v287_v34 = vmul.f32 %v1011_v31, %v235_v27  ;;  %v286_v35 = vmul.f32 %v1011_v31, %v234_v28 }
  0xbb   : > { %757 = vst.msk [vmem:[%s1046_s28 + $0xb0] sm:$0xff] %vm734_vm0, %v708_v30  ;;  %v394_v29 = vmax.f32 %v346_v21, 0.0  ;;  %v297_v30 = vmul.f32 %v1011_v31, %v245_v26 }
  0xbc   : > { %756 = vst.msk [vmem:[%s1046_s28 + $0xa8] sm:$0xff] %vm734_vm0, %v707_v32  ;;  %v384_v32 = vmax.f32 %v336_v24, 0.0  ;;  %v339_v44 = vadd.f32 %v1027_v37, %v287_v34 }
  0xbe   : > { %v387_v49 = vmax.f32 %v339_v44, 0.0 }
  0xbf   : > { %v624_v45 = vpop.permute.xlu2 %623 }
  0xc0   : > { %v721_v46 = vmul.f32 %v624_v45, %v385_v39  ;;  %v574_v47 = vpop.permute.xlu1 %573  ;;  %v569_v48 = vpop.permute.xlu0 %568  ;;  %v338_v45 = vadd.f32 %v1027_v37, %v286_v35 }
  0xc1   : > { %v711_v50 = vmul.f32 %v574_v47, %v375_v41  ;;  %v710_v51 = vmul.f32 %v569_v48, %v374_v42  ;;  %v349_v41 = vadd.f32 %v1027_v37, %v297_v30  ;;  %v237_v47 = vld [vmem:[%s1006_s6 + $0x138] sm:$0xff] }
  0xc2   : > { %770 = vst.msk [vmem:[%s1046_s28 + $0x118] sm:$0xff] %vm734_vm0, %v721_v46  ;;  %v238_v46 = vld [vmem:[%s1006_s6 + $0x140] sm:$0xff]  ;;  %v289_v52 = vmul.f32 %v1011_v31, %v237_v47 }
  0xc3   : > { %760 = vst.msk [vmem:[%s1046_s28 + $0xc8] sm:$0xff] %vm734_vm0, %v711_v50  ;;  %v397_v48 = vmax.f32 %v349_v41, 0.0  ;;  %v386_v50 = vmax.f32 %v338_v45, 0.0 }
  0xc4   : > { %759 = vst.msk [vmem:[%s1046_s28 + $0xc0] sm:$0xff] %vm734_vm0, %v710_v51  ;;  %v290_v51 = vmul.f32 %v1011_v31, %v238_v46 }
  0xc7   : > { %v639_v63 = vpop.permute.xlu2 %638 }
  0xc8   : > { %v724_v0 = vmul.f32 %v639_v63, %v388_v57  ;;  %v589_v1 = vpop.permute.xlu1 %588  ;;  %v584_v2 = vpop.permute.xlu0 %583 }
  0xc9   : > { %v714_v4 = vmul.f32 %v589_v1, %v378_v59  ;;  %v713_v5 = vmul.f32 %v584_v2, %v377_v60  ;;  %v342_v59 = vadd.f32 %v1027_v37, %v290_v51  ;;  %v341_v60 = vadd.f32 %v1027_v37, %v289_v52 }
  0xca   : > { %773 = vst.msk [vmem:[%s1046_s28 + $0x130] sm:$0xff] %vm734_vm0, %v724_v0  ;;  %v293_v1 = vmul.f32 %v1011_v31, %v241_v61  ;;  %v292_v2 = vmul.f32 %v1011_v31, %v240_v62 }
  0xcb   : > { %763 = vst.msk [vmem:[%s1046_s28 + $0xe0] sm:$0xff] %vm734_vm0, %v714_v4  ;;  %v390_v63 = vmax.f32 %v342_v59, 0.0  ;;  %v389_v0 = vmax.f32 %v341_v60, 0.0 }
  0xcc   : > { %762 = vst.msk [vmem:[%s1046_s28 + $0xd8] sm:$0xff] %vm734_vm0, %v713_v5  ;;  %v345_v7 = vadd.f32 %v1027_v37, %v293_v1  ;;  %v344_v8 = vadd.f32 %v1027_v37, %v292_v2 }
  0xce   : > { %v392_v12 = vmax.f32 %v344_v8, 0.0 }
  0xcf   : > { %v654_v17 = vpop.permute.xlu2 %653 }
  0xd0   : > { %v727_v18 = vmul.f32 %v654_v17, %v391_v11  ;;  %v604_v19 = vpop.permute.xlu1 %603  ;;  %v599_v20 = vpop.permute.xlu0 %598  ;;  %v393_v11 = vmax.f32 %v345_v7, 0.0 }
  0xd1   : > { %v717_v22 = vmul.f32 %v604_v19, %v381_v13  ;;  %v716_v23 = vmul.f32 %v599_v20, %v380_v14  ;;  %v296_v13 = vmul.f32 %v1011_v31, %v244_v9  ;;  %v295_v14 = vmul.f32 %v1011_v31, %v243_v10 }
  0xd2   : > { %776 = vst.msk [vmem:[%s1046_s28 + $0x148] sm:$0xff] %vm734_vm0, %v727_v18 }
  0xd3   : > { %766 = vst.msk [vmem:[%s1046_s28 + $0xf8] sm:$0xff] %vm734_vm0, %v717_v22  ;;  %v348_v19 = vadd.f32 %v1027_v37, %v296_v13  ;;  %v347_v20 = vadd.f32 %v1027_v37, %v295_v14 }
  0xd4   : > { %765 = vst.msk [vmem:[%s1046_s28 + $0xf0] sm:$0xff] %vm734_vm0, %v716_v23 }
  0xd5   : > { %v396_v21 = vmax.f32 %v348_v19, 0.0  ;;  %v395_v22 = vmax.f32 %v347_v20, 0.0 }
  0xd7   : > { %v669_v36 = vpop.permute.xlu2 %668 }
  0xd8   : > { %v730_v38 = vmul.f32 %v669_v36, %v394_v29  ;;  %v619_v39 = vpop.permute.xlu1 %618  ;;  %v614_v40 = vpop.permute.xlu0 %613 }
  0xd9   : > { %v720_v42 = vmul.f32 %v619_v39, %v384_v32  ;;  %v719_v43 = vmul.f32 %v614_v40, %v383_v33 }
  0xda   : > { %779 = vst.msk [vmem:[%s1046_s28 + $0x160] sm:$0xff] %vm734_vm0, %v730_v38 }
  0xdb   : > { %769 = vst.msk [vmem:[%s1046_s28 + $0x110] sm:$0xff] %vm734_vm0, %v720_v42 }
  0xdc   : > { %768 = vst.msk [vmem:[%s1046_s28 + $0x108] sm:$0xff] %vm734_vm0, %v719_v43 }
  0xdf   : > { %v684_v53 = vpop.permute.xlu2 %683 }
  0xe0   : > { %v733_v54 = vmul.f32 %v684_v53, %v397_v48  ;;  %v634_v55 = vpop.permute.xlu1 %633  ;;  %v629_v56 = vpop.permute.xlu0 %628 }
  0xe1   : > { %v723_v57 = vmul.f32 %v634_v55, %v387_v49  ;;  %v722_v58 = vmul.f32 %v629_v56, %v386_v50 }
  0xe2   : > { %782 = vst.msk [vmem:[%s1046_s28 + $0x178] sm:$0xff] %vm734_vm0, %v733_v54 }
  0xe3   : > { %772 = vst.msk [vmem:[%s1046_s28 + $0x128] sm:$0xff] %vm734_vm0, %v723_v57 }
  0xe4   : > { %771 = vst.msk [vmem:[%s1046_s28 + $0x120] sm:$0xff] %vm734_vm0, %v722_v58 }
  0xe8   : > { %v649_v3 = vpop.permute.xlu1 %648  ;;  %v644_v4 = vpop.permute.xlu0 %643 }
  0xe9   : > { %v726_v5 = vmul.f32 %v649_v3, %v390_v63  ;;  %v725_v6 = vmul.f32 %v644_v4, %v389_v0 }
  0xeb   : > { %775 = vst.msk [vmem:[%s1046_s28 + $0x140] sm:$0xff] %vm734_vm0, %v726_v5 }
  0xec   : > { %774 = vst.msk [vmem:[%s1046_s28 + $0x138] sm:$0xff] %vm734_vm0, %v725_v6 }
  0xf0   : > { %v664_v15 = vpop.permute.xlu1 %663  ;;  %v659_v16 = vpop.permute.xlu0 %658 }
  0xf1   : > { %v729_v17 = vmul.f32 %v664_v15, %v393_v11  ;;  %v728_v18 = vmul.f32 %v659_v16, %v392_v12 }
  0xf3   : > { %778 = vst.msk [vmem:[%s1046_s28 + $0x158] sm:$0xff] %vm734_vm0, %v729_v17 }
  0xf4   : > { %777 = vst.msk [vmem:[%s1046_s28 + $0x150] sm:$0xff] %vm734_vm0, %v728_v18 }
  0xf8   : > { %v679_v23 = vpop.permute.xlu1 %678  ;;  %v674_v24 = vpop.permute.xlu0 %673 }
  0xf9   : > { %v732_v25 = vmul.f32 %v679_v23, %v396_v21  ;;  %v731_v26 = vmul.f32 %v674_v24, %v395_v22 }
  0xfb   : > { %781 = vst.msk [vmem:[%s1046_s28 + $0x170] sm:$0xff] %vm734_vm0, %v732_v25 }
  0xfc   : > { %780 = vst.msk [vmem:[%s1046_s28 + $0x168] sm:$0xff] %vm734_vm0, %v731_v26 }
  0xfd PF: > { %s14_s15 = sadd.s32 1, %s868_s15  }
  0xfe   : > { %p11_p4 = scmp.ge.s32.totalorder %s14_s15, 4  }
 0x100   :  { %13 = sbr.rel (!%p11_p4) target bundleno = 1 (0x1), region = 66 }

// kernel: dense_block_forward.6
= control target key start
LH: loop header
LB: loop body
LE: loop exit
PB: predicated region body
PF: predicated region fallthrough
CT: control target
= control target key end

     0   :  { %s5707_s15 = smov 0   ;;  %s7288_s0 = inlined_call_operand.vmem [shape: bf16[2,440,16], index: 0, kind: input, shape index: {}]   ;;  %s7289_s1 = inlined_call_operand.vmem [shape: bf16[9,16,4], index: 1, kind: input, shape index: {}]   ;;  %s7290_s2 = inlined_call_operand.vmem [shape: f32[384,1], index: 2, kind: input, shape index: {}]   ;;  %s7291_s3 = inlined_call_operand.vmem [shape: f32[2,384,4], index: 3, kind: output, shape index: {0}]   ;;  %s7292_s4 = inlined_call_operand.vmem [shape: f32[2,2,4], index: 4, kind: output, shape index: {1}]  }
   0x1 LB: > { %s4737_s16 = sadd.s32 4294967295, %s5679_s15   ;;  %p4741_p0 = scmp.ge.s32.totalorder %s5679_s15, 1  ;;  %s5679_s15 = sphi %s5707_s15, %s15_s15  }
   0x2   : > { %p165_p1 = scmp.lt.s32.totalorder %s5679_s15, 3 }
   0x4   : > { %p166_p2 = pnand %p4741_p0, %p165_p1 }
   0x6   : > { %169 = sbr.rel (%p166_p2) target bundleno = 1040 (0x410), region = 32 }
   0xb   : > { %v5507_v0 = vld [vmem:[%s7289_s1 + $0x8] sm:$0xff]  ;;  %p195_p3 = scmp.lt.s32.totalorder %s4737_s16, 1  ;;  %v5508_v1 = vld [vmem:[%s7289_s1 + $0x10] sm:$0xff]  ;;  %v5533_v2 = vld [vmem:[%s7289_s1 + $0x18] sm:$0xff]  ;;  %vm387_vm0 = vsmask.f32 7424 }
   0xc   : > { %v5506_v3 = vld [vmem:[%s7289_s1] sm:$0xff]  ;;  %5624 = vmatpush.bf16.msra.mxu1 %v5507_v0  ;;  %5625 = vmatpush.bf16.msra.mxu2 %v5507_v0  ;;  %vm590_vm1 = vcmask 130048   ;;  %vm982_vm2 = vcmask 1046528   ;;  %vm4013_vm3 = vcmask 31744   ;;  %vm4499_vm4 = vcmask 24576  }
   0xd   : > { %v5557_v4 = vld [vmem:[%s7289_s1 + $0x20] sm:$0xff]  ;;  %s7350_s16 = smov (!%p195_p3, %s4737_s16), 1  ;;  %5626 = vmatpush.bf16.msra.mxu3 %v5507_v0  ;;  %670 = vmatpush.bf16.msra.mxu0 %v5507_v0 }
   0xe   : > { %s5627_s27 = smul.u32 220, %s7350_s16 }
   0xf   : > { %s5628_s26 = smul.u32 384, %s7350_s16 }
  0x10   : > { %1117 = vmatpush.bf16.msrb.mxu2 %v5508_v1  ;;  %853 = vmatpush.bf16.msrb.mxu1 %v5506_v3  ;;  %s5736_s30 = scalar_lea.vmem %s7288_s0, %s5627_s27 }
  0x11   : > { %1543 = vmatpush.bf16.msrb.mxu3 %v5533_v2  ;;  %2169 = vmatpush.bf16.msrb.mxu0 %v5557_v4  ;;  %v5739_v5 = vld [vmem:[%s5736_s30 + $0x30] sm:$0xff]  ;;  %v5742_v6 = vld [vmem:[%s5736_s30 + $0x38] sm:$0xff]  ;;  %v5745_v7 = vld [vmem:[%s5736_s30 + $0x60] sm:$0xff]  ;;  %s6593_s29 = scalar_lea.vmem %s7291_s3, %s5628_s26 }
  0x12   : > { %v5748_v8 = vld [vmem:[%s5736_s30 + $0x68] sm:$0xff]  ;;  %v5500_v9 = vld [vmem:[%s5736_s30 + $0x90] sm:$0xff]  ;;  %v5501_v10 = vld [vmem:[%s5736_s30 + $0x98] sm:$0xff]  ;;  %v436_v11 = vshll.u32 %v5739_v5, 16  ;;  %v440_v12 = vshrl.u32 %v5739_v5, 16  ;;  %v444_v13 = vshll.u32 %v5742_v6, 16 }
  0x13   : > { %v484_v14 = vshll.u32 %v5745_v7, 16  ;;  %v5757_v15 = vld [vmem:[%s5736_s30] sm:$0xff]   ;;  %v5760_v16 = vld [vmem:[%s5736_s30 + $0x8] sm:$0xff]  ;;  %v488_v17 = vshrl.u32 %v5745_v7, 16  ;;  %v492_v18 = vshll.u32 %v5748_v8, 16  ;;  %v532_v19 = vshll.u32 %v5500_v9, 16 }
  0x14   : > { %v536_v20 = vshrl.u32 %v5500_v9, 16  ;;  %v5764_v21 = vrot.slane %v436_v11, 1  ;;  %v446_v22 = vrot.slane %v444_v13, 1  ;;  %v540_v24 = vshll.u32 %v5501_v10, 16  ;;  %v5783_v40 = vld [vmem:[%s5736_s30 + $0x40] sm:$0xff]  ;;  %v5786_v41 = vld [vmem:[%s5736_s30 + $0x70] sm:$0xff] }
  0x15   : > { %v5766_v23 = vrot.slane %v484_v14, 1  ;;  %v494_v25 = vrot.slane %v492_v18, 1  ;;  %v5768_v26 = vrot.slane %v532_v19, 1  ;;  %v389_v27 = vshrl.u32 %v5757_v15, 16  ;;  %v5502_v43 = vld [vmem:[%s5736_s30 + $0xa0] sm:$0xff]  ;;  %v5792_v44 = vld [vmem:[%s5736_s30 + $0x10] sm:$0xff] }
  0x16   : > { %v391_v28 = vshll.u32 %v5757_v15, 16  ;;  %v442_v29 = vor.u32 %v440_v12, %v5764_v21  ;;  %v542_v31 = vrot.slane %v540_v24, 1  ;;  %v396_v32 = vshll.u32 %v5760_v16, 16  ;;  %v5808_v1 = vld [vmem:[%s5736_s30 + $0x48] sm:$0xff]  ;;  %v5811_v2 = vld [vmem:[%s5736_s30 + $0x78] sm:$0xff] }
  0x17   : > { %v490_v30 = vor.u32 %v488_v17, %v5766_v23  ;;  %v538_v33 = vor.u32 %v536_v20, %v5768_v26  ;;  %v448_v45 = vshrl.u32 %v5742_v6, 16  ;;  %v452_v46 = vshll.u32 %v5783_v40, 16  ;;  %v5503_v3 = vld [vmem:[%s5736_s30 + $0xa8] sm:$0xff]  ;;  %v5816_v4 = vld [vmem:[%s5736_s30 + $0x18] sm:$0xff] }
  0x18   : > { %v393_v34 = vrot.slane %v391_v28, 1  ;;  %v447_v35 = vsel %vm387_vm0, %v442_v29, %v446_v22  ;;  %v398_v37 = vrot.slane %v396_v32, 1  ;;  %v496_v47 = vshrl.u32 %v5748_v8, 16 }
  0x19   : > { %v495_v36 = vsel %vm387_vm0, %v490_v30, %v494_v25  ;;  %4849 = vmatmul.msk.bf16.vlgmr.msra.gmra.mxu1 %vm590_vm1, %v447_v35  ;;  %v543_v38 = vsel %vm387_vm0, %v538_v33, %v542_v31  ;;  %v500_v48 = vshll.u32 %v5786_v41, 16  ;;  %v544_v49 = vshrl.u32 %v5501_v10, 16  ;;  %v5835_v35 = vld [vmem:[%s5736_s30 + $0x80] sm:$0xff] }
  0x1a   : > { %4855 = vmatmul.msk.bf16.vlgmr.msra.gmra.mxu2 %vm590_vm1, %v495_v36  ;;  %v394_v39 = vor.u32 %v393_v34, %v389_v27  ;;  %4861 = vmatmul.msk.bf16.vlgmr.msra.gmra.mxu3 %vm590_vm1, %v543_v38  ;;  %v548_v50 = vshll.u32 %v5502_v43, 16  ;;  %v400_v51 = vshrl.u32 %v5760_v16, 16  ;;  %v404_v52 = vshll.u32 %v5792_v44, 16  ;;  %v5832_v34 = vld [vmem:[%s5736_s30 + $0x50] sm:$0xff] }
  0x1b   : > { %v450_v53 = vor.u32 %v448_v45, %v446_v22  ;;  %v454_v54 = vrot.slane %v452_v46, 1  ;;  %v498_v55 = vor.u32 %v496_v47, %v494_v25  ;;  %v502_v56 = vrot.slane %v500_v48, 1  ;;  %v5504_v36 = vld [vmem:[%s5736_s30 + $0xb0] sm:$0xff] }
  0x1c   : > { %v399_v42 = vsel %vm387_vm0, %v394_v39, %v398_v37  ;;  %v546_v57 = vor.u32 %v544_v49, %v542_v31  ;;  %v550_v58 = vrot.slane %v548_v50, 1  ;;  %v402_v59 = vor.u32 %v400_v51, %v398_v37  ;;  %v5840_v37 = vld [vmem:[%s5736_s30 + $0x20] sm:$0xff] }
  0x1d   : > { %4843 = vmatmul.msk.bf16.vlgmr.msra.gmra.mxu0 %vm590_vm1, %v399_v42  ;;  %v406_v60 = vrot.slane %v404_v52, 1  ;;  %v455_v61 = vsel %vm387_vm0, %v450_v53, %v454_v54  ;;  %v503_v62 = vsel %vm387_vm0, %v498_v55, %v502_v56  ;;  %v456_v9 = vshrl.u32 %v5783_v40, 16 }
  0x1e   : > { %v551_v63 = vsel %vm387_vm0, %v546_v57, %v550_v58  ;;  %v460_v10 = vshll.u32 %v5808_v1, 16  ;;  %v504_v11 = vshrl.u32 %v5786_v41, 16  ;;  %v508_v12 = vshll.u32 %v5811_v2, 16 }
  0x1f   : > { %v407_v0 = vsel %vm387_vm0, %v402_v59, %v406_v60  ;;  %v552_v13 = vshrl.u32 %v5502_v43, 16  ;;  %v556_v14 = vshll.u32 %v5503_v3, 16  ;;  %v408_v17 = vshrl.u32 %v5792_v44, 16 }
  0x20   : > { %v412_v18 = vshll.u32 %v5816_v4, 16  ;;  %v458_v19 = vor.u32 %v456_v9, %v454_v54  ;;  %v462_v20 = vrot.slane %v460_v10, 1  ;;  %v506_v22 = vor.u32 %v504_v11, %v502_v56 }
  0x21   : > { %v510_v24 = vrot.slane %v508_v12, 1  ;;  %v554_v25 = vor.u32 %v552_v13, %v550_v58  ;;  %v558_v27 = vrot.slane %v556_v14, 1  ;;  %v410_v28 = vor.u32 %v408_v17, %v406_v60 }
  0x22   : > { %v414_v29 = vrot.slane %v412_v18, 1  ;;  %v463_v30 = vsel %vm387_vm0, %v458_v19, %v462_v20  ;;  %v464_v38 = vshrl.u32 %v5808_v1, 16  ;;  %v468_v39 = vshll.u32 %v5832_v34, 16 }
  0x23   : > { %v511_v31 = vsel %vm387_vm0, %v506_v22, %v510_v24  ;;  %v559_v32 = vsel %vm387_vm0, %v554_v25, %v558_v27  ;;  %v512_v42 = vshrl.u32 %v5811_v2, 16  ;;  %v516_v43 = vshll.u32 %v5835_v35, 16 }
  0x24   : > { %v415_v33 = vsel %vm387_vm0, %v410_v28, %v414_v29  ;;  %v560_v45 = vshrl.u32 %v5503_v3, 16  ;;  %v564_v46 = vshll.u32 %v5504_v36, 16  ;;  %v416_v47 = vshrl.u32 %v5816_v4, 16 }
  0x25   : > { %v420_v48 = vshll.u32 %v5840_v37, 16  ;;  %v466_v49 = vor.u32 %v464_v38, %v462_v20  ;;  %v470_v50 = vrot.slane %v468_v39, 1  ;;  %v514_v51 = vor.u32 %v512_v42, %v510_v24  ;;  %v5583_v38 = vld [vmem:[%s7289_s1 + $0x30] sm:$0xff]  ;;  %v5607_v42 = vld [vmem:[%s7289_s1 + $0x38] sm:$0xff] }
  0x26   : > { %v518_v52 = vrot.slane %v516_v43, 1  ;;  %v562_v53 = vor.u32 %v560_v45, %v558_v27  ;;  %v566_v54 = vrot.slane %v564_v46, 1  ;;  %v418_v55 = vor.u32 %v416_v47, %v414_v29  ;;  %v260_v27 = vld [vmem:[%s5736_s30 + $0xc0] sm:$0x1]  ;;  %2906 = vmatpush.bf16.msra.mxu2 %v5583_v38  ;;  %v5558_v43 = vld [vmem:[%s7289_s1 + $0x28] sm:$0xff]  ;;  %3532 = vmatpush.bf16.msra.mxu3 %v5607_v42 }
  0x27   : > { %v422_v56 = vrot.slane %v420_v48, 1  ;;  %v471_v57 = vsel %vm387_vm0, %v466_v49, %v470_v50  ;;  %v472_v3 = vshrl.u32 %v5832_v34, 16  ;;  %v520_v10 = vshrl.u32 %v5835_v35, 16  ;;  %v5608_v45 = vld [vmem:[%s7289_s1 + $0x40] sm:$0xff]  ;;  %2480 = vmatpush.bf16.msra.mxu1 %v5558_v43 }
  0x28   : > { %v519_v58 = vsel %vm387_vm0, %v514_v51, %v518_v52  ;;  %v567_v59 = vsel %vm387_vm0, %v562_v53, %v566_v54  ;;  %v568_v12 = vshrl.u32 %v5504_v36, 16  ;;  %v424_v14 = vshrl.u32 %v5840_v37, 16  ;;  %3843 = vmatpush.bf16.msra.mxu0 %v5608_v45  ;;  %v1713_v53 = vld [vmem:[%s5736_s30 + $0xc] sm:$0xff]  }
  0x29   : > { %4850 = vmatmul.msk.bf16.gmra.mxu1 %vm590_vm1, %v455_v61  ;;  %v423_v60 = vsel %vm387_vm0, %v418_v55, %v422_v56  ;;  %v5856_v61 = vld [vmem:[%s5736_s30 + $0x58] sm:$0xff]  ;;  %v474_v18 = vor.u32 %v472_v3, %v470_v50  ;;  %v522_v20 = vor.u32 %v520_v10, %v518_v52  ;;  %v5617_v3 = vld [vmem:[%s5736_s30] sm:$0xf0]  ;;  %v1891_v10 = vshll.u32 %v1713_v53, 16 }
  0x2a   : > { %4856 = vmatmul.msk.bf16.gmra.mxu2 %vm590_vm1, %v503_v62  ;;  %4862 = vmatmul.msk.bf16.gmra.mxu3 %vm590_vm1, %v551_v63  ;;  %v5859_v62 = vld [vmem:[%s5736_s30 + $0x88] sm:$0xff]  ;;  %v5505_v63 = vld [vmem:[%s5736_s30 + $0xb8] sm:$0xff]  ;;  %v476_v9 = vshll.u32 %v5856_v61, 16  ;;  %v570_v24 = vor.u32 %v568_v12, %v566_v54  ;;  %v426_v28 = vor.u32 %v424_v14, %v422_v56  ;;  %v480_v46 = vshrl.u32 %v5856_v61, 16  ;;  %v5901_v54 = vld [vmem:[%s5736_s30 + $0xc] sm:$0xf0] }
  0x2b   : > { %v524_v11 = vshll.u32 %v5859_v62, 16  ;;  %v572_v13 = vshll.u32 %v5505_v63, 16  ;;  %v528_v47 = vshrl.u32 %v5859_v62, 16  ;;  %v576_v48 = vshrl.u32 %v5505_v63, 16 }
  0x2c   : > { %v478_v19 = vrot.slane %v476_v9, 1  ;;  %v5618_v9 = vld [vmem:[%s5736_s30] sm:$0xe]  ;;  %v1893_v12 = vrot.slane %v1891_v10, 1  ;;  %v988_v42 = vrot.slane %v5816_v4, 1 }
  0x2d   : > { %4844 = vmatmul.msk.bf16.gmra.mxu0 %vm590_vm1, %v407_v0  ;;  %v5864_v0 = vld [vmem:[%s5736_s30 + $0x28] sm:$0xff]  ;;  %v526_v22 = vrot.slane %v524_v11, 1  ;;  %v574_v25 = vrot.slane %v572_v13, 1  ;;  %v5619_v11 = vor.u32 %v5618_v9, %v5617_v3 }
  0x2e   : > { %v428_v17 = vshll.u32 %v5864_v0, 16  ;;  %v432_v50 = vshrl.u32 %v5864_v0, 16  ;;  %v482_v51 = vor.u32 %v480_v46, %v478_v19 }
  0x2f   : > { %v530_v52 = vor.u32 %v528_v47, %v526_v22  ;;  %v578_v55 = vor.u32 %v576_v48, %v574_v25  ;;  %v983_v14 = vrot.slane %v5619_v11, 1  ;;  %v5511_v47 = vld [vmem:[%s5736_s30 + $0x1c] sm:$0xff] }
  0x30   : > { %v430_v29 = vrot.slane %v428_v17, 1  ;;  %v984_v17 = vrot.slane %v5760_v16, 1 }
  0x32   : > { %v431_v36 = vsel %vm387_vm0, %v426_v28, %v430_v29  ;;  %v986_v28 = vrot.slane %v5792_v44, 1 }
  0x39   : > { %4851 = vmatmul.msk.bf16.gmra.mxu1 %vm590_vm1, %v463_v30  ;;  %v479_v30 = vsel %vm387_vm0, %v474_v18, %v478_v19  ;;  %v985_v19 = vsel %vm982_vm2, %v983_v14, %v984_v17 }
  0x3a   : > { %4857 = vmatmul.msk.bf16.gmra.mxu2 %vm590_vm1, %v511_v31  ;;  %4863 = vmatmul.msk.bf16.gmra.mxu3 %vm590_vm1, %v559_v32  ;;  %v527_v31 = vsel %vm387_vm0, %v522_v20, %v526_v22  ;;  %v575_v32 = vsel %vm387_vm0, %v570_v24, %v574_v25  ;;  %v5509_v20 = vld [vmem:[%s5736_s30 + $0xc] sm:$0xff]  ;;  %v5535_v24 = vld [vmem:[%s5736_s30 + $0x1c] sm:$0xff] }
  0x3d   : > { %4845 = vmatmul.msk.bf16.gmra.mxu0 %vm590_vm1, %v415_v33  ;;  %v361_v33 = vunpack.c.l.b16 %v260_v27  ;;  %v1904_v27 = vshll.u32 %v5535_v24, 16 }
  0x3f   : > { %v5883_v39 = vpack.c.b16 %v361_v33, %v361_v33  ;;  %v5536_v33 = vld [vmem:[%s5736_s30 + $0x24] sm:$0xff] }
  0x40   : > { %v1912_v38 = vshll.u32 %v5536_v33, 16 }
  0x41   : > { %v580_v49 = vshll.u32 %v5883_v39, 16 }
  0x42   : > { %v1914_v45 = vrot.slane %v1912_v38, 1 }
  0x43   : > { %v582_v56 = vrot.slane %v580_v49, 1 }
  0x49   : > { %4852 = vmatmul.msk.bf16.gmra.mxu1 %vm590_vm1, %v471_v57  ;;  %v434_v57 = vor.u32 %v432_v50, %v430_v29 }
  0x4a   : > { %4858 = vmatmul.msk.bf16.gmra.mxu2 %vm590_vm1, %v519_v58  ;;  %4864 = vmatmul.msk.bf16.gmra.mxu3 %vm590_vm1, %v567_v59  ;;  %v487_v58 = vsel %vm387_vm0, %v482_v51, %v5766_v23  ;;  %v535_v59 = vsel %vm387_vm0, %v530_v52, %v5768_v26  ;;  %v5534_v23 = vld [vmem:[%s5736_s30 + $0x14] sm:$0xff]  ;;  %v1889_v26 = vshrl.u32 %v1713_v53, 16  ;;  %v5537_v52 = vld [vmem:[%s5736_s30 + $0x2c] sm:$0xff] }
  0x4b   : > { %v439_v63 = vsel %vm387_vm0, %v434_v57, %v5764_v21  ;;  %v1896_v13 = vshll.u32 %v5534_v23, 16  ;;  %v1900_v25 = vshrl.u32 %v5534_v23, 16  ;;  %v990_v57 = vrot.slane %v5840_v37, 1  ;;  %v5512_v23 = vld [vmem:[%s5736_s30 + $0x24] sm:$0xff] }
  0x4c   : > { %v1894_v18 = vor.u32 %v1893_v12, %v1889_v26 }
  0x4d   : > { %4846 = vmatmul.msk.bf16.gmra.mxu0 %vm590_vm1, %v423_v60  ;;  %v583_v60 = vsel %vm387_vm0, %v578_v55, %v582_v56  ;;  %v1898_v21 = vrot.slane %v1896_v13, 1  ;;  %v1916_v56 = vshrl.u32 %v5536_v33, 16  ;;  %v991_v9 = vsel %vm982_vm2, %v988_v42, %v990_v57  ;;  %v5538_v13 = vld [vmem:[%s5736_s30 + $0x34] sm:$0xff] }
  0x4e   : > { %v1932_v38 = vshrl.u32 %v5538_v13, 16 }
  0x4f   : > { %v1899_v22 = vsel %vm387_vm0, %v1894_v18, %v1898_v21  ;;  %v1902_v29 = vor.u32 %v1900_v25, %v1898_v21  ;;  %v1924_v18 = vshrl.u32 %v5537_v52, 16  ;;  %v992_v21 = vrot.slane %v5864_v0, 1 }
  0x59   : > { %4853 = vmatmul.msk.bf16.gmra.mxu1 %vm590_vm1, %v479_v30  ;;  %v1906_v30 = vrot.slane %v1904_v27, 1  ;;  %v993_v27 = vsel %vm982_vm2, %v990_v57, %v992_v21 }
  0x5a   : > { %4859 = vmatmul.msk.bf16.gmra.mxu2 %vm590_vm1, %v527_v31  ;;  %4865 = vmatmul.msk.bf16.gmra.mxu3 %vm590_vm1, %v575_v32  ;;  %v987_v31 = vsel %vm982_vm2, %v984_v17, %v986_v28 }
  0x5b   : > { %v1907_v32 = vsel %vm387_vm0, %v1902_v29, %v1906_v30 }
  0x5d   : > { %4847 = vmatmul.msk.bf16.gmra.mxu0 %vm590_vm1, %v431_v36  ;;  %v1908_v36 = vshrl.u32 %v5535_v24, 16 }
  0x5f   : > { %v1910_v43 = vor.u32 %v1908_v36, %v1906_v30 }
  0x61   : > { %v1915_v49 = vsel %vm387_vm0, %v1910_v43, %v1914_v45 }
  0x69   : > { %4854 = vmatmul.msk.bf16.gmra.mxu1 %vm590_vm1, %v487_v58 }
  0x6a   : > { %4860 = vmatmul.msk.bf16.gmra.mxu2 %vm590_vm1, %v535_v59  ;;  %4866 = vmatmul.msk.bf16.gmra.mxu3 %vm590_vm1, %v583_v60  ;;  %v1918_v60 = vor.u32 %v1916_v56, %v1914_v45  ;;  %v5514_v56 = vld [vmem:[%s5736_s30 + $0x34] sm:$0xff] }
  0x6d   : > { %4848 = vmatmul.msk.bf16.gmra.mxu0 %vm590_vm1, %v439_v63 }
  0x79   : > { %4871 = vmatmul.msk.bf16.vlgmr.msrb.gmra.mxu1 %vm590_vm1, %v5757_v15  ;;  %v5510_v15 = vld [vmem:[%s5736_s30 + $0x14] sm:$0xff] }
  0x7a   : > { %4901 = vmatmul.msk.bf16.vlgmr.msrb.gmra.mxu2 %vm590_vm1, %v985_v19  ;;  %5027 = vmatmul.msk.bf16.vlgmr.msrb.gmra.mxu3 %vm590_vm1, %v5509_v20 }
  0x7d   : > { %5149 = vmatmul.msk.bf16.vlgmr.msrb.gmra.mxu0 %vm590_vm1, %v1899_v22 }
  0x89   : > { %4872 = vmatmul.msk.bf16.gmra.mxu1 %vm590_vm1, %v5760_v16  ;;  %v989_v16 = vsel %vm982_vm2, %v986_v28, %v988_v42  ;;  %v5513_v28 = vld [vmem:[%s5736_s30 + $0x2c] sm:$0xff]  ;;  %v994_v42 = vrot.slane %v5739_v5, 1 }
  0x8a   : > { %4902 = vmatmul.msk.bf16.gmra.mxu2 %vm590_vm1, %v987_v31  ;;  %5028 = vmatmul.msk.bf16.gmra.mxu3 %vm590_vm1, %v5510_v15 }
  0x8d   : > { %5150 = vmatmul.msk.bf16.gmra.mxu0 %vm590_vm1, %v1907_v32  ;;  %v5539_v32 = vld [vmem:[%s5736_s30 + $0x3c] sm:$0xff] }
  0x96   : > { %v5938_v46 = vpop.f32.mrf.mxu1 }
  0x99   : > { %4873 = vmatmul.msk.bf16.gmra.mxu1 %vm590_vm1, %v5792_v44  ;;  %v1920_v44 = vshll.u32 %v5537_v52, 16  ;;  %v995_v52 = vsel %vm982_vm2, %v992_v21, %v994_v42 }
  0x9a   : > { %v5942_v48 = vpop.f32.mrf.mxu0  ;;  %4903 = vmatmul.msk.bf16.gmra.mxu2 %vm590_vm1, %v989_v16  ;;  %5029 = vmatmul.msk.bf16.gmra.mxu3 %vm590_vm1, %v5511_v47 }
  0x9b   : > { %v1922_v63 = vrot.slane %v1920_v44, 1 }
  0x9d   : > { %5151 = vmatmul.msk.bf16.gmra.mxu0 %vm590_vm1, %v1915_v49  ;;  %v5950_v50 = vpop.f32.mrf.mxu2  ;;  %v5952_v51 = vpop.f32.mrf.mxu3  ;;  %v1923_v11 = vsel %vm387_vm0, %v1918_v60, %v1922_v63  ;;  %v1926_v22 = vor.u32 %v1924_v18, %v1922_v63  ;;  %v996_v18 = vrot.slane %v5742_v6, 1 }
  0x9e   : > { %7295 = vst [vmem:[#allocation2_spill] sm:$0xff] %v5952_v51  ;;  %v5955_v53 = vpop.f32.mrf.mxu1 }
  0xa2   : > { %v5957_v55 = vpop.f32.mrf.mxu0 }
  0xa5   : > { %v5960_v58 = vpop.f32.mrf.mxu2  ;;  %v5962_v59 = vpop.f32.mrf.mxu3 }
  0xa6   : > { %7296 = vst [vmem:[#allocation3_spill] sm:$0xff] %v5962_v59  ;;  %v5964_v3 = vpop.f32.mrf.mxu1 }
  0xa9   : > { %4874 = vmatmul.msk.bf16.gmra.mxu1 %vm590_vm1, %v5816_v4  ;;  %v1928_v4 = vshll.u32 %v5538_v13, 16  ;;  %v1940_v13 = vshrl.u32 %v5539_v32, 16 }
  0xaa   : > { %v5968_v10 = vpop.f32.mrf.mxu0  ;;  %4904 = vmatmul.msk.bf16.gmra.mxu2 %vm590_vm1, %v991_v9  ;;  %5030 = vmatmul.msk.bf16.gmra.mxu3 %vm590_vm1, %v5512_v23  ;;  %v5540_v9 = vld [vmem:[%s5736_s30 + $0x44] sm:$0xff] }
  0xab   : > { %v1930_v24 = vrot.slane %v1928_v4, 1 }
  0xad   : > { %5152 = vmatmul.msk.bf16.gmra.mxu0 %vm590_vm1, %v1923_v11  ;;  %v5976_v26 = vpop.f32.mrf.mxu2  ;;  %v5978_v12 = vpop.f32.mrf.mxu3  ;;  %v1931_v30 = vsel %vm387_vm0, %v1926_v22, %v1930_v24  ;;  %v1934_v16 = vor.u32 %v1932_v38, %v1930_v24 }
  0xae   : > { %7297 = vst [vmem:[#allocation4_spill] sm:$0xff] %v5978_v12  ;;  %v5981_v14 = vpop.f32.mrf.mxu1 }
  0xb2   : > { %v5983_v17 = vpop.f32.mrf.mxu0 }
  0xb5   : > { %v5986_v19 = vpop.f32.mrf.mxu2  ;;  %v5988_v20 = vpop.f32.mrf.mxu3 }
  0xb6   : > { %7298 = vst [vmem:[#allocation5_spill] sm:$0xff] %v5988_v20  ;;  %v5990_v25 = vpop.f32.mrf.mxu1 }
  0xb9   : > { %4875 = vmatmul.msk.bf16.gmra.mxu1 %vm590_vm1, %v5840_v37  ;;  %v1936_v37 = vshll.u32 %v5539_v32, 16 }
  0xba   : > { %v5994_v29 = vpop.f32.mrf.mxu0  ;;  %4905 = vmatmul.msk.bf16.gmra.mxu2 %vm590_vm1, %v993_v27  ;;  %5031 = vmatmul.msk.bf16.gmra.mxu3 %vm590_vm1, %v5513_v28  ;;  %v997_v28 = vsel %vm982_vm2, %v994_v42, %v996_v18  ;;  %v5541_v42 = vld [vmem:[%s5736_s30 + $0x4c] sm:$0xff] }
  0xbb   : > { %v1938_v47 = vrot.slane %v1936_v37, 1 }
  0xbd   : > { %5153 = vmatmul.msk.bf16.gmra.mxu0 %vm590_vm1, %v1931_v30  ;;  %v6002_v31 = vpop.f32.mrf.mxu2  ;;  %v6004_v15 = vpop.f32.mrf.mxu3  ;;  %v1939_v57 = vsel %vm387_vm0, %v1934_v16, %v1938_v47  ;;  %v1942_v22 = vor.u32 %v1940_v13, %v1938_v47  ;;  %v5515_v30 = vld [vmem:[%s5736_s30 + $0x3c] sm:$0xff] }
  0xbe   : > { %7299 = vst [vmem:[#allocation6_spill] sm:$0xff] %v6004_v15  ;;  %v6007_v33 = vpop.f32.mrf.mxu1 }
  0xc2   : > { %v6009_v36 = vpop.f32.mrf.mxu0 }
  0xc5   : > { %v6012_v43 = vpop.f32.mrf.mxu2  ;;  %v6014_v45 = vpop.f32.mrf.mxu3 }
  0xc6   : > { %7300 = vst [vmem:[#allocation7_spill] sm:$0xff] %v6014_v45  ;;  %v6016_v49 = vpop.f32.mrf.mxu1 }
  0xc9   : > { %4876 = vmatmul.msk.bf16.gmra.mxu1 %vm590_vm1, %v5864_v0  ;;  %v1944_v0 = vshll.u32 %v5540_v9, 16 }
  0xca   : > { %v6020_v44 = vpop.f32.mrf.mxu0  ;;  %4906 = vmatmul.msk.bf16.gmra.mxu2 %vm590_vm1, %v995_v52  ;;  %5032 = vmatmul.msk.bf16.gmra.mxu3 %vm590_vm1, %v5514_v56  ;;  %v1948_v56 = vshrl.u32 %v5540_v9, 16 }
  0xcb   : > { %v1946_v24 = vrot.slane %v1944_v0, 1 }
  0xcd   : > { %5154 = vmatmul.msk.bf16.gmra.mxu0 %vm590_vm1, %v1939_v57  ;;  %v6028_v60 = vpop.f32.mrf.mxu2  ;;  %v6030_v63 = vpop.f32.mrf.mxu3  ;;  %v1947_v32 = vsel %vm387_vm0, %v1942_v22, %v1946_v24  ;;  %v998_v57 = vrot.slane %v5783_v40, 1  ;;  %v1950_v22 = vor.u32 %v1948_v56, %v1946_v24 }
  0xce   : > { %7301 = vst [vmem:[#allocation8_spill] sm:$0xff] %v6030_v63  ;;  %v6033_v23 = vpop.f32.mrf.mxu1  ;;  %v1956_v63 = vshrl.u32 %v5541_v42, 16 }
  0xd2   : > { %v6035_v11 = vpop.f32.mrf.mxu0 }
  0xd5   : > { %v6038_v4 = vpop.f32.mrf.mxu2  ;;  %v6040_v21 = vpop.f32.mrf.mxu3 }
  0xd6   : > { %7302 = vst [vmem:[#allocation9_spill] sm:$0xff] %v6038_v4  ;;  %v6042_v27 = vpop.f32.mrf.mxu1  ;;  %v5518_v4 = vld [vmem:[%s5736_s30 + $0x54] sm:$0xff] }
  0xd7   : > { %7303 = vst [vmem:[#allocation10_spill] sm:$0xff] %v6040_v21 }
  0xd9   : > { %4877 = vmatmul.msk.bf16.gmra.mxu1 %vm590_vm1, %v5739_v5  ;;  %v1952_v5 = vshll.u32 %v5541_v42, 16 }
  0xda   : > { %v6046_v38 = vpop.f32.mrf.mxu0  ;;  %4907 = vmatmul.msk.bf16.gmra.mxu2 %vm590_vm1, %v997_v28  ;;  %5033 = vmatmul.msk.bf16.gmra.mxu3 %vm590_vm1, %v5515_v30 }
  0xdb   : > { %v1954_v28 = vrot.slane %v1952_v5, 1 }
  0xdd   : > { %5155 = vmatmul.msk.bf16.gmra.mxu0 %vm590_vm1, %v1947_v32  ;;  %v6054_v37 = vpop.f32.mrf.mxu2  ;;  %v6056_v16 = vpop.f32.mrf.mxu3  ;;  %v999_v32 = vsel %vm982_vm2, %v996_v18, %v998_v57  ;;  %v1955_v9 = vsel %vm387_vm0, %v1950_v22, %v1954_v28  ;;  %v5542_v18 = vld [vmem:[%s5736_s30 + $0x54] sm:$0xff] }
  0xde   : > { %7304 = vst [vmem:[#allocation11_spill] sm:$0xff] %v6054_v37  ;;  %v6059_v47 = vpop.f32.mrf.mxu1 }
  0xdf   : > { %7305 = vst [vmem:[#allocation12_spill] sm:$0xff] %v6056_v16  ;;  %v5516_v16 = vld [vmem:[%s5736_s30 + $0x44] sm:$0xff] }
  0xe2   : > { %v6061_v52 = vpop.f32.mrf.mxu0 }
  0xe5   : > { %v6064_v13 = vpop.f32.mrf.mxu2  ;;  %v6066_v0 = vpop.f32.mrf.mxu3 }
  0xe6   : > { %7306 = vst [vmem:[#allocation13_spill] sm:$0xff] %v6064_v13  ;;  %v6068_v30 = vpop.f32.mrf.mxu1 }
  0xe7   : > { %7307 = vst [vmem:[#allocation14_spill] sm:$0xff] %v6066_v0 }
  0xe9   : > { %4878 = vmatmul.msk.bf16.gmra.mxu1 %vm590_vm1, %v5742_v6  ;;  %v1960_v6 = vshll.u32 %v5542_v18, 16 }
  0xea   : > { %v6072_v21 = vpop.f32.mrf.mxu0  ;;  %4908 = vmatmul.msk.bf16.gmra.mxu2 %vm590_vm1, %v999_v32  ;;  %5034 = vmatmul.msk.bf16.gmra.mxu3 %vm590_vm1, %v5516_v16  ;;  %v1000_v32 = vrot.slane %v5808_v1, 1  ;;  %v1958_v16 = vor.u32 %v1956_v63, %v1954_v28 }
  0xec   : > { %v1001_v20 = vsel %vm982_vm2, %v998_v57, %v1000_v32 }
  0xed   : > { %5156 = vmatmul.msk.bf16.gmra.mxu0 %vm590_vm1, %v1955_v9  ;;  %v6080_v24 = vpop.f32.mrf.mxu2  ;;  %v6082_v56 = vpop.f32.mrf.mxu3  ;;  %v1962_v9 = vrot.slane %v1960_v6, 1 }
  0xee   : > { %7308 = vst [vmem:[#allocation15_spill] sm:$0xff] %v6080_v24  ;;  %v6085_v5 = vpop.f32.mrf.mxu1  ;;  %v1964_v24 = vshrl.u32 %v5542_v18, 16 }
  0xef   : > { %7309 = vst [vmem:[#allocation16_spill] sm:$0xff] %v6082_v56  ;;  %v5517_v56 = vld [vmem:[%s5736_s30 + $0x4c] sm:$0xff]  ;;  %v1963_v42 = vsel %vm387_vm0, %v1958_v16, %v1962_v9 }
  0xf2   : > { %v6087_v0 = vpop.f32.mrf.mxu0 }
  0xf5   : > { %v6090_v45 = vpop.f32.mrf.mxu2  ;;  %v6092_v22 = vpop.f32.mrf.mxu3 }
  0xf6   : > { %7310 = vst [vmem:[#allocation17_spill] sm:$0xff] %v6090_v45  ;;  %v855_v15 = vpop.f32.mrf.mxu1 }
  0xf7   : > { %7311 = vst [vmem:[#allocation18_spill] sm:$0xff] %v6092_v22  ;;  %v856_v59 = vadd.f32 %v855_v15, %v5942_v48  ;;  %v5543_v22 = vld [vmem:[%s5736_s30 + $0x5c] sm:$0xff] }
  0xf9   : > { %4879 = vmatmul.msk.bf16.gmra.mxu1 %vm590_vm1, %v5783_v40  ;;  %v1968_v40 = vshll.u32 %v5543_v22, 16 }
  0xfa   : > { %v2171_v12 = vpop.f32.mrf.mxu0  ;;  %4909 = vmatmul.msk.bf16.gmra.mxu2 %vm590_vm1, %v1001_v20  ;;  %5035 = vmatmul.msk.bf16.gmra.mxu3 %vm590_vm1, %v5517_v56  ;;  %v1002_v20 = vrot.slane %v5832_v34, 1 }
  0xfb   : > { %v1970_v37 = vrot.slane %v1968_v40, 1 }
  0xfd   : > { %5157 = vmatmul.msk.bf16.gmra.mxu0 %vm590_vm1, %v1963_v42  ;;  %v1119_v63 = vpop.f32.mrf.mxu2  ;;  %v1545_v6 = vpop.f32.mrf.mxu3  ;;  %v1966_v42 = vor.u32 %v1964_v24, %v1962_v9  ;;  %v5544_v9 = vld [vmem:[%s5736_s30 + $0x64] sm:$0xff] }
  0xfe   : > { %v1239_v28 = vadd.f32 %v1119_v63, %v856_v59  ;;  %v857_v57 = vpop.f32.mrf.mxu1  ;;  %v1003_v63 = vsel %vm982_vm2, %v1000_v32, %v1002_v20 }
  0xff   : > { %v858_v56 = vadd.f32 %v857_v57, %v5957_v55 }
 0x100   : > { %v1665_v51 = vadd.f32 %v1545_v6, %v1239_v28 }
 0x102   : > { %v2173_v45 = vpop.f32.mrf.mxu0  ;;  %v6104_v13 = vadd.f32 %v2171_v12, %v1665_v51  ;;  %v1971_v51 = vsel %vm387_vm0, %v1966_v42, %v1970_v37 }
 0x105   : > { %v1121_v16 = vpop.f32.mrf.mxu2  ;;  %v1547_v15 = vpop.f32.mrf.mxu3 }
 0x106   : > { %v1240_v48 = vadd.f32 %v1121_v16, %v858_v56  ;;  %v860_v59 = vpop.f32.mrf.mxu1  ;;  %v1972_v56 = vshrl.u32 %v5543_v22, 16  ;;  %v1976_v16 = vshll.u32 %v5544_v9, 16 }
 0x107   : > { %v861_v12 = vadd.f32 %v860_v59, %v5968_v10 }
 0x108   : > { %v1666_v28 = vadd.f32 %v1547_v15, %v1240_v48  ;;  %v1974_v59 = vor.u32 %v1972_v56, %v1970_v37 }
 0x109   : > { %4880 = vmatmul.msk.bf16.gmra.mxu1 %vm590_vm1, %v5808_v1 }
 0x10a   : > { %v2176_v6 = vpop.f32.mrf.mxu0  ;;  %4910 = vmatmul.msk.bf16.gmra.mxu2 %vm590_vm1, %v1003_v63  ;;  %v6114_v55 = vadd.f32 %v2173_v45, %v1666_v28  ;;  %5036 = vmatmul.msk.bf16.gmra.mxu3 %vm590_vm1, %v5518_v4  ;;  %v1004_v45 = vrot.slane %v5856_v61, 1  ;;  %v1978_v63 = vrot.slane %v1976_v16, 1  ;;  %v1980_v16 = vshrl.u32 %v5544_v9, 16 }
 0x10c   : > { %v1979_v22 = vsel %vm387_vm0, %v1974_v59, %v1978_v63 }
 0x10d   : > { %5158 = vmatmul.msk.bf16.gmra.mxu0 %vm590_vm1, %v1971_v51  ;;  %v1124_v24 = vpop.f32.mrf.mxu2  ;;  %v1550_v32 = vpop.f32.mrf.mxu3  ;;  %v1005_v51 = vsel %vm982_vm2, %v1002_v20, %v1004_v45 }
 0x10e   : > { %v1241_v18 = vadd.f32 %v1124_v24, %v861_v12  ;;  %v862_v57 = vpop.f32.mrf.mxu1  ;;  %v5519_v12 = vld [vmem:[%s5736_s30 + $0x5c] sm:$0xff] }
 0x10f   : > { %v863_v4 = vadd.f32 %v862_v57, %v5983_v17  ;;  %v5545_v57 = vld [vmem:[%s5736_s30 + $0x6c] sm:$0xff] }
 0x110   : > { %v1667_v40 = vadd.f32 %v1550_v32, %v1241_v18 }
 0x112   : > { %v2178_v1 = vpop.f32.mrf.mxu0  ;;  %v6120_v48 = vadd.f32 %v2176_v6, %v1667_v40 }
 0x115   : > { %v1126_v15 = vpop.f32.mrf.mxu2  ;;  %v1552_v42 = vpop.f32.mrf.mxu3 }
 0x116   : > { %v1242_v10 = vadd.f32 %v1126_v15, %v863_v4  ;;  %v865_v28 = vpop.f32.mrf.mxu1  ;;  %v1984_v4 = vshll.u32 %v5545_v57, 16 }
 0x117   : > { %v866_v37 = vadd.f32 %v865_v28, %v5994_v29  ;;  %v1982_v28 = vor.u32 %v1980_v16, %v1978_v63  ;;  %v1988_v16 = vshrl.u32 %v5545_v57, 16 }
 0x118   : > { %v1668_v24 = vadd.f32 %v1552_v42, %v1242_v10 }
 0x119   : > { %4881 = vmatmul.msk.bf16.gmra.mxu1 %vm590_vm1, %v5832_v34 }
 0x11a   : > { %v2181_v18 = vpop.f32.mrf.mxu0  ;;  %4911 = vmatmul.msk.bf16.gmra.mxu2 %vm590_vm1, %v1005_v51  ;;  %v6130_v17 = vadd.f32 %v2178_v1, %v1668_v24  ;;  %5037 = vmatmul.msk.bf16.gmra.mxu3 %vm590_vm1, %v5519_v12  ;;  %v1006_v1 = vrot.slane %v5745_v7, 1  ;;  %v1986_v51 = vrot.slane %v1984_v4, 1 }
 0x11c   : > { %v1007_v24 = vsel %vm982_vm2, %v1004_v45, %v1006_v1  ;;  %v1987_v9 = vsel %vm387_vm0, %v1982_v28, %v1986_v51  ;;  %v1990_v28 = vor.u32 %v1988_v16, %v1986_v51 }
 0x11d   : > { %5159 = vmatmul.msk.bf16.gmra.mxu0 %vm590_vm1, %v1979_v22  ;;  %v1129_v6 = vpop.f32.mrf.mxu2  ;;  %v1555_v32 = vpop.f32.mrf.mxu3  ;;  %v5520_v22 = vld [vmem:[%s5736_s30 + $0x64] sm:$0xff] }
 0x11e   : > { %v1243_v20 = vadd.f32 %v1129_v6, %v866_v37  ;;  %v867_v40 = vpop.f32.mrf.mxu1 }
 0x11f   : > { %v868_v10 = vadd.f32 %v867_v40, %v6009_v36 }
 0x120   : > { %v1669_v56 = vadd.f32 %v1555_v32, %v1243_v20  ;;  %v5546_v32 = vld [vmem:[%s5736_s30 + $0x74] sm:$0xff] }
 0x121   : > { %v1992_v4 = vshll.u32 %v5546_v32, 16 }
 0x122   : > { %v2183_v34 = vpop.f32.mrf.mxu0  ;;  %v6136_v15 = vadd.f32 %v2181_v18, %v1669_v56 }
 0x125   : > { %v1131_v42 = vpop.f32.mrf.mxu2  ;;  %v1557_v59 = vpop.f32.mrf.mxu3 }
 0x126   : > { %v1244_v29 = vadd.f32 %v1131_v42, %v868_v10  ;;  %v870_v12 = vpop.f32.mrf.mxu1 }
 0x127   : > { %v871_v63 = vadd.f32 %v870_v12, %v6020_v44  ;;  %v1994_v12 = vrot.slane %v1992_v4, 1 }
 0x128   : > { %v1670_v37 = vadd.f32 %v1557_v59, %v1244_v29 }
 0x129   : > { %4882 = vmatmul.msk.bf16.gmra.mxu1 %vm590_vm1, %v5856_v61  ;;  %v1995_v57 = vsel %vm387_vm0, %v1990_v28, %v1994_v12 }
 0x12a   : > { %v2186_v6 = vpop.f32.mrf.mxu0  ;;  %4912 = vmatmul.msk.bf16.gmra.mxu2 %vm590_vm1, %v1007_v24  ;;  %v6146_v36 = vadd.f32 %v2183_v34, %v1670_v37  ;;  %5038 = vmatmul.msk.bf16.gmra.mxu3 %vm590_vm1, %v5520_v22  ;;  %v1008_v34 = vrot.slane %v5748_v8, 1  ;;  %v5521_v37 = vld [vmem:[%s5736_s30 + $0x6c] sm:$0xff] }
 0x12c   : > { %v1009_v22 = vsel %vm982_vm2, %v1006_v1, %v1008_v34 }
 0x12d   : > { %5160 = vmatmul.msk.bf16.gmra.mxu0 %vm590_vm1, %v1987_v9  ;;  %v1134_v18 = vpop.f32.mrf.mxu2  ;;  %v1560_v20 = vpop.f32.mrf.mxu3 }
 0x12e   : > { %v1245_v45 = vadd.f32 %v1134_v18, %v871_v63  ;;  %v872_v40 = vpop.f32.mrf.mxu1 }
 0x12f   : > { %v873_v42 = vadd.f32 %v872_v40, %v6035_v11 }
 0x130   : > { %v1671_v56 = vadd.f32 %v1560_v20, %v1245_v45  ;;  %v5547_v45 = vld [vmem:[%s5736_s30 + $0x7c] sm:$0xff] }
 0x131   : > { %v2000_v16 = vshll.u32 %v5547_v45, 16 }
 0x132   : > { %v2188_v61 = vpop.f32.mrf.mxu0  ;;  %v6152_v10 = vadd.f32 %v2186_v6, %v1671_v56  ;;  %v1996_v56 = vshrl.u32 %v5546_v32, 16 }
 0x133   : > { %v2002_v28 = vrot.slane %v2000_v16, 1 }
 0x135   : > { %v1136_v29 = vpop.f32.mrf.mxu2  ;;  %v1562_v59 = vpop.f32.mrf.mxu3 }
 0x136   : > { %v1246_v44 = vadd.f32 %v1136_v29, %v873_v42  ;;  %v875_v24 = vpop.f32.mrf.mxu1 }
 0x137   : > { %v876_v51 = vadd.f32 %v875_v24, %v6046_v38 }
 0x138   : > { %v1672_v9 = vadd.f32 %v1562_v59, %v1246_v44  ;;  %v1998_v59 = vor.u32 %v1996_v56, %v1994_v12 }
 0x139   : > { %4883 = vmatmul.msk.bf16.gmra.mxu1 %vm590_vm1, %v5745_v7 }
 0x13a   : > { %v2191_v63 = vpop.f32.mrf.mxu0  ;;  %4913 = vmatmul.msk.bf16.gmra.mxu2 %vm590_vm1, %v1009_v22  ;;  %v6162_v11 = vadd.f32 %v2188_v61, %v1672_v9  ;;  %5039 = vmatmul.msk.bf16.gmra.mxu3 %vm590_vm1, %v5521_v37  ;;  %v1010_v61 = vrot.slane %v5786_v41, 1  ;;  %v5522_v37 = vld [vmem:[%s5736_s30 + $0x74] sm:$0xff]  ;;  %v2003_v32 = vsel %vm387_vm0, %v1998_v59, %v2002_v28 }
 0x13c   : > { %v1011_v22 = vsel %vm982_vm2, %v1008_v34, %v1010_v61 }
 0x13d   : > { %5161 = vmatmul.msk.bf16.gmra.mxu0 %vm590_vm1, %v1995_v57  ;;  %v1139_v6 = vpop.f32.mrf.mxu2  ;;  %v1565_v18 = vpop.f32.mrf.mxu3 }
 0x13e   : > { %v1247_v1 = vadd.f32 %v1139_v6, %v876_v51  ;;  %v877_v20 = vpop.f32.mrf.mxu1  ;;  %v5548_v6 = vld [vmem:[%s5736_s30 + $0x84] sm:$0xff] }
 0x13f   : > { %v878_v42 = vadd.f32 %v877_v20, %v6061_v52  ;;  %v2004_v20 = vshrl.u32 %v5547_v45, 16 }
 0x140   : > { %v1673_v40 = vadd.f32 %v1565_v18, %v1247_v1 }
 0x142   : > { %v2193_v7 = vpop.f32.mrf.mxu0  ;;  %v6168_v4 = vadd.f32 %v2191_v63, %v1673_v40  ;;  %v2008_v40 = vshll.u32 %v5548_v6, 16 }
 0x145   : > { %v1141_v29 = vpop.f32.mrf.mxu2  ;;  %v1567_v44 = vpop.f32.mrf.mxu3 }
 0x146   : > { %v1248_v38 = vadd.f32 %v1141_v29, %v878_v42  ;;  %v880_v24 = vpop.f32.mrf.mxu1 }
 0x147   : > { %v881_v12 = vadd.f32 %v880_v24, %v6072_v21 }
 0x148   : > { %v1674_v9 = vadd.f32 %v1567_v44, %v1248_v38  ;;  %v2006_v38 = vor.u32 %v2004_v20, %v2002_v28  ;;  %v2010_v44 = vrot.slane %v2008_v40, 1 }
 0x149   : > { %4884 = vmatmul.msk.bf16.gmra.mxu1 %vm590_vm1, %v5748_v8 }
 0x14a   : > { %v2196_v57 = vpop.f32.mrf.mxu0  ;;  %4914 = vmatmul.msk.bf16.gmra.mxu2 %vm590_vm1, %v1011_v22  ;;  %v6178_v52 = vadd.f32 %v2193_v7, %v1674_v9  ;;  %5040 = vmatmul.msk.bf16.gmra.mxu3 %vm590_vm1, %v5522_v37  ;;  %v1012_v7 = vrot.slane %v5811_v2, 1  ;;  %v5523_v22 = vld [vmem:[%s5736_s30 + $0x7c] sm:$0xff]  ;;  %v2011_v45 = vsel %vm387_vm0, %v2006_v38, %v2010_v44 }
 0x14c   : > { %v1013_v24 = vsel %vm982_vm2, %v1010_v61, %v1012_v7 }
 0x14d   : > { %5162 = vmatmul.msk.bf16.gmra.mxu0 %vm590_vm1, %v2003_v32  ;;  %v1144_v63 = vpop.f32.mrf.mxu2  ;;  %v1570_v51 = vpop.f32.mrf.mxu3 }
 0x14e   : > { %v1249_v34 = vadd.f32 %v1144_v63, %v881_v12  ;;  %v882_v1 = vpop.f32.mrf.mxu1  ;;  %v5549_v12 = vld [vmem:[%s5736_s30 + $0x8c] sm:$0xff] }
 0x14f   : > { %v883_v16 = vadd.f32 %v882_v1, %v6087_v0  ;;  %v2016_v1 = vshll.u32 %v5549_v12, 16 }
 0x150   : > { %v1675_v18 = vadd.f32 %v1570_v51, %v1249_v34  ;;  %v2012_v51 = vshrl.u32 %v5548_v6, 16 }
 0x152   : > { %v2198_v8 = vpop.f32.mrf.mxu0  ;;  %v6184_v56 = vadd.f32 %v2196_v57, %v1675_v18 }
 0x155   : > { %v1146_v42 = vpop.f32.mrf.mxu2  ;;  %v1572_v29 = vpop.f32.mrf.mxu3 }
 0x156   : > { %v1250_v21 = vadd.f32 %v1146_v42, %v883_v16  ;;  %v885_v59 = vpop.f32.mrf.mxu1  ;;  %v2014_v42 = vor.u32 %v2012_v51, %v2010_v44 }
 0x157   : > { %v886_v28 = vadd.f32 %v885_v59, %v5938_v46  ;;  %v5524_v59 = vld [vmem:[%s5736_s30 + $0x84] sm:$0xff] }
 0x158   : > { %v1676_v37 = vadd.f32 %v1572_v29, %v1250_v21  ;;  %v2018_v21 = vrot.slane %v2016_v1, 1 }
 0x159   : > { %4885 = vmatmul.msk.bf16.gmra.mxu1 %vm590_vm1, %v5786_v41 }
 0x15a   : > { %v2201_v9 = vpop.f32.mrf.mxu0  ;;  %4915 = vmatmul.msk.bf16.gmra.mxu2 %vm590_vm1, %v1013_v24  ;;  %v6194_v0 = vadd.f32 %v2198_v8, %v1676_v37  ;;  %5041 = vmatmul.msk.bf16.gmra.mxu3 %vm590_vm1, %v5523_v22  ;;  %v1014_v8 = vrot.slane %v5835_v35, 1  ;;  %v2019_v6 = vsel %vm387_vm0, %v2014_v42, %v2018_v21  ;;  %v5525_v42 = vld [vmem:[%s5736_s30 + $0x8c] sm:$0xff] }
 0x15c   : > { %v1015_v38 = vsel %vm982_vm2, %v1012_v7, %v1014_v8 }
 0x15d   : > { %5163 = vmatmul.msk.bf16.gmra.mxu0 %vm590_vm1, %v2011_v45  ;;  %v1149_v57 = vpop.f32.mrf.mxu2  ;;  %v1575_v32 = vpop.f32.mrf.mxu3  ;;  %v5550_v45 = vld [vmem:[%s5736_s30 + $0x94] sm:$0xff] }
 0x15e   : > { %v1251_v61 = vadd.f32 %v1149_v57, %v886_v28  ;;  %v887_v63 = vpop.f32.mrf.mxu1 }
 0x15f   : > { %v888_v20 = vadd.f32 %v887_v63, %v5955_v53 }
 0x160   : > { %v1677_v34 = vadd.f32 %v1575_v32, %v1251_v61  ;;  %v2020_v61 = vshrl.u32 %v5549_v12, 16  ;;  %v2024_v32 = vshll.u32 %v5550_v45, 16 }
 0x162   : > { %v2203_v41 = vpop.f32.mrf.mxu0  ;;  %v6200_v18 = vadd.f32 %v2201_v9, %v1677_v34  ;;  %v1016_v34 = vrot.slane %v5859_v62, 1 }
 0x165   : > { %v1151_v40 = vpop.f32.mrf.mxu2  ;;  %v1577_v16 = vpop.f32.mrf.mxu3 }
 0x166   : > { %v1252_v46 = vadd.f32 %v1151_v40, %v888_v20  ;;  %v890_v29 = vpop.f32.mrf.mxu1  ;;  %v2022_v20 = vor.u32 %v2020_v61, %v2018_v21  ;;  %v2026_v40 = vrot.slane %v2024_v32, 1 }
 0x167   : > { %v891_v44 = vadd.f32 %v890_v29, %v5964_v3 }
 0x168   : > { %v1678_v24 = vadd.f32 %v1577_v16, %v1252_v46  ;;  %v1017_v16 = vsel %vm982_vm2, %v1014_v8, %v1016_v34 }
 0x169   : > { %4886 = vmatmul.msk.bf16.gmra.mxu1 %vm590_vm1, %v5811_v2 }
 0x16a   : > { %v2206_v22 = vpop.f32.mrf.mxu0  ;;  %4916 = vmatmul.msk.bf16.gmra.mxu2 %vm590_vm1, %v1015_v38  ;;  %v6210_v53 = vadd.f32 %v2203_v41, %v1678_v24  ;;  %5042 = vmatmul.msk.bf16.gmra.mxu3 %vm590_vm1, %v5524_v59 }
 0x16d   : > { %5164 = vmatmul.msk.bf16.gmra.mxu0 %vm590_vm1, %v2019_v6  ;;  %v1154_v37 = vpop.f32.mrf.mxu2  ;;  %v1580_v9 = vpop.f32.mrf.mxu3 }
 0x16e   : > { %v1253_v7 = vadd.f32 %v1154_v37, %v891_v44  ;;  %v892_v28 = vpop.f32.mrf.mxu1  ;;  %v2028_v37 = vshrl.u32 %v5550_v45, 16 }
 0x16f   : > { %v893_v41 = vadd.f32 %v892_v28, %v5981_v14  ;;  %v2027_v14 = vsel %vm387_vm0, %v2022_v20, %v2026_v40  ;;  %v5641_v28 = vld [vmem:[%s5736_s30 + $0x90] sm:$0xff] }
 0x170   : > { %v1679_v57 = vadd.f32 %v1580_v9, %v1253_v7  ;;  %v5526_v20 = vld [vmem:[%s5736_s30 + $0x94] sm:$0xff] }
 0x172   : > { %v2208_v2 = vpop.f32.mrf.mxu0  ;;  %v6216_v63 = vadd.f32 %v2206_v22, %v1679_v57  ;;  %v5551_v22 = vld [vmem:[%s5736_s30 + $0x9c] sm:$0xff]  ;;  %v1018_v57 = vrot.slane %v5641_v28, 1 }
 0x173   : > { %v2032_v7 = vshll.u32 %v5551_v22, 16 }
 0x175   : > { %v1156_v51 = vpop.f32.mrf.mxu2  ;;  %v1582_v1 = vpop.f32.mrf.mxu3 }
 0x176   : > { %v1254_v3 = vadd.f32 %v1156_v51, %v893_v41  ;;  %v895_v46 = vpop.f32.mrf.mxu1  ;;  %v2030_v41 = vor.u32 %v2028_v37, %v2026_v40  ;;  %v2034_v51 = vrot.slane %v2032_v7, 1 }
 0x177   : > { %v896_v21 = vadd.f32 %v895_v46, %v5990_v25 }
 0x178   : > { %v1680_v29 = vadd.f32 %v1582_v1, %v1254_v3  ;;  %v1019_v1 = vsel %vm982_vm2, %v1016_v34, %v1018_v57 }
 0x179   : > { %4887 = vmatmul.msk.bf16.gmra.mxu1 %vm590_vm1, %v5835_v35 }
 0x17a   : > { %v2211_v38 = vpop.f32.mrf.mxu0  ;;  %4917 = vmatmul.msk.bf16.gmra.mxu2 %vm590_vm1, %v1017_v16  ;;  %v6226_v12 = vadd.f32 %v2208_v2, %v1680_v29  ;;  %5043 = vmatmul.msk.bf16.gmra.mxu3 %vm590_vm1, %v5525_v42 }
 0x17d   : > { %5165 = vmatmul.msk.bf16.gmra.mxu0 %vm590_vm1, %v2027_v14  ;;  %v1159_v8 = vpop.f32.mrf.mxu2  ;;  %v1585_v24 = vpop.f32.mrf.mxu3 }
 0x17e   : > { %v1255_v59 = vadd.f32 %v1159_v8, %v896_v21  ;;  %v897_v6 = vpop.f32.mrf.mxu1  ;;  %v2036_v8 = vshrl.u32 %v5551_v22, 16 }
 0x17f   : > { %v898_v2 = vadd.f32 %v897_v6, %v6007_v33  ;;  %v2035_v33 = vsel %vm387_vm0, %v2030_v41, %v2034_v51  ;;  %v5642_v6 = vld [vmem:[%s5736_s30 + $0x98] sm:$0xff] }
 0x180   : > { %v1681_v35 = vadd.f32 %v1585_v24, %v1255_v59  ;;  %v5527_v41 = vld [vmem:[%s5736_s30 + $0x9c] sm:$0xff] }
 0x182   : > { %v2213_v44 = vpop.f32.mrf.mxu0  ;;  %v6232_v9 = vadd.f32 %v2211_v38, %v1681_v35  ;;  %v5552_v38 = vld [vmem:[%s5736_s30 + $0xa4] sm:$0xff]  ;;  %v1020_v35 = vrot.slane %v5642_v6, 1 }
 0x183   : > { %v2040_v59 = vshll.u32 %v5552_v38, 16 }
 0x185   : > { %v1161_v61 = vpop.f32.mrf.mxu2  ;;  %v1587_v32 = vpop.f32.mrf.mxu3 }
 0x186   : > { %v1256_v25 = vadd.f32 %v1161_v61, %v898_v2  ;;  %v900_v3 = vpop.f32.mrf.mxu1  ;;  %v2038_v2 = vor.u32 %v2036_v8, %v2034_v51  ;;  %v2042_v61 = vrot.slane %v2040_v59, 1 }
 0x187   : > { %v901_v40 = vadd.f32 %v900_v3, %v6016_v49 }
 0x188   : > { %v1682_v46 = vadd.f32 %v1587_v32, %v1256_v25  ;;  %v1021_v32 = vsel %vm982_vm2, %v1018_v57, %v1020_v35  ;;  %v2043_v22 = vsel %vm387_vm0, %v2038_v2, %v2042_v61  ;;  %v5528_v2 = vld [vmem:[%s5736_s30 + $0xa4] sm:$0xff] }
 0x189   : > { %4888 = vmatmul.msk.bf16.gmra.mxu1 %vm590_vm1, %v5859_v62 }
 0x18a   : > { %v2216_v16 = vpop.f32.mrf.mxu0  ;;  %4918 = vmatmul.msk.bf16.gmra.mxu2 %vm590_vm1, %v1019_v1  ;;  %v6242_v45 = vadd.f32 %v2213_v44, %v1682_v46  ;;  %5044 = vmatmul.msk.bf16.gmra.mxu3 %vm590_vm1, %v5526_v20 }
 0x18d   : > { %5166 = vmatmul.msk.bf16.gmra.mxu0 %vm590_vm1, %v2035_v33  ;;  %v1164_v34 = vpop.f32.mrf.mxu2  ;;  %v1590_v29 = vpop.f32.mrf.mxu3 }
 0x18e   : > { %v1257_v42 = vadd.f32 %v1164_v34, %v901_v40  ;;  %v902_v14 = vpop.f32.mrf.mxu1  ;;  %v2044_v34 = vshrl.u32 %v5552_v38, 16 }
 0x18f   : > { %v903_v44 = vadd.f32 %v902_v14, %v6033_v23  ;;  %v5643_v14 = vld [vmem:[%s5736_s30 + $0xa0] sm:$0xff] }
 0x190   : > { %v1683_v62 = vadd.f32 %v1590_v29, %v1257_v42 }
 0x192   : > { %v2218_v21 = vpop.f32.mrf.mxu0  ;;  %v6248_v24 = vadd.f32 %v2216_v16, %v1683_v62  ;;  %v5553_v16 = vld [vmem:[%s5736_s30 + $0xac] sm:$0xff]  ;;  %v1022_v62 = vrot.slane %v5643_v14, 1 }
 0x193   : > { %v2048_v42 = vshll.u32 %v5553_v16, 16 }
 0x195   : > { %v1166_v37 = vpop.f32.mrf.mxu2  ;;  %v1592_v7 = vpop.f32.mrf.mxu3 }
 0x196   : > { %v1258_v49 = vadd.f32 %v1166_v37, %v903_v44  ;;  %v905_v25 = vpop.f32.mrf.mxu1  ;;  %v2046_v44 = vor.u32 %v2044_v34, %v2042_v61  ;;  %v2050_v37 = vrot.slane %v2048_v42, 1 }
 0x197   : > { %v906_v51 = vadd.f32 %v905_v25, %v6042_v27 }
 0x198   : > { %v1684_v3 = vadd.f32 %v1592_v7, %v1258_v49  ;;  %v1023_v7 = vsel %vm982_vm2, %v1020_v35, %v1022_v62  ;;  %v2051_v38 = vsel %vm387_vm0, %v2046_v44, %v2050_v37  ;;  %v5529_v44 = vld [vmem:[%s5736_s30 + $0xac] sm:$0xff] }
 0x199   : > { %4889 = vmatmul.msk.bf16.gmra.mxu1 %vm590_vm1, %v5641_v28 }
 0x19a   : > { %v2221_v1 = vpop.f32.mrf.mxu0  ;;  %4919 = vmatmul.msk.bf16.gmra.mxu2 %vm590_vm1, %v1021_v32  ;;  %v6257_v23 = vadd.f32 %v2218_v21, %v1684_v3  ;;  %5045 = vmatmul.msk.bf16.gmra.mxu3 %vm590_vm1, %v5527_v41 }
 0x19d   : > { %5167 = vmatmul.msk.bf16.gmra.mxu0 %vm590_vm1, %v2043_v22  ;;  %v1169_v20 = vpop.f32.mrf.mxu2  ;;  %v1595_v46 = vpop.f32.mrf.mxu3 }
 0x19e   : > { %v1259_v57 = vadd.f32 %v1169_v20, %v906_v51  ;;  %v907_v33 = vpop.f32.mrf.mxu1  ;;  %v2052_v20 = vshrl.u32 %v5553_v16, 16 }
 0x19f   : > { %v908_v21 = vadd.f32 %v907_v33, %v6059_v47  ;;  %v5644_v33 = vld [vmem:[%s5736_s30 + $0xa8] sm:$0xff] }
 0x1a0   : > { %v1685_v28 = vadd.f32 %v1595_v46, %v1259_v57 }
 0x1a2   : > { %v2223_v40 = vpop.f32.mrf.mxu0  ;;  %v6263_v29 = vadd.f32 %v2221_v1, %v1685_v28  ;;  %v5554_v1 = vld [vmem:[%s5736_s30 + $0xb4] sm:$0xff]  ;;  %v1024_v28 = vrot.slane %v5644_v33, 1 }
 0x1a3   : > { %v2056_v57 = vshll.u32 %v5554_v1, 16 }
 0x1a5   : > { %v1171_v8 = vpop.f32.mrf.mxu2  ;;  %v1597_v59 = vpop.f32.mrf.mxu3 }
 0x1a6   : > { %v1260_v27 = vadd.f32 %v1171_v8, %v908_v21  ;;  %v910_v49 = vpop.f32.mrf.mxu1  ;;  %v2054_v21 = vor.u32 %v2052_v20, %v2050_v37  ;;  %v2058_v8 = vrot.slane %v2056_v57, 1 }
 0x1a7   : > { %v911_v61 = vadd.f32 %v910_v49, %v6068_v30 }
 0x1a8   : > { %v1686_v25 = vadd.f32 %v1597_v59, %v1260_v27  ;;  %v1025_v59 = vsel %vm982_vm2, %v1022_v62, %v1024_v28  ;;  %v2059_v16 = vsel %vm387_vm0, %v2054_v21, %v2058_v8  ;;  %v5530_v21 = vld [vmem:[%s5736_s30 + $0xb4] sm:$0xff] }
 0x1a9   : > { %4890 = vmatmul.msk.bf16.gmra.mxu1 %vm590_vm1, %v5642_v6 }
 0x1aa   : > { %v2226_v32 = vpop.f32.mrf.mxu0  ;;  %4920 = vmatmul.msk.bf16.gmra.mxu2 %vm590_vm1, %v1023_v7  ;;  %v6272_v47 = vadd.f32 %v2223_v40, %v1686_v25  ;;  %5046 = vmatmul.msk.bf16.gmra.mxu3 %vm590_vm1, %v5528_v2 }
 0x1ad   : > { %5168 = vmatmul.msk.bf16.gmra.mxu0 %vm590_vm1, %v2051_v38  ;;  %v1174_v41 = vpop.f32.mrf.mxu2  ;;  %v1600_v3 = vpop.f32.mrf.mxu3 }
 0x1ae   : > { %v1261_v35 = vadd.f32 %v1174_v41, %v911_v61  ;;  %v912_v22 = vpop.f32.mrf.mxu1  ;;  %v2060_v41 = vshrl.u32 %v5554_v1, 16 }
 0x1af   : > { %v913_v40 = vadd.f32 %v912_v22, %v6085_v5  ;;  %v5645_v22 = vld [vmem:[%s5736_s30 + $0xb0] sm:$0xff] }
 0x1b0   : > { %v1687_v6 = vadd.f32 %v1600_v3, %v1261_v35 }
 0x1b2   : > { %v2228_v51 = vpop.f32.mrf.mxu0  ;;  %v6278_v46 = vadd.f32 %v2226_v32, %v1687_v6  ;;  %v5555_v32 = vld [vmem:[%s5736_s30 + $0xbc] sm:$0xff]  ;;  %v1026_v6 = vrot.slane %v5645_v22, 1 }
 0x1b3   : > { %v2064_v35 = vshll.u32 %v5555_v32, 16 }
 0x1b5   : > { %v1176_v34 = vpop.f32.mrf.mxu2  ;;  %v1602_v42 = vpop.f32.mrf.mxu3 }
 0x1b6   : > { %v1262_v30 = vadd.f32 %v1176_v34, %v913_v40  ;;  %v915_v27 = vpop.f32.mrf.mxu1  ;;  %v2062_v40 = vor.u32 %v2060_v41, %v2058_v8  ;;  %v2066_v34 = vrot.slane %v2064_v35, 1 }
 0x1b7   : > { %v916_v37 = vadd.f32 %v915_v27, %v5950_v50 }
 0x1b8   : > { %v1688_v49 = vadd.f32 %v1602_v42, %v1262_v30  ;;  %v1027_v42 = vsel %vm982_vm2, %v1024_v28, %v1026_v6  ;;  %v2067_v1 = vsel %vm387_vm0, %v2062_v40, %v2066_v34  ;;  %v5531_v40 = vld [vmem:[%s5736_s30 + $0xbc] sm:$0xff] }
 0x1b9   : > { %4891 = vmatmul.msk.bf16.gmra.mxu1 %vm590_vm1, %v5643_v14 }
 0x1ba   : > { %v2231_v7 = vpop.f32.mrf.mxu0  ;;  %4921 = vmatmul.msk.bf16.gmra.mxu2 %vm590_vm1, %v1025_v59  ;;  %v6287_v5 = vadd.f32 %v2228_v51, %v1688_v49  ;;  %5047 = vmatmul.msk.bf16.gmra.mxu3 %vm590_vm1, %v5529_v44 }
 0x1bd   : > { %5169 = vmatmul.msk.bf16.gmra.mxu0 %vm590_vm1, %v2059_v16  ;;  %v1179_v2 = vpop.f32.mrf.mxu2  ;;  %v1605_v25 = vpop.f32.mrf.mxu3 }
 0x1be   : > { %v1263_v62 = vadd.f32 %v1179_v2, %v916_v37  ;;  %v917_v38 = vpop.f32.mrf.mxu1  ;;  %v2068_v2 = vshrl.u32 %v5555_v32, 16 }
 0x1bf   : > { %v918_v51 = vadd.f32 %v917_v38, %v5960_v58  ;;  %v5646_v38 = vld [vmem:[%s5736_s30 + $0xb8] sm:$0xff] }
 0x1c0   : > { %v1689_v14 = vadd.f32 %v1605_v25, %v1263_v62 }
 0x1c2   : > { %v2233_v61 = vpop.f32.mrf.mxu0  ;;  %v6293_v3 = vadd.f32 %v2231_v7, %v1689_v14  ;;  %v5556_v7 = vld [vmem:[%s5736_s30 + $0xc4] sm:$0xff]  ;;  %v1028_v14 = vrot.slane %v5646_v38, 1 }
 0x1c3   : > { %v2072_v62 = vshll.u32 %v5556_v7, 16 }
 0x1c5   : > { %v1181_v20 = vpop.f32.mrf.mxu2  ;;  %v1607_v57 = vpop.f32.mrf.mxu3 }
 0x1c6   : > { %v1264_v50 = vadd.f32 %v1181_v20, %v918_v51  ;;  %v920_v30 = vpop.f32.mrf.mxu1  ;;  %v2070_v51 = vor.u32 %v2068_v2, %v2066_v34  ;;  %v2074_v20 = vrot.slane %v2072_v62, 1 }
 0x1c7   : > { %v921_v8 = vadd.f32 %v920_v30, %v5976_v26  ;;  %v1761_v30 = vld [vmem:[%s5736_s30 + $0xcc] sm:$0x1] }
 0x1c8   : > { %v1690_v27 = vadd.f32 %v1607_v57, %v1264_v50  ;;  %v1029_v57 = vsel %vm982_vm2, %v1026_v6, %v1028_v14  ;;  %v2075_v32 = vsel %vm387_vm0, %v2070_v51, %v2074_v20 }
 0x1c9   : > { %4892 = vmatmul.msk.bf16.gmra.mxu1 %vm590_vm1, %v5644_v33 }
 0x1ca   : > { %v2236_v59 = vpop.f32.mrf.mxu0  ;;  %4922 = vmatmul.msk.bf16.gmra.mxu2 %vm590_vm1, %v1027_v42  ;;  %v6302_v58 = vadd.f32 %v2233_v61, %v1690_v27  ;;  %5048 = vmatmul.msk.bf16.gmra.mxu3 %vm590_vm1, %v5530_v21  ;;  %v1862_v27 = vunpack.c.l.b16 %v1761_v30 }
 0x1cd   : > { %5170 = vmatmul.msk.bf16.gmra.mxu0 %vm590_vm1, %v2067_v1  ;;  %v1184_v44 = vpop.f32.mrf.mxu2  ;;  %v1610_v49 = vpop.f32.mrf.mxu3 }
 0x1ce   : > { %v1265_v28 = vadd.f32 %v1184_v44, %v921_v8  ;;  %v922_v16 = vpop.f32.mrf.mxu1  ;;  %v6323_v8 = vpack.c.b16 %v1862_v27, %v1862_v27 }
 0x1cf   : > { %v923_v61 = vadd.f32 %v922_v16, %v5986_v19 }
 0x1d0   : > { %v1691_v33 = vadd.f32 %v1610_v49, %v1265_v28  ;;  %v2076_v49 = vshrl.u32 %v5556_v7, 16  ;;  %v2080_v16 = vshll.u32 %v6323_v8, 16  ;;  %v5671_v7 = vld [vmem:[%s5736_s30 + $0xc] sm:$0xe] }
 0x1d2   : > { %v2238_v37 = vpop.f32.mrf.mxu0  ;;  %v6308_v25 = vadd.f32 %v2236_v59, %v1691_v33 }
 0x1d5   : > { %v1186_v26 = vpop.f32.mrf.mxu2  ;;  %v1612_v35 = vpop.f32.mrf.mxu3 }
 0x1d6   : > { %v1266_v41 = vadd.f32 %v1186_v26, %v923_v61  ;;  %v925_v50 = vpop.f32.mrf.mxu1  ;;  %v2078_v26 = vor.u32 %v2076_v49, %v2074_v20  ;;  %v5681_v49 = vmov 0  }
 0x1d7   : > { %v926_v34 = vadd.f32 %v925_v50, %v6002_v31  ;;  %v1030_v31 = vrot.slane %v5883_v39, 1  ;;  %v5532_v50 = vld [vmem:[%s5736_s30 + $0xc4] sm:$0xff]  ;;  %5638 = vset.pattern.permute.xlu0 %v5681_v49  ;;  %5639 = vset.pattern.permute.xlu1 %v5681_v49 }
 0x1d8   : > { %v1692_v42 = vadd.f32 %v1612_v35, %v1266_v41  ;;  %v2082_v41 = vrot.slane %v2080_v16, 1  ;;  %5640 = vset.pattern.permute.xlu2 %v5681_v49 }
 0x1d9   : > { %4893 = vmatmul.msk.bf16.gmra.mxu1 %vm590_vm1, %v5645_v22  ;;  %v1031_v51 = vsel %vm982_vm2, %v1028_v14, %v1030_v31  ;;  %v6342_v14 = vld [vmem:[%s5736_s30 + $0x20] sm:$0xff] }
 0x1da   : > { %v2241_v21 = vpop.f32.mrf.mxu0  ;;  %4923 = vmatmul.msk.bf16.gmra.mxu2 %vm590_vm1, %v1029_v57  ;;  %v6318_v19 = vadd.f32 %v2238_v37, %v1692_v42  ;;  %5049 = vmatmul.msk.bf16.gmra.mxu3 %vm590_vm1, %v5531_v40  ;;  %v5620_v40 = vld [vmem:[%s5736_s30 + $0x18] sm:$0xff]   ;;  %v2083_v39 = vsel %vm387_vm0, %v2078_v26, %v2082_v41 }
 0x1db   : > { %v3254_v42 = vshll.u32 %v5620_v40, 16 }
 0x1dd   : > { %5171 = vmatmul.msk.bf16.gmra.mxu0 %vm590_vm1, %v2075_v32  ;;  %v1189_v6 = vpop.f32.mrf.mxu2  ;;  %v1615_v1 = vpop.f32.mrf.mxu3 }
 0x1de   : > { %v1267_v59 = vadd.f32 %v1189_v6, %v926_v34  ;;  %v927_v22 = vpop.f32.mrf.mxu1  ;;  %v5672_v34 = vor.u32 %v5671_v7, %v5901_v54  ;;  %v3252_v6 = vshrl.u32 %v5620_v40, 16  ;;  %v5559_v7 = vld [vmem:[%s5736_s30 + $0x18] sm:$0xff] }
 0x1df   : > { %v928_v37 = vadd.f32 %v927_v22, %v6012_v43 }
 0x1e0   : > { %v1693_v44 = vadd.f32 %v1615_v1, %v1267_v59  ;;  %v5621_v59 = vld [vmem:[%s5736_s30 + $0x18] sm:$0xf0]  ;;  %v5622_v1 = vld [vmem:[%s5736_s30 + $0x18] sm:$0xe] }
 0x1e1   : > { %v5623_v31 = vor.u32 %v5622_v1, %v5621_v59  ;;  %v6371_v1 = vld [vmem:[%s5736_s30 + $0x28] sm:$0xff] }
 0x1e2   : > { %v2243_v28 = vpop.f32.mrf.mxu0  ;;  %v6326_v33 = vadd.f32 %v2241_v21, %v1693_v44  ;;  %v3256_v44 = vrot.slane %v3254_v42, 1 }
 0x1e3   : > { %v3709_v40 = vrot.slane %v5623_v31, 1  ;;  %v3263_v31 = vshrl.u32 %v6342_v14, 16 }
 0x1e4   : > { %v3257_v41 = vor.u32 %v3256_v44, %v3252_v6  ;;  %v7313_v6 = vld [vmem:[#allocation11_spill] sm:$0xff] }
 0x1e5   : > { %v1191_v2 = vpop.f32.mrf.mxu2  ;;  %v1617_v61 = vpop.f32.mrf.mxu3 }
 0x1e6   : > { %v1268_v62 = vadd.f32 %v1191_v2, %v928_v37  ;;  %v930_v35 = vpop.f32.mrf.mxu1  ;;  %v2346_v37 = vrot.slane %v5672_v34, 1  ;;  %v5647_v2 = vld [vmem:[%s5736_s30 + $0x14] sm:$0xff] }
 0x1e7   : > { %v931_v20 = vadd.f32 %v930_v35, %v6028_v60  ;;  %v4062_v60 = vld [vmem:[%s7290_s2] sm:$0xff] }
 0x1e8   : > { %v1694_v57 = vadd.f32 %v1617_v61, %v1268_v62  ;;  %4112 = vperm.xlu0 %5638, %v4062_v60   ;;  %v2347_v62 = vrot.slane %v5647_v2, 1  ;;  %v7312_v61 = vld [vmem:[#allocation9_spill] sm:$0xff] }
 0x1e9   : > { %4894 = vmatmul.msk.bf16.gmra.mxu1 %vm590_vm1, %v5646_v38 }
 0x1ea   : > { %v2246_v30 = vpop.f32.mrf.mxu0  ;;  %4924 = vmatmul.msk.bf16.gmra.mxu2 %vm590_vm1, %v1031_v51  ;;  %v6337_v43 = vadd.f32 %v2243_v28, %v1694_v57  ;;  %5050 = vmatmul.msk.bf16.gmra.mxu3 %vm590_vm1, %v5532_v50  ;;  %v3259_v28 = vshll.u32 %v6342_v14, 16  ;;  %v2348_v42 = vsel %vm982_vm2, %v2346_v37, %v2347_v62  ;;  %v4064_v37 = vld [vmem:[%s7290_s2 + $0x10] sm:$0xff] }
 0x1eb   : > { %4122 = vperm.xlu1 %5639, %v4064_v37  }
 0x1ec   : > { %v3261_v35 = vrot.slane %v3259_v28, 1 }
 0x1ed   : > { %5172 = vmatmul.msk.bf16.gmra.mxu0 %vm590_vm1, %v2083_v39  ;;  %v1194_v21 = vpop.f32.mrf.mxu2  ;;  %v1620_v27 = vpop.f32.mrf.mxu3  ;;  %v3710_v39 = vrot.slane %v6342_v14, 1  ;;  %v5560_v14 = vld [vmem:[%s5736_s30 + $0x20] sm:$0xff] }
 0x1ee   : > { %v1269_v32 = vadd.f32 %v1194_v21, %v931_v20  ;;  %v932_v38 = vpop.f32.mrf.mxu1  ;;  %v3262_v21 = vsel %vm387_vm0, %v3257_v41, %v3261_v35 }
 0x1ef   : > { %v933_v26 = vadd.f32 %v932_v38, %v7312_v61  ;;  %v3711_v38 = vsel %vm982_vm2, %v3709_v40, %v3710_v39 }
 0x1f0   : > { %v1695_v22 = vadd.f32 %v1620_v27, %v1269_v32  ;;  %v4063_v32 = vld [vmem:[%s7290_s2 + $0x8] sm:$0xff] }
 0x1f1   : > { %4117 = vperm.xlu0 %5638, %v4063_v32  }
 0x1f2   : > { %v2248_v16 = vpop.f32.mrf.mxu0  ;;  %v6352_v54 = vadd.f32 %v2246_v30, %v1695_v22 }
 0x1f5   : > { %v1196_v51 = vpop.f32.mrf.mxu2  ;;  %v1622_v57 = vpop.f32.mrf.mxu3 }
 0x1f6   : > { %v1270_v50 = vadd.f32 %v1196_v51, %v933_v26  ;;  %v935_v20 = vpop.f32.mrf.mxu1  ;;  %v5648_v26 = vld [vmem:[%s5736_s30 + $0x1c] sm:$0xff] }
 0x1f7   : > { %v936_v59 = vadd.f32 %v935_v20, %v7313_v6  ;;  %v2349_v41 = vrot.slane %v5648_v26, 1  ;;  %v7314_v51 = vld [vmem:[#allocation13_spill] sm:$0xff]  ;;  %v3271_v26 = vshrl.u32 %v6371_v1, 16 }
 0x1f8   : > { %v1696_v30 = vadd.f32 %v1622_v57, %v1270_v50  ;;  %v3265_v57 = vor.u32 %v3263_v31, %v3261_v35  ;;  %v4065_v6 = vld [vmem:[%s7290_s2 + $0x18] sm:$0xff] }
 0x1f9   : > { %5179 = vmatmul.msk.bf16.vlgmr.msra.gmra.mxu1 %vm590_vm1, %v2348_v42  ;;  %v2350_v32 = vsel %vm982_vm2, %v2347_v62, %v2349_v41  ;;  %4127 = vperm.xlu1 %5639, %v4065_v6   ;;  %v7315_v62 = vld [vmem:[#allocation15_spill] sm:$0xff] }
 0x1fa   : > { %v2251_v27 = vpop.f32.mrf.mxu0  ;;  %5305 = vmatmul.msk.bf16.vlgmr.msra.gmra.mxu2 %vm590_vm1, %v5559_v7  ;;  %v6366_v34 = vadd.f32 %v2248_v16, %v1696_v30  ;;  %5427 = vmatmul.msk.bf16.vlgmr.msra.gmra.mxu3 %vm590_vm1, %v3262_v21  ;;  %v3267_v16 = vshll.u32 %v6371_v1, 16  ;;  %v3712_v30 = vrot.slane %v6371_v1, 1 }
 0x1fc   : > { %v3269_v7 = vrot.slane %v3267_v16, 1 }
 0x1fd   : > { %5457 = vmatmul.msk.bf16.vlgmr.msra.gmra.mxu0 %vm590_vm1, %v3711_v38  ;;  %v1199_v22 = vpop.f32.mrf.mxu2  ;;  %v1625_v28 = vpop.f32.mrf.mxu3 }
 0x1fe   : > { %v1271_v44 = vadd.f32 %v1199_v22, %v936_v59  ;;  %v937_v60 = vpop.f32.mrf.mxu1  ;;  %v3713_v59 = vsel %vm982_vm2, %v3710_v39, %v3712_v30 }
 0x1ff   : > { %v938_v50 = vadd.f32 %v937_v60, %v7314_v51 }
 0x200   : > { %v1697_v49 = vadd.f32 %v1625_v28, %v1271_v44  ;;  %v6398_v28 = vld [vmem:[%s5736_s30 + $0x30] sm:$0xff] }
 0x201   : > { %v3275_v39 = vshll.u32 %v6398_v28, 16  ;;  %v3714_v6 = vrot.slane %v6398_v28, 1 }
 0x202   : > { %v2253_v2 = vpop.f32.mrf.mxu0  ;;  %v6379_v61 = vadd.f32 %v2251_v27, %v1697_v49  ;;  %v3270_v27 = vsel %vm387_vm0, %v3265_v57, %v3269_v7 }
 0x205   : > { %v1201_v40 = vpop.f32.mrf.mxu2  ;;  %v1627_v42 = vpop.f32.mrf.mxu3 }
 0x206   : > { %v1272_v20 = vadd.f32 %v1201_v40, %v938_v50  ;;  %v940_v21 = vpop.f32.mrf.mxu1  ;;  %v5649_v50 = vld [vmem:[%s5736_s30 + $0x24] sm:$0xff]  ;;  %v7316_v40 = vld [vmem:[#allocation17_spill] sm:$0xff] }
 0x207   : > { %v941_v44 = vadd.f32 %v940_v21, %v7315_v62  ;;  %v2351_v57 = vrot.slane %v5649_v50, 1 }
 0x208   : > { %v1698_v38 = vadd.f32 %v1627_v42, %v1272_v20  ;;  %v3273_v42 = vor.u32 %v3271_v26, %v3269_v7  ;;  %v3715_v7 = vsel %vm982_vm2, %v3712_v30, %v3714_v6 }
 0x209   : > { %5180 = vmatmul.msk.bf16.gmra.mxu1 %vm590_vm1, %v2350_v32  ;;  %v2352_v1 = vsel %vm982_vm2, %v2349_v41, %v2351_v57 }
 0x20a   : > { %v2256_v35 = vpop.f32.mrf.mxu0  ;;  %5306 = vmatmul.msk.bf16.gmra.mxu2 %vm590_vm1, %v5560_v14  ;;  %v6393_v22 = vadd.f32 %v2253_v2, %v1698_v38  ;;  %5428 = vmatmul.msk.bf16.gmra.mxu3 %vm590_vm1, %v3270_v27  ;;  %v3277_v14 = vrot.slane %v3275_v39, 1  ;;  %v5561_v27 = vld [vmem:[%s5736_s30 + $0x28] sm:$0xff] }
 0x20d   : > { %5458 = vmatmul.msk.bf16.gmra.mxu0 %vm590_vm1, %v3713_v59  ;;  %v1204_v60 = vpop.f32.mrf.mxu2  ;;  %v1630_v31 = vpop.f32.mrf.mxu3 }
 0x20e   : > { %v1273_v49 = vadd.f32 %v1204_v60, %v941_v44  ;;  %v942_v16 = vpop.f32.mrf.mxu1 }
 0x20f   : > { %v943_v20 = vadd.f32 %v942_v16, %v7316_v40  ;;  %v6419_v16 = vld [vmem:[%s5736_s30 + $0x38] sm:$0xff]  ;;  %v3279_v40 = vshrl.u32 %v6398_v28, 16  ;;  %v5562_v28 = vld [vmem:[%s5736_s30 + $0x30] sm:$0xff] }
 0x210   : > { %v1699_v37 = vadd.f32 %v1630_v31, %v1273_v49  ;;  %v7317_v49 = vld [vmem:[#allocation2_spill] sm:$0xff]  ;;  %v3283_v30 = vshll.u32 %v6419_v16, 16 }
 0x212   : > { %v2258_v2 = vpop.f32.mrf.mxu0  ;;  %v6403_v51 = vadd.f32 %v2256_v35, %v1699_v37  ;;  %v3278_v35 = vsel %vm387_vm0, %v3273_v42, %v3277_v14 }
 0x215   : > { %v1206_v21 = vpop.f32.mrf.mxu2  ;;  %v1632_v38 = vpop.f32.mrf.mxu3 }
 0x216   : > { %v1274_v32 = vadd.f32 %v1206_v21, %v943_v20  ;;  %v945_v59 = vpop.f32.mrf.mxu1  ;;  %v5650_v21 = vld [vmem:[%s5736_s30 + $0x2c] sm:$0xff] }
 0x217   : > { %v946_v31 = vadd.f32 %v945_v59, %v7317_v49  ;;  %v3281_v59 = vor.u32 %v3279_v40, %v3277_v14  ;;  %v3716_v49 = vrot.slane %v6419_v16, 1  ;;  %v4069_v14 = vld [vmem:[%s7290_s2 + $0x38] sm:$0xff]  ;;  %v7319_v40 = vld [vmem:[#allocation4_spill] sm:$0xff] }
 0x218   : > { %v1700_v62 = vadd.f32 %v1632_v38, %v1274_v32  ;;  %v2353_v32 = vrot.slane %v5650_v21, 1  ;;  %v7318_v38 = vld [vmem:[#allocation3_spill] sm:$0xff]  ;;  %4147 = vperm.xlu1 %5639, %v4069_v14  }
 0x219   : > { %5181 = vmatmul.msk.bf16.gmra.mxu1 %vm590_vm1, %v2352_v1  ;;  %v3285_v1 = vrot.slane %v3283_v30, 1 }
 0x21a   : > { %v2261_v44 = vpop.f32.mrf.mxu0  ;;  %5307 = vmatmul.msk.bf16.gmra.mxu2 %vm590_vm1, %v5561_v27  ;;  %v6414_v60 = vadd.f32 %v2258_v2, %v1700_v62  ;;  %5429 = vmatmul.msk.bf16.gmra.mxu3 %vm590_vm1, %v3278_v35  ;;  %v4068_v2 = vld [vmem:[%s7290_s2 + $0x30] sm:$0xff] }
 0x21b   : > { %4142 = vperm.xlu0 %5638, %v4068_v2   ;;  %v6449_v2 = vld [vmem:[%s5736_s30 + $0x40] sm:$0xff] }
 0x21d   : > { %5459 = vmatmul.msk.bf16.gmra.mxu0 %vm590_vm1, %v3715_v7  ;;  %v1209_v41 = vpop.f32.mrf.mxu2  ;;  %v1635_v26 = vpop.f32.mrf.mxu3 }
 0x21e   : > { %v1275_v37 = vadd.f32 %v1209_v41, %v946_v31  ;;  %v947_v39 = vpop.f32.mrf.mxu1  ;;  %v2354_v41 = vsel %vm982_vm2, %v2351_v57, %v2353_v32  ;;  %v3717_v57 = vsel %vm982_vm2, %v3714_v6, %v3716_v49  ;;  %v3291_v6 = vshll.u32 %v6449_v2, 16 }
 0x21f   : > { %v948_v27 = vadd.f32 %v947_v39, %v7318_v38 }
 0x220   : > { %v1701_v50 = vadd.f32 %v1635_v26, %v1275_v37  ;;  %v4066_v26 = vld [vmem:[%s7290_s2 + $0x20] sm:$0xff]  ;;  %v3293_v14 = vrot.slane %v3291_v6, 1 }
 0x221   : > { %4132 = vperm.xlu2 %5640, %v4066_v26  }
 0x222   : > { %v2263_v20 = vpop.f32.mrf.mxu0  ;;  %v6427_v42 = vadd.f32 %v2261_v44, %v1701_v50  ;;  %v3286_v44 = vsel %vm387_vm0, %v3281_v59, %v3285_v1 }
 0x225   : > { %v1211_v62 = vpop.f32.mrf.mxu2  ;;  %v1637_v7 = vpop.f32.mrf.mxu3 }
 0x226   : > { %v1276_v35 = vadd.f32 %v1211_v62, %v948_v27  ;;  %v950_v31 = vpop.f32.mrf.mxu1 }
 0x227   : > { %v951_v30 = vadd.f32 %v950_v31, %v7319_v40  ;;  %v5651_v31 = vld [vmem:[%s5736_s30 + $0x34] sm:$0xff] }
 0x228   : > { %v1702_v37 = vadd.f32 %v1637_v7, %v1276_v35  ;;  %v3287_v35 = vshrl.u32 %v6419_v16, 16  ;;  %v5563_v16 = vld [vmem:[%s5736_s30 + $0x38] sm:$0xff] }
 0x229   : > { %5182 = vmatmul.msk.bf16.gmra.mxu1 %vm590_vm1, %v2354_v41  ;;  %v2355_v41 = vrot.slane %v5651_v31, 1  ;;  %v6476_v31 = vld [vmem:[%s5736_s30 + $0x48] sm:$0xff] }
 0x22a   : > { %v2266_v39 = vpop.f32.mrf.mxu0  ;;  %5308 = vmatmul.msk.bf16.gmra.mxu2 %vm590_vm1, %v5562_v28  ;;  %v6444_v50 = vadd.f32 %v2263_v20, %v1702_v37  ;;  %5430 = vmatmul.msk.bf16.gmra.mxu3 %vm590_vm1, %v3286_v44  ;;  %v4067_v20 = vld [vmem:[%s7290_s2 + $0x28] sm:$0xff]  ;;  %v7321_v37 = vld [vmem:[#allocation5_spill] sm:$0xff]  ;;  %v3289_v26 = vor.u32 %v3287_v35, %v3285_v1 }
 0x22b   : > { %4137 = vperm.xlu2 %5640, %v4067_v20  }
 0x22d   : > { %5460 = vmatmul.msk.bf16.gmra.mxu0 %vm590_vm1, %v3717_v57  ;;  %v1214_v21 = vpop.f32.mrf.mxu2  ;;  %v1640_v27 = vpop.f32.mrf.mxu3 }
 0x22e   : > { %v1277_v38 = vadd.f32 %v1214_v21, %v951_v30  ;;  %v952_v59 = vpop.f32.mrf.mxu1  ;;  %v3718_v21 = vrot.slane %v6449_v2, 1 }
 0x22f   : > { %v953_v44 = vadd.f32 %v952_v59, %v7321_v37 }
 0x230   : > { %v1703_v62 = vadd.f32 %v1640_v27, %v1277_v38  ;;  %v2356_v27 = vsel %vm982_vm2, %v2353_v32, %v2355_v41  ;;  %v3719_v59 = vsel %vm982_vm2, %v3716_v49, %v3718_v21  ;;  %v7323_v32 = vld [vmem:[#allocation6_spill] sm:$0xff]  ;;  %v3299_v49 = vshll.u32 %v6476_v31, 16 }
 0x232   : > { %v2268_v7 = vpop.f32.mrf.mxu0  ;;  %v6457_v28 = vadd.f32 %v2266_v39, %v1703_v62  ;;  %v3294_v39 = vsel %vm387_vm0, %v3289_v26, %v3293_v14  ;;  %v4071_v62 = vld [vmem:[%s7290_s2 + $0x48] sm:$0xff] }
 0x233   : > { %4157 = vperm.xlu0 %5638, %v4071_v62  }
 0x234   : > { %7320 = vst [vmem:[#allocation9_spill] sm:$0xff] %v6457_v28 }
 0x235   : > { %v1216_v57 = vpop.f32.mrf.mxu2  ;;  %v1642_v30 = vpop.f32.mrf.mxu3 }
 0x236   : > { %v1278_v40 = vadd.f32 %v1216_v57, %v953_v44  ;;  %v955_v38 = vpop.f32.mrf.mxu1 }
 0x237   : > { %v956_v6 = vadd.f32 %v955_v38, %v7323_v32  ;;  %v3301_v32 = vrot.slane %v3299_v49, 1 }
 0x238   : > { %v1704_v20 = vadd.f32 %v1642_v30, %v1278_v40  ;;  %v3295_v30 = vshrl.u32 %v6449_v2, 16  ;;  %v5564_v2 = vld [vmem:[%s5736_s30 + $0x40] sm:$0xff] }
 0x239   : > { %5183 = vmatmul.msk.bf16.gmra.mxu1 %vm590_vm1, %v2356_v27  ;;  %v5652_v27 = vld [vmem:[%s5736_s30 + $0x3c] sm:$0xff] }
 0x23a   : > { %v2271_v1 = vpop.f32.mrf.mxu0  ;;  %5309 = vmatmul.msk.bf16.gmra.mxu2 %vm590_vm1, %v5563_v16  ;;  %v6471_v35 = vadd.f32 %v2268_v7, %v1704_v20  ;;  %5431 = vmatmul.msk.bf16.gmra.mxu3 %vm590_vm1, %v3294_v39  ;;  %v4072_v7 = vld [vmem:[%s7290_s2 + $0x50] sm:$0xff]  ;;  %v2357_v20 = vrot.slane %v5652_v27, 1  ;;  %v7325_v39 = vld [vmem:[#allocation7_spill] sm:$0xff] }
 0x23b   : > { %4162 = vperm.xlu1 %5639, %v4072_v7   ;;  %v6503_v27 = vld [vmem:[%s5736_s30 + $0x50] sm:$0xff] }
 0x23c   : > { %7322 = vst [vmem:[#allocation11_spill] sm:$0xff] %v6471_v35  ;;  %v2358_v28 = vsel %vm982_vm2, %v2355_v41, %v2357_v20  ;;  %v7327_v41 = vld [vmem:[#allocation8_spill] sm:$0xff] }
 0x23d   : > { %5461 = vmatmul.msk.bf16.gmra.mxu0 %vm590_vm1, %v3719_v59  ;;  %v1219_v37 = vpop.f32.mrf.mxu2  ;;  %v1645_v26 = vpop.f32.mrf.mxu3  ;;  %v3297_v59 = vor.u32 %v3295_v30, %v3293_v14 }
 0x23e   : > { %v1279_v44 = vadd.f32 %v1219_v37, %v956_v6  ;;  %v957_v57 = vpop.f32.mrf.mxu1 }
 0x23f   : > { %v958_v62 = vadd.f32 %v957_v57, %v7325_v39 }
 0x240   : > { %v1705_v40 = vadd.f32 %v1645_v26, %v1279_v44  ;;  %v3720_v26 = vrot.slane %v6476_v31, 1 }
 0x242   : > { %v2273_v16 = vpop.f32.mrf.mxu0  ;;  %v6484_v38 = vadd.f32 %v2271_v1, %v1705_v40  ;;  %v3302_v1 = vsel %vm387_vm0, %v3297_v59, %v3301_v32  ;;  %v4070_v40 = vld [vmem:[%s7290_s2 + $0x40] sm:$0xff]  ;;  %v3721_v57 = vsel %vm982_vm2, %v3718_v21, %v3720_v26  ;;  %v3307_v21 = vshll.u32 %v6503_v27, 16 }
 0x243   : > { %4152 = vperm.xlu2 %5640, %v4070_v40  }
 0x244   : > { %7324 = vst [vmem:[#allocation13_spill] sm:$0xff] %v6484_v38 }
 0x245   : > { %v1221_v6 = vpop.f32.mrf.mxu2  ;;  %v1647_v44 = vpop.f32.mrf.mxu3 }
 0x246   : > { %v1280_v37 = vadd.f32 %v1221_v6, %v958_v62  ;;  %v960_v35 = vpop.f32.mrf.mxu1 }
 0x247   : > { %v961_v49 = vadd.f32 %v960_v35, %v7327_v41  ;;  %v3309_v41 = vrot.slane %v3307_v21, 1 }
 0x248   : > { %v1706_v7 = vadd.f32 %v1647_v44, %v1280_v37  ;;  %v3303_v37 = vshrl.u32 %v6476_v31, 16  ;;  %v5565_v31 = vld [vmem:[%s5736_s30 + $0x48] sm:$0xff] }
 0x249   : > { %5184 = vmatmul.msk.bf16.gmra.mxu1 %vm590_vm1, %v2358_v28 }
 0x24a   : > { %v2276_v14 = vpop.f32.mrf.mxu0  ;;  %5310 = vmatmul.msk.bf16.gmra.mxu2 %vm590_vm1, %v5564_v2  ;;  %v6498_v30 = vadd.f32 %v2273_v16, %v1706_v7  ;;  %5432 = vmatmul.msk.bf16.gmra.mxu3 %vm590_vm1, %v3302_v1  ;;  %v4074_v16 = vld [vmem:[%s7290_s2 + $0x60] sm:$0xff] }
 0x24b   : > { %4172 = vperm.xlu0 %5638, %v4074_v16   ;;  %v5653_v2 = vld [vmem:[%s5736_s30 + $0x44] sm:$0xff] }
 0x24c   : > { %7326 = vst [vmem:[#allocation15_spill] sm:$0xff] %v6498_v30  ;;  %v2359_v7 = vrot.slane %v5653_v2, 1  ;;  %v7329_v1 = vld [vmem:[#allocation10_spill] sm:$0xff]  ;;  %v6530_v2 = vld [vmem:[%s5736_s30 + $0x58] sm:$0xff] }
 0x24d   : > { %5462 = vmatmul.msk.bf16.gmra.mxu0 %vm590_vm1, %v3721_v57  ;;  %v1224_v39 = vpop.f32.mrf.mxu2  ;;  %v1650_v59 = vpop.f32.mrf.mxu3  ;;  %v3305_v57 = vor.u32 %v3303_v37, %v3301_v32 }
 0x24e   : > { %v1281_v62 = vadd.f32 %v1224_v39, %v961_v49  ;;  %v962_v6 = vpop.f32.mrf.mxu1  ;;  %v2360_v38 = vsel %vm982_vm2, %v2357_v20, %v2359_v7  ;;  %v7331_v20 = vld [vmem:[#allocation12_spill] sm:$0xff] }
 0x24f   : > { %v963_v40 = vadd.f32 %v962_v6, %v7329_v1 }
 0x250   : > { %v1707_v28 = vadd.f32 %v1650_v59, %v1281_v62  ;;  %v3722_v59 = vrot.slane %v6503_v27, 1 }
 0x252   : > { %v2278_v35 = vpop.f32.mrf.mxu0  ;;  %v6511_v44 = vadd.f32 %v2276_v14, %v1707_v28  ;;  %v3310_v14 = vsel %vm387_vm0, %v3305_v57, %v3309_v41  ;;  %v4075_v28 = vld [vmem:[%s7290_s2 + $0x68] sm:$0xff]  ;;  %v3723_v6 = vsel %vm982_vm2, %v3720_v26, %v3722_v59  ;;  %v3315_v26 = vshll.u32 %v6530_v2, 16 }
 0x253   : > { %4177 = vperm.xlu1 %5639, %v4075_v28  }
 0x254   : > { %7328 = vst [vmem:[#allocation17_spill] sm:$0xff] %v6511_v44 }
 0x255   : > { %v1226_v49 = vpop.f32.mrf.mxu2  ;;  %v1652_v62 = vpop.f32.mrf.mxu3 }
 0x256   : > { %v1282_v39 = vadd.f32 %v1226_v49, %v963_v40  ;;  %v965_v30 = vpop.f32.mrf.mxu1 }
 0x257   : > { %v966_v21 = vadd.f32 %v965_v30, %v7331_v20  ;;  %v3317_v20 = vrot.slane %v3315_v26, 1 }
 0x258   : > { %v1708_v16 = vadd.f32 %v1652_v62, %v1282_v39  ;;  %v3311_v39 = vshrl.u32 %v6503_v27, 16  ;;  %v5566_v27 = vld [vmem:[%s5736_s30 + $0x50] sm:$0xff] }
 0x259   : > { %5185 = vmatmul.msk.bf16.gmra.mxu1 %vm590_vm1, %v2360_v38 }
 0x25a   : > { %v2281_v32 = vpop.f32.mrf.mxu0  ;;  %5311 = vmatmul.msk.bf16.gmra.mxu2 %vm590_vm1, %v5565_v31  ;;  %v6525_v37 = vadd.f32 %v2278_v35, %v1708_v16  ;;  %5433 = vmatmul.msk.bf16.gmra.mxu3 %vm590_vm1, %v3310_v14  ;;  %v4073_v35 = vld [vmem:[%s7290_s2 + $0x58] sm:$0xff]  ;;  %v5654_v31 = vld [vmem:[%s5736_s30 + $0x4c] sm:$0xff]  ;;  %v7333_v14 = vld [vmem:[#allocation14_spill] sm:$0xff] }
 0x25b   : > { %4167 = vperm.xlu2 %5640, %v4073_v35   ;;  %v2361_v16 = vrot.slane %v5654_v31, 1  ;;  %v6557_v31 = vld [vmem:[%s5736_s30 + $0x60] sm:$0xff] }
 0x25c   : > { %7330 = vst [vmem:[#allocation2_spill] sm:$0xff] %v6525_v37 }
 0x25d   : > { %5463 = vmatmul.msk.bf16.gmra.mxu0 %vm590_vm1, %v3723_v6  ;;  %v1229_v1 = vpop.f32.mrf.mxu2  ;;  %v1655_v57 = vpop.f32.mrf.mxu3  ;;  %v3313_v6 = vor.u32 %v3311_v39, %v3309_v41  ;;  %v2362_v44 = vsel %vm982_vm2, %v2359_v7, %v2361_v16  ;;  %v7335_v7 = vld [vmem:[#allocation16_spill] sm:$0xff] }
 0x25e   : > { %v1283_v40 = vadd.f32 %v1229_v1, %v966_v21  ;;  %v967_v49 = vpop.f32.mrf.mxu1 }
 0x25f   : > { %v968_v28 = vadd.f32 %v967_v49, %v7333_v14 }
 0x260   : > { %v1709_v38 = vadd.f32 %v1655_v57, %v1283_v40  ;;  %v3724_v57 = vrot.slane %v6530_v2, 1 }
 0x262   : > { %v2283_v30 = vpop.f32.mrf.mxu0  ;;  %v6538_v62 = vadd.f32 %v2281_v32, %v1709_v38  ;;  %v3318_v32 = vsel %vm387_vm0, %v3313_v6, %v3317_v20  ;;  %v4077_v38 = vld [vmem:[%s7290_s2 + $0x78] sm:$0xff]  ;;  %v3725_v49 = vsel %vm982_vm2, %v3722_v59, %v3724_v57  ;;  %v3323_v59 = vshll.u32 %v6557_v31, 16 }
 0x263   : > { %4187 = vperm.xlu0 %5638, %v4077_v38  }
 0x264   : > { %7332 = vst [vmem:[#allocation3_spill] sm:$0xff] %v6538_v62 }
 0x265   : > { %v1231_v21 = vpop.f32.mrf.mxu2  ;;  %v1657_v40 = vpop.f32.mrf.mxu3 }
 0x266   : > { %v1284_v1 = vadd.f32 %v1231_v21, %v968_v28  ;;  %v970_v37 = vpop.f32.mrf.mxu1 }
 0x267   : > { %v971_v26 = vadd.f32 %v970_v37, %v7335_v7  ;;  %v3325_v7 = vrot.slane %v3323_v59, 1  ;;  %v6584_v59 = vld [vmem:[%s5736_s30 + $0x68] sm:$0xff] }
 0x268   : > { %v1710_v35 = vadd.f32 %v1657_v40, %v1284_v1  ;;  %v3319_v1 = vshrl.u32 %v6530_v2, 16  ;;  %v5567_v2 = vld [vmem:[%s5736_s30 + $0x58] sm:$0xff] }
 0x269   : > { %5186 = vmatmul.msk.bf16.gmra.mxu1 %vm590_vm1, %v2362_v44 }
 0x26a   : > { %v2286_v41 = vpop.f32.mrf.mxu0  ;;  %5312 = vmatmul.msk.bf16.gmra.mxu2 %vm590_vm1, %v5566_v27  ;;  %v6552_v39 = vadd.f32 %v2283_v30, %v1710_v35  ;;  %5434 = vmatmul.msk.bf16.gmra.mxu3 %vm590_vm1, %v3318_v32  ;;  %v4078_v30 = vld [vmem:[%s7290_s2 + $0x80] sm:$0xff]  ;;  %v5655_v27 = vld [vmem:[%s5736_s30 + $0x54] sm:$0xff] }
 0x26b   : > { %4192 = vperm.xlu1 %5639, %v4078_v30   ;;  %v2363_v35 = vrot.slane %v5655_v27, 1  ;;  %v7336_v32 = vld [vmem:[#allocation18_spill] sm:$0xff] }
 0x26c   : > { %7334 = vst [vmem:[#allocation4_spill] sm:$0xff] %v6552_v39 }
 0x26d   : > { %5464 = vmatmul.msk.bf16.gmra.mxu0 %vm590_vm1, %v3725_v49  ;;  %v1234_v14 = vpop.f32.mrf.mxu2  ;;  %v1660_v6 = vpop.f32.mrf.mxu3  ;;  %v3321_v49 = vor.u32 %v3319_v1, %v3317_v20  ;;  %v2364_v62 = vsel %vm982_vm2, %v2361_v16, %v2363_v35 }
 0x26e   : > { %v1285_v28 = vadd.f32 %v1234_v14, %v971_v26  ;;  %v972_v21 = vpop.f32.mrf.mxu1 }
 0x26f   : > { %v973_v38 = vadd.f32 %v972_v21, %v7336_v32  ;;  %v4076_v21 = vld [vmem:[%s7290_s2 + $0x70] sm:$0xff] }
 0x270   : > { %v1711_v44 = vadd.f32 %v1660_v6, %v1285_v28  ;;  %v3726_v6 = vrot.slane %v6557_v31, 1  ;;  %4182 = vperm.xlu2 %5640, %v4076_v21  }
 0x272   : > { %v2288_v40 = vpop.f32.mrf.mxu0  ;;  %v6565_v37 = vadd.f32 %v2286_v41, %v1711_v44  ;;  %v3326_v41 = vsel %vm387_vm0, %v3321_v49, %v3325_v7  ;;  %v3727_v44 = vsel %vm982_vm2, %v3724_v57, %v3726_v6  ;;  %v4113_v49 = vpop.permute.xlu0 %4112  ;;  %v3327_v57 = vshrl.u32 %v6557_v31, 16 }
 0x275   : > { %v1236_v26 = vpop.f32.mrf.mxu2  ;;  %v1662_v28 = vpop.f32.mrf.mxu3 }
 0x276   : > { %v1286_v14 = vadd.f32 %v1236_v26, %v973_v38  ;;  %v2482_v39 = vpop.f32.mrf.mxu1 }
 0x277   : > { %v2602_v16 = vadd.f32 %v2482_v39, %v6104_v13  ;;  %v4080_v13 = vld [vmem:[%s7290_s2 + $0x90] sm:$0xff] }
 0x278   : > { %v1712_v30 = vadd.f32 %v1662_v28, %v1286_v14  ;;  %4202 = vperm.xlu0 %5638, %v4080_v13   ;;  %v6599_v28 = vld [vmem:[%s5736_s30 + $0x5c] sm:$0xff] }
 0x279   : > { %5187 = vmatmul.msk.bf16.gmra.mxu1 %vm590_vm1, %v2364_v62  ;;  %v7294_v31 = vrot.slane %v6599_v28, 1 }
 0x27a   : > { %v3845_v20 = vpop.f32.mrf.mxu0  ;;  %5313 = vmatmul.msk.bf16.gmra.mxu2 %vm590_vm1, %v5567_v2  ;;  %v6579_v1 = vadd.f32 %v2288_v40, %v1712_v30  ;;  %5435 = vmatmul.msk.bf16.gmra.mxu3 %vm590_vm1, %v3326_v41  ;;  %v3331_v40 = vshll.u32 %v6584_v59, 16  ;;  %v3329_v30 = vor.u32 %v3327_v57, %v3325_v7  ;;  %v4081_v7 = vld [vmem:[%s7290_s2 + $0x98] sm:$0xff] }
 0x27b   : > { %4207 = vperm.xlu1 %5639, %v4081_v7  }
 0x27c   : > { %7337 = vst [vmem:[#allocation5_spill] sm:$0xff] %v6579_v1  ;;  %v3333_v41 = vrot.slane %v3331_v40, 1  ;;  %v5569_v1 = vld [vmem:[%s5736_s30 + $0x68] sm:$0xff] }
 0x27d   : > { %5465 = vmatmul.msk.bf16.gmra.mxu0 %vm590_vm1, %v3727_v44  ;;  %v2908_v27 = vpop.f32.mrf.mxu2  ;;  %v3534_v62 = vpop.f32.mrf.mxu3 }
 0x27e   : > { %v3028_v32 = vadd.f32 %v2908_v27, %v2602_v16  ;;  %v2484_v38 = vpop.f32.mrf.mxu1  ;;  %v5568_v27 = vld [vmem:[%s5736_s30 + $0x60] sm:$0xff] }
 0x27f   : > { %v2603_v2 = vadd.f32 %v2484_v38, %v6114_v55  ;;  %v3334_v55 = vsel %vm387_vm0, %v3329_v30, %v3333_v41  ;;  %v4118_v38 = vpop.permute.xlu0 %4117  ;;  %v6624_v30 = vld [vmem:[%s5736_s30 + $0x70] sm:$0xff] }
 0x280   : > { %v3654_v26 = vadd.f32 %v3534_v62, %v3028_v32  ;;  %v7293_v32 = vrot.slane %v6584_v59, 1 }
 0x282   : > { %v3847_v39 = vpop.f32.mrf.mxu0  ;;  %v3965_v14 = vadd.f32 %v3845_v20, %v3654_v26  ;;  %v2366_v20 = vsel %vm982_vm2, %v2363_v35, %v7294_v31  ;;  %v3729_v35 = vsel %vm982_vm2, %v3726_v6, %v7293_v32 }
 0x284   : > { %4014 = vst.msk [vmem:[%s6593_s29] sm:$0xff] %vm4013_vm3, %v3965_v14  ;;  %v4350_v26 = vmul.f32 %v4113_v49, %v3965_v14 }
 0x285   : > { %v2910_v21 = vpop.f32.mrf.mxu2  ;;  %v3536_v16 = vpop.f32.mrf.mxu3 }
 0x286   : > { %v3029_v44 = vadd.f32 %v2910_v21, %v2603_v2  ;;  %v2487_v62 = vpop.f32.mrf.mxu1  ;;  %v4501_v49 = vmul.f32 %v4350_v26, %v4350_v26 }
 0x287   : > { %v2604_v14 = vadd.f32 %v2487_v62, %v6120_v48  ;;  %v4123_v48 = vpop.permute.xlu1 %4122  ;;  %v3335_v62 = vshrl.u32 %v6584_v59, 16 }
 0x288   : > { %v3655_v13 = vadd.f32 %v3536_v16, %v3029_v44 }
 0x289   : > { %5188 = vmatmul.msk.bf16.gmra.mxu1 %vm590_vm1, %v2366_v20 }
 0x28a   : > { %v3850_v57 = vpop.f32.mrf.mxu0  ;;  %5314 = vmatmul.msk.bf16.gmra.mxu2 %vm590_vm1, %v5568_v27  ;;  %v3966_v40 = vadd.f32 %v3847_v39, %v3655_v13  ;;  %5436 = vmatmul.msk.bf16.gmra.mxu3 %vm590_vm1, %v3334_v55  ;;  %v4398_v39 = vsel %vm4013_vm3, %v4350_v26, 0.0  ;;  %v4549_v55 = vsel %vm4013_vm3, %v4501_v49, 0.0 }
 0x28c   : > { %4015 = vst.msk [vmem:[%s6593_s29 + $0x8] sm:$0xff] %vm4013_vm3, %v3966_v40  ;;  %v4351_v2 = vmul.f32 %v4118_v38, %v3966_v40  ;;  %v3339_v40 = vshll.u32 %v6624_v30, 16 }
 0x28d   : > { %5466 = vmatmul.msk.bf16.gmra.mxu0 %vm590_vm1, %v3729_v35  ;;  %v2913_v21 = vpop.f32.mrf.mxu2  ;;  %v3539_v27 = vpop.f32.mrf.mxu3  ;;  %v4079_v35 = vld [vmem:[%s7290_s2 + $0x88] sm:$0xff] }
 0x28e   : > { %v4399_v44 = vsel %vm4013_vm3, %v4351_v2, 0.0  ;;  %v4502_v16 = vmul.f32 %v4351_v2, %v4351_v2  ;;  %v3030_v6 = vadd.f32 %v2913_v21, %v2604_v14  ;;  %v2489_v13 = vpop.f32.mrf.mxu1  ;;  %4197 = vperm.xlu2 %5640, %v4079_v35   ;;  %v6637_v21 = vld [vmem:[%s5736_s30 + $0x64] sm:$0xff] }
 0x28f   : > { %v4400_v20 = vadd.f32 %v4399_v44, %v4398_v39  ;;  %v2367_v39 = vrot.slane %v6637_v21, 1  ;;  %v2605_v49 = vadd.f32 %v2489_v13, %v6130_v17  ;;  %v7338_v17 = vrot.slane %v6599_v28, 1 }
 0x290   : > { %v4550_v38 = vsel %vm4013_vm3, %v4502_v16, 0.0  ;;  %v3656_v7 = vadd.f32 %v3539_v27, %v3030_v6  ;;  %v3337_v16 = vor.u32 %v3335_v62, %v3333_v41  ;;  %v3341_v6 = vrot.slane %v3339_v40, 1 }
 0x291   : > { %v4551_v26 = vadd.f32 %v4550_v38, %v4549_v55  ;;  %v2368_v13 = vsel %vm982_vm2, %v7338_v17, %v2367_v39 }
 0x292   : > { %v3852_v14 = vpop.f32.mrf.mxu0  ;;  %v3967_v2 = vadd.f32 %v3850_v57, %v3656_v7  ;;  %v3730_v57 = vrot.slane %v6624_v30, 1  ;;  %v3342_v62 = vsel %vm387_vm0, %v3337_v16, %v3341_v6  ;;  %v6668_v16 = vld [vmem:[%s5736_s30 + $0x78] sm:$0xff] }
 0x294   : > { %4016 = vst.msk [vmem:[%s6593_s29 + $0x10] sm:$0xff] %vm4013_vm3, %v3967_v2  ;;  %v4352_v44 = vmul.f32 %v4123_v48, %v3967_v2  ;;  %v4128_v2 = vpop.permute.xlu1 %4127 }
 0x295   : > { %v2915_v27 = vpop.f32.mrf.mxu2  ;;  %v3541_v31 = vpop.f32.mrf.mxu3 }
 0x296   : > { %v4401_v55 = vsel %vm4013_vm3, %v4352_v44, 0.0  ;;  %v4503_v38 = vmul.f32 %v4352_v44, %v4352_v44  ;;  %v3031_v32 = vadd.f32 %v2915_v27, %v2605_v49  ;;  %v2492_v35 = vpop.f32.mrf.mxu1  ;;  %v7339_v44 = vrot.slane %v6584_v59, 1 }
 0x297   : > { %v4402_v7 = vadd.f32 %v4401_v55, %v4400_v20  ;;  %v4083_v20 = vld [vmem:[%s7290_s2 + $0xa8] sm:$0xff] }
 0x298   : > { %v4552_v41 = vsel %vm4013_vm3, %v4503_v38, 0.0  ;;  %v3657_v48 = vadd.f32 %v3541_v31, %v3031_v32  ;;  %v3731_v31 = vsel %vm982_vm2, %v7339_v44, %v3730_v57  ;;  %4217 = vperm.xlu0 %5638, %v4083_v20   ;;  %v2606_v32 = vadd.f32 %v2492_v35, %v6136_v15  ;;  %v6679_v44 = vld [vmem:[%s5736_s30 + $0x6c] sm:$0xff] }
 0x299   : > { %v4553_v40 = vadd.f32 %v4552_v41, %v4551_v26  ;;  %5189 = vmatmul.msk.bf16.gmra.mxu1 %vm590_vm1, %v2368_v13  ;;  %v4133_v13 = vpop.permute.xlu2 %4132  ;;  %v3343_v41 = vshrl.u32 %v6624_v30, 16 }
 0x29a   : > { %v3855_v49 = vpop.f32.mrf.mxu0  ;;  %5315 = vmatmul.msk.bf16.gmra.mxu2 %vm590_vm1, %v5569_v1  ;;  %v3968_v28 = vadd.f32 %v3852_v14, %v3657_v48  ;;  %5437 = vmatmul.msk.bf16.gmra.mxu3 %vm590_vm1, %v3342_v62  ;;  %v3347_v48 = vshll.u32 %v6668_v16, 16 }
 0x29c   : > { %4017 = vst.msk [vmem:[%s6593_s29 + $0x18] sm:$0xff] %vm4013_vm3, %v3968_v28  ;;  %v4353_v26 = vmul.f32 %v4128_v2, %v3968_v28  ;;  %v4084_v2 = vld [vmem:[%s7290_s2 + $0xb0] sm:$0xff] }
 0x29d   : > { %5467 = vmatmul.msk.bf16.gmra.mxu0 %vm590_vm1, %v3731_v31  ;;  %v2918_v1 = vpop.f32.mrf.mxu2  ;;  %v3544_v55 = vpop.f32.mrf.mxu3  ;;  %4222 = vperm.xlu1 %5639, %v4084_v2  }
 0x29e   : > { %v4403_v14 = vsel %vm4013_vm3, %v4353_v26, 0.0  ;;  %v4504_v27 = vmul.f32 %v4353_v26, %v4353_v26  ;;  %v3032_v59 = vadd.f32 %v2918_v1, %v2606_v32  ;;  %v2494_v17 = vpop.f32.mrf.mxu1  ;;  %v3345_v26 = vor.u32 %v3343_v41, %v3341_v6 }
 0x29f   : > { %v4404_v38 = vadd.f32 %v4403_v14, %v4402_v7  ;;  %v2369_v7 = vrot.slane %v6679_v44, 1  ;;  %v2607_v31 = vadd.f32 %v2494_v17, %v6146_v36  ;;  %v3349_v1 = vrot.slane %v3347_v48, 1 }
 0x2a0   : > { %v4554_v15 = vsel %vm4013_vm3, %v4504_v27, 0.0  ;;  %v3658_v35 = vadd.f32 %v3544_v55, %v3032_v59 }
 0x2a1   : > { %v4555_v62 = vadd.f32 %v4554_v15, %v4553_v40  ;;  %v5570_v15 = vld [vmem:[%s5736_s30 + $0x70] sm:$0xff]  ;;  %v2370_v36 = vsel %vm982_vm2, %v2367_v39, %v2369_v7  ;;  %v4138_v48 = vpop.permute.xlu2 %4137 }
 0x2a2   : > { %v3857_v20 = vpop.f32.mrf.mxu0  ;;  %v3969_v28 = vadd.f32 %v3855_v49, %v3658_v35  ;;  %v3732_v49 = vrot.slane %v6668_v16, 1 }
 0x2a4   : > { %4018 = vst.msk [vmem:[%s6593_s29 + $0x20] sm:$0xff] %vm4013_vm3, %v3969_v28  ;;  %v4354_v32 = vmul.f32 %v4133_v13, %v3969_v28  ;;  %v3350_v13 = vsel %vm387_vm0, %v3345_v26, %v3349_v1  ;;  %v3733_v39 = vsel %vm982_vm2, %v3730_v57, %v3732_v49 }
 0x2a5   : > { %v2920_v40 = vpop.f32.mrf.mxu2  ;;  %v3546_v55 = vpop.f32.mrf.mxu3 }
 0x2a6   : > { %v4405_v14 = vsel %vm4013_vm3, %v4354_v32, 0.0  ;;  %v4505_v27 = vmul.f32 %v4354_v32, %v4354_v32  ;;  %v3033_v59 = vadd.f32 %v2920_v40, %v2607_v31  ;;  %v2497_v2 = vpop.f32.mrf.mxu1  ;;  %v6710_v32 = vld [vmem:[%s5736_s30 + $0x80] sm:$0xff] }
 0x2a7   : > { %v4406_v35 = vadd.f32 %v4405_v14, %v4404_v38  ;;  %v4082_v38 = vld [vmem:[%s7290_s2 + $0xa0] sm:$0xff] }
 0x2a8   : > { %v4556_v6 = vsel %vm4013_vm3, %v4505_v27, 0.0  ;;  %v3659_v17 = vadd.f32 %v3546_v55, %v3033_v59  ;;  %4212 = vperm.xlu2 %5640, %v4082_v38   ;;  %v3351_v55 = vshrl.u32 %v6668_v16, 16 }
 0x2a9   : > { %v4557_v41 = vadd.f32 %v4556_v6, %v4555_v62  ;;  %5190 = vmatmul.msk.bf16.gmra.mxu1 %vm590_vm1, %v2370_v36  ;;  %v2608_v62 = vadd.f32 %v2497_v2, %v6152_v10  ;;  %v4143_v36 = vpop.permute.xlu0 %4142  ;;  %v4086_v6 = vld [vmem:[%s7290_s2 + $0xc0] sm:$0xff] }
 0x2aa   : > { %v3860_v28 = vpop.f32.mrf.mxu0  ;;  %5316 = vmatmul.msk.bf16.gmra.mxu2 %vm590_vm1, %v5570_v15  ;;  %v3970_v21 = vadd.f32 %v3857_v20, %v3659_v17  ;;  %5438 = vmatmul.msk.bf16.gmra.mxu3 %vm590_vm1, %v3350_v13  ;;  %v3355_v15 = vshll.u32 %v6710_v32, 16 }
 0x2ab   : > { %4232 = vperm.xlu0 %5638, %v4086_v6  }
 0x2ac   : > { %4019 = vst.msk [vmem:[%s6593_s29 + $0x28] sm:$0xff] %vm4013_vm3, %v3970_v21  ;;  %v4355_v31 = vmul.f32 %v4138_v48, %v3970_v21  ;;  %v6721_v48 = vld [vmem:[%s5736_s30 + $0x74] sm:$0xff] }
 0x2ad   : > { %5468 = vmatmul.msk.bf16.gmra.mxu0 %vm590_vm1, %v3733_v39  ;;  %v2923_v26 = vpop.f32.mrf.mxu2  ;;  %v3549_v14 = vpop.f32.mrf.mxu3  ;;  %v3353_v39 = vor.u32 %v3351_v55, %v3349_v1  ;;  %v4087_v1 = vld [vmem:[%s7290_s2 + $0xc8] sm:$0xff] }
 0x2ae   : > { %v4407_v20 = vsel %vm4013_vm3, %v4355_v31, 0.0  ;;  %v4506_v40 = vmul.f32 %v4355_v31, %v4355_v31  ;;  %v3034_v30 = vadd.f32 %v2923_v26, %v2608_v62  ;;  %v2499_v27 = vpop.f32.mrf.mxu1  ;;  %4237 = vperm.xlu1 %5639, %v4087_v1  }
 0x2af   : > { %v4408_v57 = vadd.f32 %v4407_v20, %v4406_v35  ;;  %v2371_v35 = vrot.slane %v6721_v48, 1  ;;  %v2609_v38 = vadd.f32 %v2499_v27, %v6162_v11 }
 0x2b0   : > { %v4558_v59 = vsel %vm4013_vm3, %v4506_v40, 0.0  ;;  %v3660_v10 = vadd.f32 %v3549_v14, %v3034_v30  ;;  %v5571_v30 = vld [vmem:[%s5736_s30 + $0x78] sm:$0xff] }
 0x2b1   : > { %v4559_v2 = vadd.f32 %v4558_v59, %v4557_v41  ;;  %v3357_v41 = vrot.slane %v3355_v15, 1  ;;  %v2372_v11 = vsel %vm982_vm2, %v2369_v7, %v2371_v35  ;;  %v4148_v15 = vpop.permute.xlu1 %4147 }
 0x2b2   : > { %v3862_v17 = vpop.f32.mrf.mxu0  ;;  %v3971_v13 = vadd.f32 %v3860_v28, %v3660_v10  ;;  %v3734_v28 = vrot.slane %v6710_v32, 1 }
 0x2b3   : > { %v3358_v55 = vsel %vm387_vm0, %v3353_v39, %v3357_v41 }
 0x2b4   : > { %4020 = vst.msk [vmem:[%s6593_s29 + $0x30] sm:$0xff] %vm4013_vm3, %v3971_v13  ;;  %v4356_v21 = vmul.f32 %v4143_v36, %v3971_v13  ;;  %v3735_v7 = vsel %vm982_vm2, %v3732_v49, %v3734_v28  ;;  %v6752_v13 = vld [vmem:[%s5736_s30 + $0x88] sm:$0xff] }
 0x2b5   : > { %v2925_v62 = vpop.f32.mrf.mxu2  ;;  %v3551_v40 = vpop.f32.mrf.mxu3 }
 0x2b6   : > { %v4409_v31 = vsel %vm4013_vm3, %v4356_v21, 0.0  ;;  %v4507_v26 = vmul.f32 %v4356_v21, %v4356_v21  ;;  %v3035_v20 = vadd.f32 %v2925_v62, %v2609_v38  ;;  %v2502_v59 = vpop.f32.mrf.mxu1 }
 0x2b7   : > { %v4410_v14 = vadd.f32 %v4409_v31, %v4408_v57  ;;  %v2610_v6 = vadd.f32 %v2502_v59, %v6168_v4  ;;  %v4090_v31 = vld [vmem:[%s7290_s2 + $0xe0] sm:$0xff] }
 0x2b8   : > { %v4560_v27 = vsel %vm4013_vm3, %v4507_v26, 0.0  ;;  %v3661_v10 = vadd.f32 %v3551_v40, %v3035_v20  ;;  %v3359_v40 = vshrl.u32 %v6710_v32, 16  ;;  %4252 = vperm.xlu1 %5639, %v4090_v31  }
 0x2b9   : > { %v4561_v57 = vadd.f32 %v4560_v27, %v4559_v2  ;;  %5191 = vmatmul.msk.bf16.gmra.mxu1 %vm590_vm1, %v2372_v11  ;;  %v4153_v11 = vpop.permute.xlu2 %4152 }
 0x2ba   : > { %v3865_v36 = vpop.f32.mrf.mxu0  ;;  %5317 = vmatmul.msk.bf16.gmra.mxu2 %vm590_vm1, %v5571_v30  ;;  %v3972_v44 = vadd.f32 %v3862_v17, %v3661_v10  ;;  %5439 = vmatmul.msk.bf16.gmra.mxu3 %vm590_vm1, %v3358_v55  ;;  %v4089_v17 = vld [vmem:[%s7290_s2 + $0xd8] sm:$0xff]  ;;  %v3363_v30 = vshll.u32 %v6752_v13, 16 }
 0x2bb   : > { %4247 = vperm.xlu0 %5638, %v4089_v17   ;;  %v6769_v10 = vld [vmem:[%s5736_s30 + $0x7c] sm:$0xff] }
 0x2bc   : > { %4021 = vst.msk [vmem:[%s6593_s29 + $0x38] sm:$0xff] %vm4013_vm3, %v3972_v44  ;;  %v4357_v2 = vmul.f32 %v4148_v15, %v3972_v44  ;;  %v2373_v55 = vrot.slane %v6769_v10, 1  ;;  %v4091_v10 = vld [vmem:[%s7290_s2 + $0xe8] sm:$0xff] }
 0x2bd   : > { %5469 = vmatmul.msk.bf16.gmra.mxu0 %vm590_vm1, %v3735_v7  ;;  %v2928_v38 = vpop.f32.mrf.mxu2  ;;  %v3554_v39 = vpop.f32.mrf.mxu3  ;;  %v3361_v7 = vor.u32 %v3359_v40, %v3357_v41 }
 0x2be   : > { %v4411_v16 = vsel %vm4013_vm3, %v4357_v2, 0.0  ;;  %v4508_v21 = vmul.f32 %v4357_v2, %v4357_v2  ;;  %v3036_v49 = vadd.f32 %v2928_v38, %v2610_v6  ;;  %v2504_v62 = vpop.f32.mrf.mxu1  ;;  %v4092_v2 = vld [vmem:[%s7290_s2 + $0xf0] sm:$0xff]  ;;  %v2374_v41 = vsel %vm982_vm2, %v2371_v35, %v2373_v55  ;;  %v4158_v40 = vpop.permute.xlu0 %4157 }
 0x2bf   : > { %v4412_v4 = vadd.f32 %v4411_v16, %v4410_v14  ;;  %v4085_v14 = vld [vmem:[%s7290_s2 + $0xb8] sm:$0xff]  ;;  %v2611_v15 = vadd.f32 %v2504_v62, %v6178_v52 }
 0x2c0   : > { %v4562_v26 = vsel %vm4013_vm3, %v4508_v21, 0.0  ;;  %v3662_v20 = vadd.f32 %v3554_v39, %v3036_v49  ;;  %4227 = vperm.xlu2 %5640, %v4085_v14   ;;  %v5572_v21 = vld [vmem:[%s5736_s30 + $0x80] sm:$0xff]  ;;  %v3736_v49 = vrot.slane %v6752_v13, 1  ;;  %v4093_v62 = vld [vmem:[%s7290_s2 + $0xf8] sm:$0xff]  ;;  %v6803_v14 = vld [vmem:[%s5736_s30 + $0x90] sm:$0xff] }
 0x2c1   : > { %v4563_v59 = vadd.f32 %v4562_v26, %v4561_v57  ;;  %v3365_v57 = vrot.slane %v3363_v30, 1  ;;  %4267 = vperm.xlu1 %5639, %v4093_v62   ;;  %v6820_v62 = vld [vmem:[%s5736_s30 + $0x84] sm:$0xff] }
 0x2c2   : > { %v3867_v1 = vpop.f32.mrf.mxu0  ;;  %v3973_v27 = vadd.f32 %v3865_v36, %v3662_v20  ;;  %v3737_v35 = vsel %vm982_vm2, %v3734_v28, %v3736_v49 }
 0x2c3   : > { %4262 = vperm.xlu0 %5638, %v4092_v2   ;;  %v3366_v20 = vsel %vm387_vm0, %v3361_v7, %v3365_v57 }
 0x2c4   : > { %4022 = vst.msk [vmem:[%s6593_s29 + $0x40] sm:$0xff] %vm4013_vm3, %v3973_v27  ;;  %v4358_v44 = vmul.f32 %v4153_v11, %v3973_v27 }
 0x2c5   : > { %v2930_v6 = vpop.f32.mrf.mxu2  ;;  %v3556_v16 = vpop.f32.mrf.mxu3 }
 0x2c6   : > { %v4413_v38 = vsel %vm4013_vm3, %v4358_v44, 0.0  ;;  %v4509_v36 = vmul.f32 %v4358_v44, %v4358_v44  ;;  %v3037_v17 = vadd.f32 %v2930_v6, %v2611_v15  ;;  %v2507_v39 = vpop.f32.mrf.mxu1  ;;  %v4096_v6 = vld [vmem:[%s7290_s2 + $0x110] sm:$0xff] }
 0x2c7   : > { %v4414_v52 = vadd.f32 %v4413_v38, %v4412_v4  ;;  %v2612_v11 = vadd.f32 %v2507_v39, %v6184_v56 }
 0x2c8   : > { %v4564_v31 = vsel %vm4013_vm3, %v4509_v36, 0.0  ;;  %v3663_v26 = vadd.f32 %v3556_v16, %v3037_v17  ;;  %v3367_v36 = vshrl.u32 %v6752_v13, 16  ;;  %v3371_v17 = vshll.u32 %v6803_v14, 16 }
 0x2c9   : > { %v4565_v4 = vadd.f32 %v4564_v31, %v4563_v59  ;;  %5192 = vmatmul.msk.bf16.gmra.mxu1 %vm590_vm1, %v2374_v41  ;;  %4282 = vperm.xlu1 %5639, %v4096_v6   ;;  %v2375_v31 = vrot.slane %v6820_v62, 1  ;;  %v4097_v62 = vld [vmem:[%s7290_s2 + $0x118] sm:$0xff] }
 0x2ca   : > { %v3870_v30 = vpop.f32.mrf.mxu0  ;;  %5318 = vmatmul.msk.bf16.gmra.mxu2 %vm590_vm1, %v5572_v21  ;;  %v3974_v48 = vadd.f32 %v3867_v1, %v3663_v26  ;;  %5440 = vmatmul.msk.bf16.gmra.mxu3 %vm590_vm1, %v3366_v20  ;;  %v4095_v1 = vld [vmem:[%s7290_s2 + $0x108] sm:$0xff]  ;;  %v4163_v21 = vpop.permute.xlu1 %4162 }
 0x2cb   : > { %4277 = vperm.xlu0 %5638, %v4095_v1   ;;  %v5573_v1 = vld [vmem:[%s5736_s30 + $0x88] sm:$0xff] }
 0x2cc   : > { %4023 = vst.msk [vmem:[%s6593_s29 + $0x48] sm:$0xff] %vm4013_vm3, %v3974_v48  ;;  %v4359_v59 = vmul.f32 %v4158_v40, %v3974_v48  ;;  %v3369_v40 = vor.u32 %v3367_v36, %v3365_v57  ;;  %v2376_v57 = vsel %vm982_vm2, %v2373_v55, %v2375_v31 }
 0x2cd   : > { %5470 = vmatmul.msk.bf16.gmra.mxu0 %vm590_vm1, %v3737_v35  ;;  %v2933_v27 = vpop.f32.mrf.mxu2  ;;  %v3559_v44 = vpop.f32.mrf.mxu3  ;;  %v4098_v35 = vld [vmem:[%s7290_s2 + $0x120] sm:$0xff] }
 0x2ce   : > { %v4415_v32 = vsel %vm4013_vm3, %v4359_v59, 0.0  ;;  %v4510_v15 = vmul.f32 %v4359_v59, %v4359_v59  ;;  %v3038_v28 = vadd.f32 %v2933_v27, %v2612_v11  ;;  %v2509_v7 = vpop.f32.mrf.mxu1 }
 0x2cf   : > { %v4416_v56 = vadd.f32 %v4415_v32, %v4414_v52  ;;  %v4088_v52 = vld [vmem:[%s7290_s2 + $0xd0] sm:$0xff]  ;;  %v2613_v26 = vadd.f32 %v2509_v7, %v6194_v0  ;;  %v3738_v32 = vrot.slane %v6803_v14, 1 }
 0x2d0   : > { %v4566_v2 = vsel %vm4013_vm3, %v4510_v15, 0.0  ;;  %v3664_v38 = vadd.f32 %v3559_v44, %v3038_v28  ;;  %4242 = vperm.xlu2 %5640, %v4088_v52   ;;  %v4099_v28 = vld [vmem:[%s7290_s2 + $0x128] sm:$0xff] }
 0x2d1   : > { %v4567_v16 = vadd.f32 %v4566_v2, %v4565_v4  ;;  %v3373_v4 = vrot.slane %v3371_v17, 1  ;;  %4297 = vperm.xlu1 %5639, %v4099_v28   ;;  %v4168_v2 = vpop.permute.xlu2 %4167  ;;  %v3739_v36 = vsel %vm982_vm2, %v3736_v49, %v3738_v32 }
 0x2d2   : > { %v3872_v39 = vpop.f32.mrf.mxu0  ;;  %v3975_v41 = vadd.f32 %v3870_v30, %v3664_v38 }
 0x2d3   : > { %4292 = vperm.xlu0 %5638, %v4098_v35   ;;  %v3374_v6 = vsel %vm387_vm0, %v3369_v40, %v3373_v4  ;;  %v4102_v40 = vld [vmem:[%s7290_s2 + $0x140] sm:$0xff] }
 0x2d4   : > { %4024 = vst.msk [vmem:[%s6593_s29 + $0x50] sm:$0xff] %vm4013_vm3, %v3975_v41  ;;  %v4360_v20 = vmul.f32 %v4163_v21, %v3975_v41  ;;  %v6857_v21 = vld [vmem:[%s5736_s30 + $0x98] sm:$0xff] }
 0x2d5   : > { %v2935_v48 = vpop.f32.mrf.mxu2  ;;  %v3561_v27 = vpop.f32.mrf.mxu3 }
 0x2d6   : > { %v4417_v11 = vsel %vm4013_vm3, %v4360_v20, 0.0  ;;  %v4511_v30 = vmul.f32 %v4360_v20, %v4360_v20  ;;  %v3039_v59 = vadd.f32 %v2935_v48, %v2613_v26  ;;  %v2512_v15 = vpop.f32.mrf.mxu1 }
 0x2d7   : > { %v4418_v0 = vadd.f32 %v4417_v11, %v4416_v56  ;;  %v2614_v17 = vadd.f32 %v2512_v15, %v6200_v18  ;;  %v3375_v11 = vshrl.u32 %v6803_v14, 16 }
 0x2d8   : > { %v4568_v44 = vsel %vm4013_vm3, %v4511_v30, 0.0  ;;  %v3665_v7 = vadd.f32 %v3561_v27, %v3039_v59  ;;  %4257 = vperm.xlu2 %5640, %v4091_v10   ;;  %v3379_v30 = vshll.u32 %v6857_v21, 16  ;;  %v4173_v27 = vpop.permute.xlu0 %4172  ;;  %v4104_v10 = vld [vmem:[%s7290_s2 + $0x150] sm:$0xff] }
 0x2d9   : > { %v4569_v56 = vadd.f32 %v4568_v44, %v4567_v16  ;;  %5193 = vmatmul.msk.bf16.gmra.mxu1 %vm590_vm1, %v2376_v57  ;;  %4312 = vperm.xlu1 %5639, %v4102_v40   ;;  %v6874_v57 = vld [vmem:[%s5736_s30 + $0x8c] sm:$0xff] }
 0x2da   : > { %v3875_v38 = vpop.f32.mrf.mxu0  ;;  %5319 = vmatmul.msk.bf16.gmra.mxu2 %vm590_vm1, %v5573_v1  ;;  %v3976_v55 = vadd.f32 %v3872_v39, %v3665_v7  ;;  %5441 = vmatmul.msk.bf16.gmra.mxu3 %vm590_vm1, %v3374_v6  ;;  %v4101_v39 = vld [vmem:[%s7290_s2 + $0x138] sm:$0xff]  ;;  %v4094_v1 = vld [vmem:[%s7290_s2 + $0x100] sm:$0xff]  ;;  %v2377_v28 = vrot.slane %v6874_v57, 1  ;;  %v3377_v6 = vor.u32 %v3375_v11, %v3373_v4 }
 0x2db   : > { %4307 = vperm.xlu0 %5638, %v4101_v39  }
 0x2dc   : > { %4025 = vst.msk [vmem:[%s6593_s29 + $0x58] sm:$0xff] %vm4013_vm3, %v3976_v55  ;;  %v4361_v16 = vmul.f32 %v4168_v2, %v3976_v55  ;;  %v2378_v4 = vsel %vm982_vm2, %v2375_v31, %v2377_v28 }
 0x2dd   : > { %5471 = vmatmul.msk.bf16.gmra.mxu0 %vm590_vm1, %v3739_v36  ;;  %v2938_v52 = vpop.f32.mrf.mxu2  ;;  %v3564_v26 = vpop.f32.mrf.mxu3 }
 0x2de   : > { %v4419_v13 = vsel %vm4013_vm3, %v4361_v16, 0.0  ;;  %v4512_v49 = vmul.f32 %v4361_v16, %v4361_v16  ;;  %v3040_v41 = vadd.f32 %v2938_v52, %v2614_v17  ;;  %v2514_v20 = vpop.f32.mrf.mxu1  ;;  %v5574_v16 = vld [vmem:[%s5736_s30 + $0x90] sm:$0xff]  ;;  %v3740_v52 = vrot.slane %v6857_v21, 1 }
 0x2df   : > { %v4420_v18 = vadd.f32 %v4419_v13, %v4418_v0  ;;  %v2615_v44 = vadd.f32 %v2514_v20, %v6210_v53  ;;  %v4105_v13 = vld [vmem:[%s7290_s2 + $0x158] sm:$0xff]  ;;  %v4178_v20 = vpop.permute.xlu1 %4177 }
 0x2e0   : > { %v4570_v48 = vsel %vm4013_vm3, %v4512_v49, 0.0  ;;  %v3666_v35 = vadd.f32 %v3564_v26, %v3040_v41  ;;  %4272 = vperm.xlu2 %5640, %v4094_v1  }
 0x2e1   : > { %v4571_v59 = vadd.f32 %v4570_v48, %v4569_v56  ;;  %v3381_v56 = vrot.slane %v3379_v30, 1  ;;  %4327 = vperm.xlu1 %5639, %v4105_v13   ;;  %v3741_v48 = vsel %vm982_vm2, %v3738_v32, %v3740_v52  ;;  %v6911_v30 = vld [vmem:[%s5736_s30 + $0xa0] sm:$0xff] }
 0x2e2   : > { %v3877_v0 = vpop.f32.mrf.mxu0  ;;  %v3977_v15 = vadd.f32 %v3875_v38, %v3666_v35 }
 0x2e3   : > { %4322 = vperm.xlu0 %5638, %v4104_v10   ;;  %v3382_v26 = vsel %vm387_vm0, %v3377_v6, %v3381_v56  ;;  %v3387_v10 = vshll.u32 %v6911_v30, 16 }
 0x2e4   : > { %4026 = vst.msk [vmem:[%s6593_s29 + $0x60] sm:$0xff] %vm4013_vm3, %v3977_v15  ;;  %v4362_v7 = vmul.f32 %v4173_v27, %v3977_v15  ;;  %v4107_v27 = vld [vmem:[%s7290_s2 + $0x168] sm:$0xff] }
 0x2e5   : > { %v2940_v2 = vpop.f32.mrf.mxu2  ;;  %v3566_v17 = vpop.f32.mrf.mxu3 }
 0x2e6   : > { %v4421_v55 = vsel %vm4013_vm3, %v4362_v7, 0.0  ;;  %v4513_v38 = vmul.f32 %v4362_v7, %v4362_v7  ;;  %v3041_v36 = vadd.f32 %v2940_v2, %v2615_v44  ;;  %v2517_v39 = vpop.f32.mrf.mxu1  ;;  %v4108_v44 = vld [vmem:[%s7290_s2 + $0x170] sm:$0xff]  ;;  %v3383_v2 = vshrl.u32 %v6857_v21, 16 }
 0x2e7   : > { %v4422_v53 = vadd.f32 %v4421_v55, %v4420_v18  ;;  %v2616_v35 = vadd.f32 %v2517_v39, %v6216_v63 }
 0x2e8   : > { %v4572_v49 = vsel %vm4013_vm3, %v4513_v38, 0.0  ;;  %v3667_v41 = vadd.f32 %v3566_v17, %v3041_v36  ;;  %4287 = vperm.xlu2 %5640, %v4097_v62   ;;  %v4183_v38 = vpop.permute.xlu2 %4182  ;;  %v4100_v36 = vld [vmem:[%s7290_s2 + $0x130] sm:$0xff] }
 0x2e9   : > { %v4573_v18 = vadd.f32 %v4572_v49, %v4571_v59  ;;  %5194 = vmatmul.msk.bf16.gmra.mxu1 %vm590_vm1, %v2378_v4  ;;  %4342 = vperm.xlu1 %5639, %v4108_v44   ;;  %v3385_v49 = vor.u32 %v3383_v2, %v3381_v56  ;;  %v6959_v44 = vld [vmem:[%s5736_s30 + $0xa8] sm:$0xff] }
 0x2ea   : > { %v3880_v40 = vpop.f32.mrf.mxu0  ;;  %5320 = vmatmul.msk.bf16.gmra.mxu2 %vm590_vm1, %v5574_v16  ;;  %v3978_v31 = vadd.f32 %v3877_v0, %v3667_v41  ;;  %5442 = vmatmul.msk.bf16.gmra.mxu3 %vm590_vm1, %v3382_v26  ;;  %v3389_v41 = vrot.slane %v3387_v10, 1 }
 0x2eb   : > { %4337 = vperm.xlu0 %5638, %v4107_v27  }
 0x2ec   : > { %4027 = vst.msk [vmem:[%s6593_s29 + $0x68] sm:$0xff] %vm4013_vm3, %v3978_v31  ;;  %v4363_v11 = vmul.f32 %v4178_v20, %v3978_v31  ;;  %v3390_v27 = vsel %vm387_vm0, %v3385_v49, %v3389_v41 }
 0x2ed   : > { %5472 = vmatmul.msk.bf16.gmra.mxu0 %vm590_vm1, %v3741_v48  ;;  %v2943_v59 = vpop.f32.mrf.mxu2  ;;  %v3569_v0 = vpop.f32.mrf.mxu3  ;;  %v5575_v48 = vld [vmem:[%s5736_s30 + $0x98] sm:$0xff] }
 0x2ee   : > { %v4423_v14 = vsel %vm4013_vm3, %v4363_v11, 0.0  ;;  %v4514_v32 = vmul.f32 %v4363_v11, %v4363_v11  ;;  %v3042_v1 = vadd.f32 %v2943_v59, %v2616_v35  ;;  %v2519_v15 = vpop.f32.mrf.mxu1 }
 0x2ef   : > { %v4424_v63 = vadd.f32 %v4423_v14, %v4422_v53  ;;  %v6928_v53 = vld [vmem:[%s5736_s30 + $0x94] sm:$0xff]  ;;  %v2617_v4 = vadd.f32 %v2519_v15, %v6226_v12 }
 0x2f0   : > { %v4574_v7 = vsel %vm4013_vm3, %v4514_v32, 0.0  ;;  %v3668_v6 = vadd.f32 %v3569_v0, %v3042_v1  ;;  %v2379_v39 = vrot.slane %v6928_v53, 1  ;;  %4302 = vperm.xlu2 %5640, %v4100_v36   ;;  %v4188_v32 = vpop.permute.xlu0 %4187  ;;  %v4103_v1 = vld [vmem:[%s7290_s2 + $0x148] sm:$0xff]  ;;  %v3391_v36 = vshrl.u32 %v6911_v30, 16 }
 0x2f1   : > { %v4575_v55 = vadd.f32 %v4574_v7, %v4573_v18 }
 0x2f2   : > { %v3882_v17 = vpop.f32.mrf.mxu0  ;;  %v3979_v16 = vadd.f32 %v3880_v40, %v3668_v6  ;;  %v3742_v40 = vrot.slane %v6911_v30, 1  ;;  %v2380_v12 = vsel %vm982_vm2, %v2377_v28, %v2379_v39 }
 0x2f4   : > { %4028 = vst.msk [vmem:[%s6593_s29 + $0x70] sm:$0xff] %vm4013_vm3, %v3979_v16  ;;  %v4364_v13 = vmul.f32 %v4183_v38, %v3979_v16  ;;  %v3743_v28 = vsel %vm982_vm2, %v3740_v52, %v3742_v40 }
 0x2f5   : > { %v2945_v26 = vpop.f32.mrf.mxu2  ;;  %v3571_v31 = vpop.f32.mrf.mxu3 }
 0x2f6   : > { %v4425_v18 = vsel %vm4013_vm3, %v4364_v13, 0.0  ;;  %v4515_v20 = vmul.f32 %v4364_v13, %v4364_v13  ;;  %v3043_v62 = vadd.f32 %v2945_v26, %v2617_v4  ;;  %v2522_v11 = vpop.f32.mrf.mxu1  ;;  %v4193_v4 = vpop.permute.xlu1 %4192  ;;  %v4106_v13 = vld [vmem:[%s7290_s2 + $0x160] sm:$0xff] }
 0x2f7   : > { %v4426_v35 = vadd.f32 %v4425_v18, %v4424_v63  ;;  %v2618_v63 = vadd.f32 %v2522_v11, %v6232_v9  ;;  %v6970_v18 = vld [vmem:[%s5736_s30 + $0x9c] sm:$0xff] }
 0x2f8   : > { %v4576_v56 = vsel %vm4013_vm3, %v4515_v20, 0.0  ;;  %v3669_v59 = vadd.f32 %v3571_v31, %v3043_v62  ;;  %4317 = vperm.xlu2 %5640, %v4103_v1   ;;  %v2381_v20 = vrot.slane %v6970_v18, 1 }
 0x2f9   : > { %v4577_v14 = vadd.f32 %v4576_v56, %v4575_v55  ;;  %5195 = vmatmul.msk.bf16.gmra.mxu1 %vm590_vm1, %v2380_v12 }
 0x2fa   : > { %v3885_v0 = vpop.f32.mrf.mxu0  ;;  %5321 = vmatmul.msk.bf16.gmra.mxu2 %vm590_vm1, %v5575_v48  ;;  %v3980_v57 = vadd.f32 %v3882_v17, %v3669_v59  ;;  %5443 = vmatmul.msk.bf16.gmra.mxu3 %vm590_vm1, %v3390_v27  ;;  %v3395_v17 = vshll.u32 %v6959_v44, 16  ;;  %v3393_v48 = vor.u32 %v3391_v36, %v3389_v41 }
 0x2fc   : > { %4029 = vst.msk [vmem:[%s6593_s29 + $0x78] sm:$0xff] %vm4013_vm3, %v3980_v57  ;;  %v4365_v15 = vmul.f32 %v4188_v32, %v3980_v57  ;;  %v3744_v32 = vrot.slane %v6959_v44, 1 }
 0x2fd   : > { %5473 = vmatmul.msk.bf16.gmra.mxu0 %vm590_vm1, %v3743_v28  ;;  %v2948_v7 = vpop.f32.mrf.mxu2  ;;  %v3574_v10 = vpop.f32.mrf.mxu3 }
 0x2fe   : > { %v4427_v6 = vsel %vm4013_vm3, %v4365_v15, 0.0  ;;  %v4516_v2 = vmul.f32 %v4365_v15, %v4365_v15  ;;  %v3044_v21 = vadd.f32 %v2948_v7, %v2618_v63  ;;  %v2524_v55 = vpop.f32.mrf.mxu1  ;;  %v4198_v15 = vpop.permute.xlu2 %4197  ;;  %v4109_v7 = vld [vmem:[%s7290_s2 + $0x178] sm:$0xff] }
 0x2ff   : > { %v4428_v52 = vadd.f32 %v4427_v6, %v4426_v35  ;;  %v2619_v62 = vadd.f32 %v2524_v55, %v6242_v45  ;;  %v3397_v35 = vrot.slane %v3395_v17, 1  ;;  %v2382_v45 = vsel %vm982_vm2, %v2379_v39, %v2381_v20 }
 0x300   : > { %v4578_v38 = vsel %vm4013_vm3, %v4516_v2, 0.0  ;;  %v3670_v9 = vadd.f32 %v3574_v10, %v3044_v21  ;;  %4332 = vperm.xlu2 %5640, %v4106_v13   ;;  %v3745_v39 = vsel %vm982_vm2, %v3742_v40, %v3744_v32  ;;  %v7001_v10 = vld [vmem:[%s5736_s30 + $0xb0] sm:$0xff] }
 0x301   : > { %v4579_v16 = vadd.f32 %v4578_v38, %v4577_v14  ;;  %v5576_v14 = vld [vmem:[%s5736_s30 + $0xa0] sm:$0xff]  ;;  %v3398_v28 = vsel %vm387_vm0, %v3393_v48, %v3397_v35 }
 0x302   : > { %v3887_v49 = vpop.f32.mrf.mxu0  ;;  %v3981_v26 = vadd.f32 %v3885_v0, %v3670_v9 }
 0x304   : > { %4030 = vst.msk [vmem:[%s6593_s29 + $0x80] sm:$0xff] %vm4013_vm3, %v3981_v26  ;;  %v4366_v31 = vmul.f32 %v4193_v4, %v3981_v26  ;;  %v3403_v4 = vshll.u32 %v7001_v10, 16 }
 0x305   : > { %v2950_v11 = vpop.f32.mrf.mxu2  ;;  %v3576_v27 = vpop.f32.mrf.mxu3 }
 0x306   : > { %v4429_v12 = vsel %vm4013_vm3, %v4366_v31, 0.0  ;;  %v4517_v56 = vmul.f32 %v4366_v31, %v4366_v31  ;;  %v3045_v59 = vadd.f32 %v2950_v11, %v2619_v62  ;;  %v2527_v0 = vpop.f32.mrf.mxu1  ;;  %v7009_v31 = vld [vmem:[%s5736_s30 + $0xa4] sm:$0xff] }
 0x307   : > { %v4430_v1 = vadd.f32 %v4429_v12, %v4428_v52  ;;  %v2620_v2 = vadd.f32 %v2527_v0, %v6248_v24  ;;  %v2383_v48 = vrot.slane %v7009_v31, 1 }
 0x308   : > { %v4580_v41 = vsel %vm4013_vm3, %v4517_v56, 0.0  ;;  %v3671_v57 = vadd.f32 %v3576_v27, %v3045_v59  ;;  %4347 = vperm.xlu2 %5640, %v4109_v7   ;;  %v3405_v59 = vrot.slane %v3403_v4, 1  ;;  %v4213_v4 = vpop.permute.xlu2 %4212 }
 0x309   : > { %v4581_v63 = vadd.f32 %v4580_v41, %v4579_v16  ;;  %5196 = vmatmul.msk.bf16.gmra.mxu1 %vm590_vm1, %v2382_v45  ;;  %v3399_v16 = vshrl.u32 %v6959_v44, 16  ;;  %v5577_v41 = vld [vmem:[%s5736_s30 + $0xa8] sm:$0xff] }
 0x30a   : > { %v3890_v6 = vpop.f32.mrf.mxu0  ;;  %5322 = vmatmul.msk.bf16.gmra.mxu2 %vm590_vm1, %v5576_v14  ;;  %v3982_v53 = vadd.f32 %v3887_v49, %v3671_v57  ;;  %5444 = vmatmul.msk.bf16.gmra.mxu3 %vm590_vm1, %v3398_v28  ;;  %v4203_v49 = vpop.permute.xlu0 %4202  ;;  %v3746_v57 = vrot.slane %v7001_v10, 1 }
 0x30b   : > { %v3401_v56 = vor.u32 %v3399_v16, %v3397_v35 }
 0x30c   : > { %4031 = vst.msk [vmem:[%s6593_s29 + $0x88] sm:$0xff] %vm4013_vm3, %v3982_v53  ;;  %v4367_v21 = vmul.f32 %v4198_v15, %v3982_v53  ;;  %v4208_v53 = vpop.permute.xlu1 %4207  ;;  %v3747_v18 = vsel %vm982_vm2, %v3744_v32, %v3746_v57 }
 0x30d   : > { %5474 = vmatmul.msk.bf16.gmra.mxu0 %vm590_vm1, %v3745_v39  ;;  %v2953_v52 = vpop.f32.mrf.mxu2  ;;  %v3579_v40 = vpop.f32.mrf.mxu3  ;;  %v3406_v7 = vsel %vm387_vm0, %v3401_v56, %v3405_v59 }
 0x30e   : > { %v4431_v55 = vsel %vm4013_vm3, %v4367_v21, 0.0  ;;  %v4518_v38 = vmul.f32 %v4367_v21, %v4367_v21  ;;  %v3046_v30 = vadd.f32 %v2953_v52, %v2620_v2  ;;  %v2529_v36 = vpop.f32.mrf.mxu1  ;;  %v7035_v52 = vld [vmem:[%s5736_s30 + $0xb8] sm:$0xff] }
 0x30f   : > { %v4432_v9 = vadd.f32 %v4431_v55, %v4430_v1  ;;  %v2621_v11 = vadd.f32 %v2529_v36, %v6257_v23  ;;  %v2384_v23 = vsel %vm982_vm2, %v2381_v20, %v2383_v48 }
 0x310   : > { %v4582_v17 = vsel %vm4013_vm3, %v4518_v38, 0.0  ;;  %v3672_v24 = vadd.f32 %v3579_v40, %v3046_v30 }
 0x311   : > { %v4583_v13 = vadd.f32 %v4582_v17, %v4581_v63  ;;  %v3407_v17 = vshrl.u32 %v7001_v10, 16 }
 0x312   : > { %v3892_v26 = vpop.f32.mrf.mxu0  ;;  %v3983_v62 = vadd.f32 %v3890_v6, %v3672_v24  ;;  %v3411_v24 = vshll.u32 %v7035_v52, 16 }
 0x313   : > { %v3409_v56 = vor.u32 %v3407_v17, %v3405_v59 }
 0x314   : > { %4032 = vst.msk [vmem:[%s6593_s29 + $0x90] sm:$0xff] %vm4013_vm3, %v3983_v62  ;;  %v4368_v12 = vmul.f32 %v4203_v49, %v3983_v62 }
 0x315   : > { %v2955_v27 = vpop.f32.mrf.mxu2  ;;  %v3581_v45 = vpop.f32.mrf.mxu3 }
 0x316   : > { %v4433_v14 = vsel %vm4013_vm3, %v4368_v12, 0.0  ;;  %v4519_v1 = vmul.f32 %v4368_v12, %v4368_v12  ;;  %v3047_v0 = vadd.f32 %v2955_v27, %v2621_v11  ;;  %v2532_v63 = vpop.f32.mrf.mxu1  ;;  %v3413_v27 = vrot.slane %v3411_v24, 1 }
 0x317   : > { %v4434_v28 = vadd.f32 %v4433_v14, %v4432_v9  ;;  %v2622_v20 = vadd.f32 %v2532_v63, %v6263_v29 }
 0x318   : > { %v4584_v35 = vsel %vm4013_vm3, %v4519_v1, 0.0  ;;  %v3673_v15 = vadd.f32 %v3581_v45, %v3047_v0 }
 0x319   : > { %v4585_v6 = vadd.f32 %v4584_v35, %v4583_v13  ;;  %5197 = vmatmul.msk.bf16.gmra.mxu1 %vm590_vm1, %v2384_v23 }
 0x31a   : > { %v3895_v39 = vpop.f32.mrf.mxu0  ;;  %5323 = vmatmul.msk.bf16.gmra.mxu2 %vm590_vm1, %v5577_v41  ;;  %v3984_v2 = vadd.f32 %v3892_v26, %v3673_v15  ;;  %5445 = vmatmul.msk.bf16.gmra.mxu3 %vm590_vm1, %v3406_v7  ;;  %v7043_v26 = vld [vmem:[%s5736_s30 + $0xac] sm:$0xff]  ;;  %v3414_v15 = vsel %vm387_vm0, %v3409_v56, %v3413_v27 }
 0x31b   : > { %v2385_v62 = vrot.slane %v7043_v26, 1  ;;  %v5578_v41 = vld [vmem:[%s5736_s30 + $0xb0] sm:$0xff] }
 0x31c   : > { %4033 = vst.msk [vmem:[%s6593_s29 + $0x98] sm:$0xff] %vm4013_vm3, %v3984_v2  ;;  %v4369_v21 = vmul.f32 %v4208_v53, %v3984_v2 }
 0x31d   : > { %5475 = vmatmul.msk.bf16.gmra.mxu0 %vm590_vm1, %v3747_v18  ;;  %v2958_v55 = vpop.f32.mrf.mxu2  ;;  %v3584_v40 = vpop.f32.mrf.mxu3  ;;  %v7067_v18 = vld [vmem:[%s5736_s30 + $0xc0] sm:$0xff] }
 0x31e   : > { %v4435_v38 = vsel %vm4013_vm3, %v4369_v21, 0.0  ;;  %v4520_v30 = vmul.f32 %v4369_v21, %v4369_v21  ;;  %v3048_v44 = vadd.f32 %v2958_v55, %v2622_v20  ;;  %v2534_v9 = vpop.f32.mrf.mxu1 }
 0x31f   : > { %v4436_v32 = vadd.f32 %v4435_v38, %v4434_v28  ;;  %v2623_v11 = vadd.f32 %v2534_v9, %v6272_v47  ;;  %v3748_v28 = vrot.slane %v7035_v52, 1  ;;  %v2386_v47 = vsel %vm982_vm2, %v2383_v48, %v2385_v62 }
 0x320   : > { %v4586_v36 = vsel %vm4013_vm3, %v4520_v30, 0.0  ;;  %v3674_v29 = vadd.f32 %v3584_v40, %v3048_v44  ;;  %v3419_v9 = vshll.u32 %v7067_v18, 16 }
 0x321   : > { %v4587_v16 = vadd.f32 %v4586_v36, %v4585_v6  ;;  %v4218_v6 = vpop.permute.xlu0 %4217  ;;  %v3749_v2 = vsel %vm982_vm2, %v3746_v57, %v3748_v28 }
 0x322   : > { %v3897_v13 = vpop.f32.mrf.mxu0  ;;  %v3985_v49 = vadd.f32 %v3895_v39, %v3674_v29  ;;  %v4223_v29 = vpop.permute.xlu1 %4222 }
 0x324   : > { %4034 = vst.msk [vmem:[%s6593_s29 + $0xa0] sm:$0xff] %vm4013_vm3, %v3985_v49  ;;  %v4370_v12 = vmul.f32 %v4213_v4, %v3985_v49 }
 0x325   : > { %v2960_v14 = vpop.f32.mrf.mxu2  ;;  %v3586_v45 = vpop.f32.mrf.mxu3 }
 0x326   : > { %v4437_v10 = vsel %vm4013_vm3, %v4370_v12, 0.0  ;;  %v4521_v1 = vmul.f32 %v4370_v12, %v4370_v12  ;;  %v3049_v0 = vadd.f32 %v2960_v14, %v2623_v11  ;;  %v2537_v23 = vpop.f32.mrf.mxu1  ;;  %v3421_v12 = vrot.slane %v3419_v9, 1 }
 0x327   : > { %v4438_v63 = vadd.f32 %v4437_v10, %v4436_v32  ;;  %v2624_v31 = vadd.f32 %v2537_v23, %v6278_v46  ;;  %v3415_v32 = vshrl.u32 %v7035_v52, 16 }
 0x328   : > { %v4588_v59 = vsel %vm4013_vm3, %v4521_v1, 0.0  ;;  %v3675_v35 = vadd.f32 %v3586_v45, %v3049_v0  ;;  %v5579_v0 = vld [vmem:[%s5736_s30 + $0xb8] sm:$0xff]  ;;  %v3750_v45 = vrot.slane %v7067_v18, 1 }
 0x329   : > { %v4589_v7 = vadd.f32 %v4588_v59, %v4587_v16  ;;  %5198 = vmatmul.msk.bf16.gmra.mxu1 %vm590_vm1, %v2386_v47  ;;  %v7075_v16 = vld [vmem:[%s5736_s30 + $0xb4] sm:$0xff]  ;;  %v3417_v11 = vor.u32 %v3415_v32, %v3413_v27  ;;  %v7107_v32 = vld [vmem:[%s5736_s30 + $0xbc] sm:$0xff] }
 0x32a   : > { %v3900_v53 = vpop.f32.mrf.mxu0  ;;  %5324 = vmatmul.msk.bf16.gmra.mxu2 %vm590_vm1, %v5578_v41  ;;  %v3986_v39 = vadd.f32 %v3897_v13, %v3675_v35  ;;  %5446 = vmatmul.msk.bf16.gmra.mxu3 %vm590_vm1, %v3414_v15  ;;  %v2387_v4 = vrot.slane %v7075_v16, 1  ;;  %v4228_v35 = vpop.permute.xlu2 %4227  ;;  %v2389_v9 = vrot.slane %v7107_v32, 1 }
 0x32b   : > { %v3422_v47 = vsel %vm387_vm0, %v3417_v11, %v3421_v12  ;;  %v4238_v16 = vpop.permute.xlu1 %4237 }
 0x32c   : > { %4035 = vst.msk [vmem:[%s6593_s29 + $0xa8] sm:$0xff] %vm4013_vm3, %v3986_v39  ;;  %v4371_v48 = vmul.f32 %v4218_v6, %v3986_v39  ;;  %v3751_v6 = vsel %vm982_vm2, %v3748_v28, %v3750_v45 }
 0x32d   : > { %5476 = vmatmul.msk.bf16.gmra.mxu0 %vm590_vm1, %v3749_v2  ;;  %v2963_v20 = vpop.f32.mrf.mxu2  ;;  %v3589_v30 = vpop.f32.mrf.mxu3 }
 0x32e   : > { %v4439_v21 = vsel %vm4013_vm3, %v4371_v48, 0.0  ;;  %v4522_v55 = vmul.f32 %v4371_v48, %v4371_v48  ;;  %v3050_v38 = vadd.f32 %v2963_v20, %v2624_v31  ;;  %v2539_v44 = vpop.f32.mrf.mxu1 }
 0x32f   : > { %v4440_v57 = vadd.f32 %v4439_v21, %v4438_v63  ;;  %v2625_v13 = vadd.f32 %v2539_v44, %v6287_v5  ;;  %v2388_v5 = vsel %vm982_vm2, %v2385_v62, %v2387_v4  ;;  %v4233_v44 = vpop.permute.xlu0 %4232 }
 0x330   : > { %v4590_v40 = vsel %vm4013_vm3, %v4522_v55, 0.0  ;;  %v3676_v46 = vadd.f32 %v3589_v30, %v3050_v38  ;;  %v3423_v38 = vshrl.u32 %v7067_v18, 16 }
 0x331   : > { %v4591_v36 = vadd.f32 %v4590_v40, %v4589_v7 }
 0x332   : > { %v3902_v17 = vpop.f32.mrf.mxu0  ;;  %v3987_v24 = vadd.f32 %v3900_v53, %v3676_v46  ;;  %v7099_v53 = vld [vmem:[%s5736_s30 + $0xc8] sm:$0xff] }
 0x333   : > { %v3427_v30 = vshll.u32 %v7099_v53, 16 }
 0x334   : > { %4036 = vst.msk [vmem:[%s6593_s29 + $0xb0] sm:$0xff] %vm4013_vm3, %v3987_v24  ;;  %v4372_v49 = vmul.f32 %v4223_v29, %v3987_v24 }
 0x335   : > { %v2965_v56 = vpop.f32.mrf.mxu2  ;;  %v3591_v1 = vpop.f32.mrf.mxu3  ;;  %v3429_v24 = vrot.slane %v3427_v30, 1 }
 0x336   : > { %v4441_v52 = vsel %vm4013_vm3, %v4372_v49, 0.0  ;;  %v4523_v14 = vmul.f32 %v4372_v49, %v4372_v49  ;;  %v3051_v10 = vadd.f32 %v2965_v56, %v2625_v13  ;;  %v2542_v63 = vpop.f32.mrf.mxu1 }
 0x337   : > { %v4442_v41 = vadd.f32 %v4441_v52, %v4440_v57  ;;  %v2626_v26 = vadd.f32 %v2542_v63, %v6293_v3  ;;  %v5580_v52 = vld [vmem:[%s5736_s30 + $0xc0] sm:$0xff]  ;;  %v4248_v32 = vpop.permute.xlu0 %4247 }
 0x338   : > { %v4592_v27 = vsel %vm4013_vm3, %v4523_v14, 0.0  ;;  %v3677_v23 = vadd.f32 %v3591_v1, %v3051_v10  ;;  %v3752_v14 = vrot.slane %v7099_v53, 1 }
 0x339   : > { %v4593_v59 = vadd.f32 %v4592_v27, %v4591_v36  ;;  %5199 = vmatmul.msk.bf16.gmra.mxu1 %vm590_vm1, %v2388_v5 }
 0x33a   : > { %v3905_v15 = vpop.f32.mrf.mxu0  ;;  %5325 = vmatmul.msk.bf16.gmra.mxu2 %vm590_vm1, %v5579_v0  ;;  %v3988_v7 = vadd.f32 %v3902_v17, %v3677_v23  ;;  %5447 = vmatmul.msk.bf16.gmra.mxu3 %vm590_vm1, %v3422_v47  ;;  %v3425_v17 = vor.u32 %v3423_v38, %v3421_v12  ;;  %v3753_v23 = vsel %vm982_vm2, %v3750_v45, %v3752_v14 }
 0x33c   : > { %4037 = vst.msk [vmem:[%s6593_s29 + $0xb8] sm:$0xff] %vm4013_vm3, %v3988_v7  ;;  %v4373_v62 = vmul.f32 %v4228_v35, %v3988_v7 }
 0x33d   : > { %5477 = vmatmul.msk.bf16.gmra.mxu0 %vm590_vm1, %v3751_v6  ;;  %v2968_v39 = vpop.f32.mrf.mxu2  ;;  %v3594_v20 = vpop.f32.mrf.mxu3 }
 0x33e   : > { %v4443_v2 = vsel %vm4013_vm3, %v4373_v62, 0.0  ;;  %v4524_v31 = vmul.f32 %v4373_v62, %v4373_v62  ;;  %v3052_v48 = vadd.f32 %v2968_v39, %v2626_v26  ;;  %v2544_v21 = vpop.f32.mrf.mxu1 }
 0x33f   : > { %v4444_v28 = vadd.f32 %v4443_v2, %v4442_v41  ;;  %v2627_v36 = vadd.f32 %v2544_v21, %v6302_v58  ;;  %v2390_v58 = vsel %vm982_vm2, %v2387_v4, %v2389_v9  ;;  %v3430_v41 = vsel %vm387_vm0, %v3425_v17, %v3429_v24  ;;  %v4243_v21 = vpop.permute.xlu2 %4242 }
 0x340   : > { %v4594_v55 = vsel %vm4013_vm3, %v4524_v31, 0.0  ;;  %v3678_v3 = vadd.f32 %v3594_v20, %v3052_v48  ;;  %v3431_v2 = vshrl.u32 %v7099_v53, 16 }
 0x341   : > { %v4595_v57 = vadd.f32 %v4594_v55, %v4593_v59  ;;  %v7133_v59 = vld [vmem:[%s5736_s30 + $0xd0] sm:$0xff]  ;;  %v7141_v55 = vld [vmem:[%s5736_s30 + $0xc4] sm:$0xff] }
 0x342   : > { %v3907_v40 = vpop.f32.mrf.mxu0  ;;  %v3989_v46 = vadd.f32 %v3905_v15, %v3678_v3  ;;  %v3435_v31 = vshll.u32 %v7133_v59, 16  ;;  %v2391_v3 = vrot.slane %v7141_v55, 1 }
 0x344   : > { %4038 = vst.msk [vmem:[%s6593_s29 + $0xc0] sm:$0xff] %vm4013_vm3, %v3989_v46  ;;  %v4374_v29 = vmul.f32 %v4233_v44, %v3989_v46  ;;  %v3437_v44 = vrot.slane %v3435_v31, 1  ;;  %v3124_v46 = vld [vmem:[%s5736_s30 + $0xd8] sm:$0x1] }
 0x345   : > { %v2970_v13 = vpop.f32.mrf.mxu2  ;;  %v3596_v56 = vpop.f32.mrf.mxu3 }
 0x346   : > { %v4445_v18 = vsel %vm4013_vm3, %v4374_v29, 0.0  ;;  %v4525_v49 = vmul.f32 %v4374_v29, %v4374_v29  ;;  %v3053_v11 = vadd.f32 %v2970_v13, %v2627_v36  ;;  %v2547_v1 = vpop.f32.mrf.mxu1 }
 0x347   : > { %v4446_v10 = vadd.f32 %v4445_v18, %v4444_v28  ;;  %v2628_v4 = vadd.f32 %v2547_v1, %v6308_v25  ;;  %v5581_v18 = vld [vmem:[%s5736_s30 + $0xc8] sm:$0xff]  ;;  %v3225_v1 = vunpack.c.l.b16 %v3124_v46 }
 0x348   : > { %v4596_v12 = vsel %vm4013_vm3, %v4525_v49, 0.0  ;;  %v3679_v0 = vadd.f32 %v3596_v56, %v3053_v11  ;;  %v3754_v49 = vrot.slane %v7133_v59, 1 }
 0x349   : > { %v4597_v63 = vadd.f32 %v4596_v12, %v4595_v57  ;;  %5200 = vmatmul.msk.bf16.gmra.mxu1 %vm590_vm1, %v2390_v58  ;;  %v3433_v57 = vor.u32 %v3431_v2, %v3429_v24 }
 0x34a   : > { %v3990_v5 = vadd.f32 %v3907_v40, %v3679_v0  ;;  %v3910_v27 = vpop.f32.mrf.mxu0  ;;  %5326 = vmatmul.msk.bf16.gmra.mxu2 %vm590_vm1, %v5580_v52  ;;  %5448 = vmatmul.msk.bf16.gmra.mxu3 %vm590_vm1, %v3430_v41  ;;  %v3755_v41 = vsel %vm982_vm2, %v3752_v14, %v3754_v49 }
 0x34c   : > { %4039 = vst.msk [vmem:[%s6593_s29 + $0xc8] sm:$0xff] %vm4013_vm3, %v3990_v5  ;;  %v4375_v47 = vmul.f32 %v4238_v16, %v3990_v5  ;;  %v3250_v5 = vpack.c.b16 %v3225_v1, %v3225_v1 }
 0x34d   : > { %5478 = vmatmul.msk.bf16.gmra.mxu0 %vm590_vm1, %v3753_v23  ;;  %v2973_v35 = vpop.f32.mrf.mxu2  ;;  %v3599_v45 = vpop.f32.mrf.mxu3 }
 0x34e   : > { %v4447_v15 = vsel %vm4013_vm3, %v4375_v47, 0.0  ;;  %v4526_v7 = vmul.f32 %v4375_v47, %v4375_v47  ;;  %v3054_v6 = vadd.f32 %v2973_v35, %v2628_v4  ;;  %v2549_v62 = vpop.f32.mrf.mxu1 }
 0x34f   : > { %v4448_v26 = vadd.f32 %v4447_v15, %v4446_v10  ;;  %v2629_v30 = vadd.f32 %v2549_v62, %v6318_v19  ;;  %v2392_v19 = vsel %vm982_vm2, %v2389_v9, %v2391_v3  ;;  %v3438_v10 = vsel %vm387_vm0, %v3433_v57, %v3437_v44  ;;  %v4253_v62 = vpop.permute.xlu1 %4252 }
 0x350   : > { %v4598_v39 = vsel %vm4013_vm3, %v4526_v7, 0.0  ;;  %v3680_v25 = vadd.f32 %v3599_v45, %v3054_v6  ;;  %v3439_v7 = vshrl.u32 %v7133_v59, 16  ;;  %v3443_v6 = vshll.u32 %v3250_v5, 16 }
 0x351   : > { %v4599_v48 = vadd.f32 %v4598_v39, %v4597_v63  ;;  %v2393_v39 = vrot.slane %v6323_v8, 1  ;;  %v3756_v57 = vrot.slane %v3250_v5, 1 }
 0x352   : > { %v3991_v20 = vadd.f32 %v3910_v27, %v3680_v25  ;;  %v3912_v28 = vpop.f32.mrf.mxu0  ;;  %v3441_v31 = vor.u32 %v3439_v7, %v3437_v44 }
 0x353   : > { %v2394_v8 = vsel %vm982_vm2, %v2391_v3, %v2393_v39 }
 0x354   : > { %4040 = vst.msk [vmem:[%s6593_s29 + $0xd0] sm:$0xff] %vm4013_vm3, %v3991_v20  ;;  %v4376_v38 = vmul.f32 %v4243_v21, %v3991_v20 }
 0x355   : > { %v2975_v40 = vpop.f32.mrf.mxu2  ;;  %v3601_v13 = vpop.f32.mrf.mxu3 }
 0x356   : > { %v4449_v36 = vsel %vm4013_vm3, %v4376_v38, 0.0  ;;  %v4527_v29 = vmul.f32 %v4376_v38, %v4376_v38  ;;  %v3055_v17 = vadd.f32 %v2975_v40, %v2629_v30  ;;  %v2552_v56 = vpop.f32.mrf.mxu1  ;;  %v5582_v30 = vld [vmem:[%s5736_s30 + $0xd0] sm:$0xff]  ;;  %s4744_s30 = sshll.u32 %s7350_s16, 1 }
 0x357   : > { %v4450_v11 = vadd.f32 %v4449_v36, %v4448_v26  ;;  %v2630_v63 = vadd.f32 %v2552_v56, %v6326_v33  ;;  %s208_s26 = scalar_lea.vmem %s7292_s4, %s4744_s30 }
 0x358   : > { %v4600_v24 = vsel %vm4013_vm3, %v4527_v29, 0.0  ;;  %v3681_v52 = vadd.f32 %v3601_v13, %v3055_v17 }
 0x359   : > { %v4601_v58 = vadd.f32 %v4600_v24, %v4599_v48  ;;  %5201 = vmatmul.msk.bf16.gmra.mxu1 %vm590_vm1, %v2392_v19  ;;  %v3445_v48 = vrot.slane %v3443_v6, 1 }
 0x35a   : > { %v3992_v12 = vadd.f32 %v3912_v28, %v3681_v52  ;;  %v3915_v0 = vpop.f32.mrf.mxu0  ;;  %5327 = vmatmul.msk.bf16.gmra.mxu2 %vm590_vm1, %v5581_v18  ;;  %5449 = vmatmul.msk.bf16.gmra.mxu3 %vm590_vm1, %v3438_v10  ;;  %v3757_v18 = vsel %vm982_vm2, %v3754_v49, %v3756_v57 }
 0x35b   : > { %v3446_v44 = vsel %vm387_vm0, %v3441_v31, %v3445_v48 }
 0x35c   : > { %4041 = vst.msk [vmem:[%s6593_s29 + $0xd8] sm:$0xff] %vm4013_vm3, %v3992_v12  ;;  %v4377_v9 = vmul.f32 %v4248_v32, %v3992_v12 }
 0x35d   : > { %5479 = vmatmul.msk.bf16.gmra.mxu0 %vm590_vm1, %v3755_v41  ;;  %v2978_v27 = vpop.f32.mrf.mxu2  ;;  %v3604_v53 = vpop.f32.mrf.mxu3 }
 0x35e   : > { %v4451_v23 = vsel %vm4013_vm3, %v4377_v9, 0.0  ;;  %v4528_v16 = vmul.f32 %v4377_v9, %v4377_v9  ;;  %v3056_v4 = vadd.f32 %v2978_v27, %v2630_v63  ;;  %v2554_v14 = vpop.f32.mrf.mxu1  ;;  %v4263_v9 = vpop.permute.xlu0 %4262 }
 0x35f   : > { %v4452_v47 = vadd.f32 %v4451_v23, %v4450_v11  ;;  %v2631_v2 = vadd.f32 %v2554_v14, %v6337_v43  ;;  %v4258_v11 = vpop.permute.xlu2 %4257 }
 0x360   : > { %v4602_v35 = vsel %vm4013_vm3, %v4528_v16, 0.0  ;;  %v3682_v15 = vadd.f32 %v3604_v53, %v3056_v4 }
 0x361   : > { %v4603_v33 = vadd.f32 %v4602_v35, %v4601_v58 }
 0x362   : > { %v3993_v45 = vadd.f32 %v3915_v0, %v3682_v15  ;;  %v3917_v26 = vpop.f32.mrf.mxu0 }
 0x364   : > { %4042 = vst.msk [vmem:[%s6593_s29 + $0xe0] sm:$0xff] %vm4013_vm3, %v3993_v45  ;;  %v4378_v25 = vmul.f32 %v4253_v62, %v3993_v45 }
 0x365   : > { %v2980_v20 = vpop.f32.mrf.mxu2  ;;  %v3606_v38 = vpop.f32.mrf.mxu3 }
 0x366   : > { %v4453_v28 = vsel %vm4013_vm3, %v4378_v25, 0.0  ;;  %v4529_v21 = vmul.f32 %v4378_v25, %v4378_v25  ;;  %v3057_v59 = vadd.f32 %v2980_v20, %v2631_v2  ;;  %v2557_v46 = vpop.f32.mrf.mxu1 }
 0x367   : > { %v4454_v40 = vadd.f32 %v4453_v28, %v4452_v47  ;;  %v2632_v3 = vadd.f32 %v2557_v46, %v6352_v54 }
 0x368   : > { %v4604_v36 = vsel %vm4013_vm3, %v4529_v21, 0.0  ;;  %v3683_v43 = vadd.f32 %v3606_v38, %v3057_v59 }
 0x369   : > { %v4605_v29 = vadd.f32 %v4604_v36, %v4603_v33  ;;  %5202 = vmatmul.msk.bf16.gmra.mxu1 %vm590_vm1, %v2394_v8  ;;  %v4268_v33 = vpop.permute.xlu1 %4267 }
 0x36a   : > { %v3994_v17 = vadd.f32 %v3917_v26, %v3683_v43  ;;  %v3920_v13 = vpop.f32.mrf.mxu0  ;;  %5328 = vmatmul.msk.bf16.gmra.mxu2 %vm590_vm1, %v5582_v30  ;;  %5450 = vmatmul.msk.bf16.gmra.mxu3 %vm590_vm1, %v3446_v44  ;;  %v4273_v30 = vpop.permute.xlu2 %4272 }
 0x36c   : > { %4043 = vst.msk [vmem:[%s6593_s29 + $0xe8] sm:$0xff] %vm4013_vm3, %v3994_v17  ;;  %v4379_v55 = vmul.f32 %v4258_v11, %v3994_v17 }
 0x36d   : > { %5480 = vmatmul.msk.bf16.gmra.mxu0 %vm590_vm1, %v3757_v18  ;;  %v2983_v56 = vpop.f32.mrf.mxu2  ;;  %v3609_v10 = vpop.f32.mrf.mxu3 }
 0x36e   : > { %v4455_v19 = vsel %vm4013_vm3, %v4379_v55, 0.0  ;;  %v4530_v24 = vmul.f32 %v4379_v55, %v4379_v55  ;;  %v3058_v52 = vadd.f32 %v2983_v56, %v2632_v3  ;;  %v2559_v58 = vpop.f32.mrf.mxu1  ;;  %v4278_v3 = vpop.permute.xlu0 %4277 }
 0x36f   : > { %v4456_v1 = vadd.f32 %v4455_v19, %v4454_v40  ;;  %v2633_v63 = vadd.f32 %v2559_v58, %v6366_v34 }
 0x370   : > { %v4606_v49 = vsel %vm4013_vm3, %v4530_v24, 0.0  ;;  %v3684_v12 = vadd.f32 %v3609_v10, %v3058_v52 }
 0x371   : > { %v4607_v0 = vadd.f32 %v4606_v49, %v4605_v29 }
 0x372   : > { %v3995_v41 = vadd.f32 %v3920_v13, %v3684_v12  ;;  %v3922_v32 = vpop.f32.mrf.mxu0 }
 0x374   : > { %4044 = vst.msk [vmem:[%s6593_s29 + $0xf0] sm:$0xff] %vm4013_vm3, %v3995_v41  ;;  %v4380_v54 = vmul.f32 %v4263_v9, %v3995_v41 }
 0x375   : > { %v2985_v5 = vpop.f32.mrf.mxu2  ;;  %v3611_v4 = vpop.f32.mrf.mxu3 }
 0x376   : > { %v4457_v27 = vsel %vm4013_vm3, %v4380_v54, 0.0  ;;  %v4531_v23 = vmul.f32 %v4380_v54, %v4380_v54  ;;  %v3059_v16 = vadd.f32 %v2985_v5, %v2633_v63  ;;  %v2562_v47 = vpop.f32.mrf.mxu1  ;;  %v4283_v54 = vpop.permute.xlu1 %4282 }
 0x377   : > { %v4458_v53 = vadd.f32 %v4457_v27, %v4456_v1  ;;  %v2634_v34 = vadd.f32 %v2562_v47, %v6379_v61 }
 0x378   : > { %v4608_v14 = vsel %vm4013_vm3, %v4531_v23, 0.0  ;;  %v3685_v35 = vadd.f32 %v3611_v4, %v3059_v16 }
 0x379   : > { %v4609_v15 = vadd.f32 %v4608_v14, %v4607_v0 }
 0x37a   : > { %v3996_v7 = vadd.f32 %v3922_v32, %v3685_v35  ;;  %v3925_v6 = vpop.f32.mrf.mxu0 }
 0x37c   : > { %4045 = vst.msk [vmem:[%s6593_s29 + $0xf8] sm:$0xff] %vm4013_vm3, %v3996_v7  ;;  %v4381_v45 = vmul.f32 %v4268_v33, %v3996_v7  ;;  %v4288_v33 = vpop.permute.xlu2 %4287 }
 0x37d   : > { %v2988_v26 = vpop.f32.mrf.mxu2  ;;  %v3614_v2 = vpop.f32.mrf.mxu3 }
 0x37e   : > { %v4459_v62 = vsel %vm4013_vm3, %v4381_v45, 0.0  ;;  %v4532_v39 = vmul.f32 %v4381_v45, %v4381_v45  ;;  %v3060_v25 = vadd.f32 %v2988_v26, %v2634_v34  ;;  %v2564_v48 = vpop.f32.mrf.mxu1 }
 0x37f   : > { %v4460_v31 = vadd.f32 %v4459_v62, %v4458_v53  ;;  %v2635_v61 = vadd.f32 %v2564_v48, %v6393_v22 }
 0x380   : > { %v4610_v20 = vsel %vm4013_vm3, %v4532_v39, 0.0  ;;  %v3686_v28 = vadd.f32 %v3614_v2, %v3060_v25 }
 0x381   : > { %v4611_v21 = vadd.f32 %v4610_v20, %v4609_v15 }
 0x382   : > { %v3997_v59 = vadd.f32 %v3925_v6, %v3686_v28  ;;  %v3927_v38 = vpop.f32.mrf.mxu0 }
 0x384   : > { %4046 = vst.msk [vmem:[%s6593_s29 + $0x100] sm:$0xff] %vm4013_vm3, %v3997_v59  ;;  %v4382_v57 = vmul.f32 %v4273_v30, %v3997_v59 }
 0x385   : > { %v2990_v40 = vpop.f32.mrf.mxu2  ;;  %v3616_v43 = vpop.f32.mrf.mxu3 }
 0x386   : > { %v4461_v46 = vsel %vm4013_vm3, %v4382_v57, 0.0  ;;  %v4533_v8 = vmul.f32 %v4382_v57, %v4382_v57  ;;  %v3061_v36 = vadd.f32 %v2990_v40, %v2635_v61  ;;  %v2567_v29 = vpop.f32.mrf.mxu1 }
 0x387   : > { %v4462_v44 = vadd.f32 %v4461_v46, %v4460_v31  ;;  %v2636_v22 = vadd.f32 %v2567_v29, %v6403_v51 }
 0x388   : > { %v4612_v17 = vsel %vm4013_vm3, %v4533_v8, 0.0  ;;  %v3687_v13 = vadd.f32 %v3616_v43, %v3061_v36 }
 0x389   : > { %v4613_v18 = vadd.f32 %v4612_v17, %v4611_v21 }
 0x38a   : > { %v3998_v11 = vadd.f32 %v3927_v38, %v3687_v13  ;;  %v3930_v55 = vpop.f32.mrf.mxu0  ;;  %v4293_v38 = vpop.permute.xlu0 %4292 }
 0x38c   : > { %4047 = vst.msk [vmem:[%s6593_s29 + $0x108] sm:$0xff] %vm4013_vm3, %v3998_v11  ;;  %v4383_v56 = vmul.f32 %v4278_v3, %v3998_v11  ;;  %v4298_v11 = vpop.permute.xlu1 %4297 }
 0x38d   : > { %v2993_v19 = vpop.f32.mrf.mxu2  ;;  %v3619_v1 = vpop.f32.mrf.mxu3 }
 0x38e   : > { %v4463_v24 = vsel %vm4013_vm3, %v4383_v56, 0.0  ;;  %v4534_v52 = vmul.f32 %v4383_v56, %v4383_v56  ;;  %v3062_v10 = vadd.f32 %v2993_v19, %v2636_v22  ;;  %v2569_v49 = vpop.f32.mrf.mxu1 }
 0x38f   : > { %v4464_v58 = vadd.f32 %v4463_v24, %v4462_v44  ;;  %v2637_v51 = vadd.f32 %v2569_v49, %v6414_v60 }
 0x390   : > { %v4614_v12 = vsel %vm4013_vm3, %v4534_v52, 0.0  ;;  %v3688_v0 = vadd.f32 %v3619_v1, %v3062_v10 }
 0x391   : > { %v4615_v41 = vadd.f32 %v4614_v12, %v4613_v18 }
 0x392   : > { %v3999_v32 = vadd.f32 %v3930_v55, %v3688_v0  ;;  %v3932_v9 = vpop.f32.mrf.mxu0 }
 0x394   : > { %4048 = vst.msk [vmem:[%s6593_s29 + $0x110] sm:$0xff] %vm4013_vm3, %v3999_v32  ;;  %v4384_v63 = vmul.f32 %v4283_v54, %v3999_v32  ;;  %v4303_v32 = vpop.permute.xlu2 %4302  ;;  %v7341_v54 = vld [vmem:[#allocation11_spill] sm:$0xff] }
 0x395   : > { %v2995_v5 = vpop.f32.mrf.mxu2  ;;  %v3621_v4 = vpop.f32.mrf.mxu3 }
 0x396   : > { %v4465_v27 = vsel %vm4013_vm3, %v4384_v63, 0.0  ;;  %v4535_v23 = vmul.f32 %v4384_v63, %v4384_v63  ;;  %v3063_v16 = vadd.f32 %v2995_v5, %v2637_v51  ;;  %v2572_v47 = vpop.f32.mrf.mxu1 }
 0x397   : > { %v4466_v53 = vadd.f32 %v4465_v27, %v4464_v58  ;;  %v2638_v60 = vadd.f32 %v2572_v47, %v6427_v42 }
 0x398   : > { %v4616_v14 = vsel %vm4013_vm3, %v4535_v23, 0.0  ;;  %v3689_v35 = vadd.f32 %v3621_v4, %v3063_v16 }
 0x399   : > { %v4617_v15 = vadd.f32 %v4616_v14, %v4615_v41 }
 0x39a   : > { %v4000_v7 = vadd.f32 %v3932_v9, %v3689_v35  ;;  %v3935_v6 = vpop.f32.mrf.mxu0 }
 0x39c   : > { %4049 = vst.msk [vmem:[%s6593_s29 + $0x118] sm:$0xff] %vm4013_vm3, %v4000_v7  ;;  %v4385_v45 = vmul.f32 %v4288_v33, %v4000_v7 }
 0x39d   : > { %v2998_v34 = vpop.f32.mrf.mxu2  ;;  %v3624_v25 = vpop.f32.mrf.mxu3 }
 0x39e   : > { %v4467_v26 = vsel %vm4013_vm3, %v4385_v45, 0.0  ;;  %v4536_v62 = vmul.f32 %v4385_v45, %v4385_v45  ;;  %v3064_v39 = vadd.f32 %v2998_v34, %v2638_v60  ;;  %v2574_v31 = vpop.f32.mrf.mxu1  ;;  %v7342_v45 = vld [vmem:[#allocation13_spill] sm:$0xff] }
 0x39f   : > { %v4468_v2 = vadd.f32 %v4467_v26, %v4466_v53  ;;  %v2639_v42 = vadd.f32 %v2574_v31, %v6444_v50  ;;  %v7340_v50 = vld [vmem:[#allocation9_spill] sm:$0xff] }
 0x3a0   : > { %v4618_v48 = vsel %vm4013_vm3, %v4536_v62, 0.0  ;;  %v3690_v20 = vadd.f32 %v3624_v25, %v3064_v39 }
 0x3a1   : > { %v4619_v28 = vadd.f32 %v4618_v48, %v4617_v15 }
 0x3a2   : > { %v4001_v21 = vadd.f32 %v3935_v6, %v3690_v20  ;;  %v3937_v59 = vpop.f32.mrf.mxu0  ;;  %v4308_v6 = vpop.permute.xlu0 %4307 }
 0x3a4   : > { %4050 = vst.msk [vmem:[%s6593_s29 + $0x120] sm:$0xff] %vm4013_vm3, %v4001_v21  ;;  %v4386_v30 = vmul.f32 %v4293_v38, %v4001_v21  ;;  %v4313_v38 = vpop.permute.xlu1 %4312 }
 0x3a5   : > { %v3000_v57 = vpop.f32.mrf.mxu2  ;;  %v3626_v8 = vpop.f32.mrf.mxu3 }
 0x3a6   : > { %v4469_v61 = vsel %vm4013_vm3, %v4386_v30, 0.0  ;;  %v4537_v40 = vmul.f32 %v4386_v30, %v4386_v30  ;;  %v3065_v46 = vadd.f32 %v3000_v57, %v2639_v42  ;;  %v2577_v43 = vpop.f32.mrf.mxu1  ;;  %v7343_v42 = vld [vmem:[#allocation15_spill] sm:$0xff] }
 0x3a7   : > { %v4470_v36 = vadd.f32 %v4469_v61, %v4468_v2  ;;  %v2640_v3 = vadd.f32 %v2577_v43, %v7340_v50 }
 0x3a8   : > { %v4620_v44 = vsel %vm4013_vm3, %v4537_v40, 0.0  ;;  %v3691_v29 = vadd.f32 %v3626_v8, %v3065_v46 }
 0x3a9   : > { %v4621_v17 = vadd.f32 %v4620_v44, %v4619_v28 }
 0x3aa   : > { %v4002_v13 = vadd.f32 %v3937_v59, %v3691_v29  ;;  %v3940_v18 = vpop.f32.mrf.mxu0 }
 0x3ac   : > { %4051 = vst.msk [vmem:[%s6593_s29 + $0x128] sm:$0xff] %vm4013_vm3, %v4002_v13  ;;  %v4387_v55 = vmul.f32 %v4298_v11, %v4002_v13 }
 0x3ad   : > { %v3003_v56 = vpop.f32.mrf.mxu2  ;;  %v3629_v52 = vpop.f32.mrf.mxu3 }
 0x3ae   : > { %v4471_v22 = vsel %vm4013_vm3, %v4387_v55, 0.0  ;;  %v4538_v19 = vmul.f32 %v4387_v55, %v4387_v55  ;;  %v3066_v24 = vadd.f32 %v3003_v56, %v2640_v3  ;;  %v2579_v1 = vpop.f32.mrf.mxu1  ;;  %v4318_v55 = vpop.permute.xlu2 %4317  ;;  %v7344_v3 = vld [vmem:[#allocation17_spill] sm:$0xff] }
 0x3af   : > { %v4472_v10 = vadd.f32 %v4471_v22, %v4470_v36  ;;  %v2641_v63 = vadd.f32 %v2579_v1, %v7341_v54 }
 0x3b0   : > { %v4622_v58 = vsel %vm4013_vm3, %v4538_v19, 0.0  ;;  %v3692_v49 = vadd.f32 %v3629_v52, %v3066_v24 }
 0x3b1   : > { %v4623_v12 = vadd.f32 %v4622_v58, %v4621_v17 }
 0x3b2   : > { %v4003_v0 = vadd.f32 %v3940_v18, %v3692_v49  ;;  %v3942_v41 = vpop.f32.mrf.mxu0 }
 0x3b4   : > { %4052 = vst.msk [vmem:[%s6593_s29 + $0x130] sm:$0xff] %vm4013_vm3, %v4003_v0  ;;  %v4388_v9 = vmul.f32 %v4303_v32, %v4003_v0 }
 0x3b5   : > { %v3005_v51 = vpop.f32.mrf.mxu2  ;;  %v3631_v16 = vpop.f32.mrf.mxu3 }
 0x3b6   : > { %v4473_v5 = vsel %vm4013_vm3, %v4388_v9, 0.0  ;;  %v4539_v27 = vmul.f32 %v4388_v9, %v4388_v9  ;;  %v3067_v23 = vadd.f32 %v3005_v51, %v2641_v63  ;;  %v2582_v53 = vpop.f32.mrf.mxu1  ;;  %v4323_v9 = vpop.permute.xlu0 %4322  ;;  %v7345_v63 = vld [vmem:[#allocation2_spill] sm:$0xff] }
 0x3b7   : > { %v4474_v4 = vadd.f32 %v4473_v5, %v4472_v10  ;;  %v2642_v60 = vadd.f32 %v2582_v53, %v7342_v45 }
 0x3b8   : > { %v4624_v47 = vsel %vm4013_vm3, %v4539_v27, 0.0  ;;  %v3693_v14 = vadd.f32 %v3631_v16, %v3067_v23 }
 0x3b9   : > { %v4625_v35 = vadd.f32 %v4624_v47, %v4623_v12 }
 0x3ba   : > { %v4004_v15 = vadd.f32 %v3942_v41, %v3693_v14  ;;  %v3945_v7 = vpop.f32.mrf.mxu0 }
 0x3bc   : > { %4053 = vst.msk [vmem:[%s6593_s29 + $0x138] sm:$0xff] %vm4013_vm3, %v4004_v15  ;;  %v4389_v33 = vmul.f32 %v4308_v6, %v4004_v15  ;;  %v4328_v6 = vpop.permute.xlu1 %4327 }
 0x3bd   : > { %v3008_v34 = vpop.f32.mrf.mxu2  ;;  %v3634_v25 = vpop.f32.mrf.mxu3 }
 0x3be   : > { %v4475_v26 = vsel %vm4013_vm3, %v4389_v33, 0.0  ;;  %v4540_v62 = vmul.f32 %v4389_v33, %v4389_v33  ;;  %v3068_v39 = vadd.f32 %v3008_v34, %v2642_v60  ;;  %v2584_v31 = vpop.f32.mrf.mxu1  ;;  %v7346_v60 = vld [vmem:[#allocation3_spill] sm:$0xff] }
 0x3bf   : > { %v4476_v2 = vadd.f32 %v4475_v26, %v4474_v4  ;;  %v2643_v57 = vadd.f32 %v2584_v31, %v7343_v42  ;;  %v7347_v42 = vld [vmem:[#allocation4_spill] sm:$0xff] }
 0x3c0   : > { %v4626_v48 = vsel %vm4013_vm3, %v4540_v62, 0.0  ;;  %v3694_v20 = vadd.f32 %v3634_v25, %v3068_v39 }
 0x3c1   : > { %v4627_v28 = vadd.f32 %v4626_v48, %v4625_v35 }
 0x3c2   : > { %v4005_v21 = vadd.f32 %v3945_v7, %v3694_v20  ;;  %v3947_v59 = vpop.f32.mrf.mxu0 }
 0x3c4   : > { %4054 = vst.msk [vmem:[%s6593_s29 + $0x140] sm:$0xff] %vm4013_vm3, %v4005_v21  ;;  %v4390_v30 = vmul.f32 %v4313_v38, %v4005_v21  ;;  %v4333_v38 = vpop.permute.xlu2 %4332 }
 0x3c5   : > { %v3010_v61 = vpop.f32.mrf.mxu2  ;;  %v3636_v36 = vpop.f32.mrf.mxu3 }
 0x3c6   : > { %v4477_v40 = vsel %vm4013_vm3, %v4390_v30, 0.0  ;;  %v4541_v46 = vmul.f32 %v4390_v30, %v4390_v30  ;;  %v3069_v8 = vadd.f32 %v3010_v61, %v2643_v57  ;;  %v2587_v44 = vpop.f32.mrf.mxu1 }
 0x3c7   : > { %v4478_v43 = vadd.f32 %v4477_v40, %v4476_v2  ;;  %v2644_v56 = vadd.f32 %v2587_v44, %v7344_v3 }
 0x3c8   : > { %v4628_v29 = vsel %vm4013_vm3, %v4541_v46, 0.0  ;;  %v3695_v17 = vadd.f32 %v3636_v36, %v3069_v8 }
 0x3c9   : > { %v4629_v13 = vadd.f32 %v4628_v29, %v4627_v28 }
 0x3ca   : > { %v4006_v18 = vadd.f32 %v3947_v59, %v3695_v17  ;;  %v3950_v11 = vpop.f32.mrf.mxu0 }
 0x3cc   : > { %4055 = vst.msk [vmem:[%s6593_s29 + $0x148] sm:$0xff] %vm4013_vm3, %v4006_v18  ;;  %v4391_v50 = vmul.f32 %v4318_v55, %v4006_v18  ;;  %v4338_v55 = vpop.permute.xlu0 %4337 }
 0x3cd   : > { %v3013_v22 = vpop.f32.mrf.mxu2  ;;  %v3639_v10 = vpop.f32.mrf.mxu3 }
 0x3ce   : > { %v4479_v19 = vsel %vm4013_vm3, %v4391_v50, 0.0  ;;  %v4542_v24 = vmul.f32 %v4391_v50, %v4391_v50  ;;  %v3070_v52 = vadd.f32 %v3013_v22, %v2644_v56  ;;  %v2589_v58 = vpop.f32.mrf.mxu1 }
 0x3cf   : > { %v4480_v1 = vadd.f32 %v4479_v19, %v4478_v43  ;;  %v2645_v51 = vadd.f32 %v2589_v58, %v7345_v63 }
 0x3d0   : > { %v4630_v49 = vsel %vm4013_vm3, %v4542_v24, 0.0  ;;  %v3696_v12 = vadd.f32 %v3639_v10, %v3070_v52 }
 0x3d1   : > { %v4631_v0 = vadd.f32 %v4630_v49, %v4629_v13 }
 0x3d2   : > { %v4007_v41 = vadd.f32 %v3950_v11, %v3696_v12  ;;  %v3952_v32 = vpop.f32.mrf.mxu0 }
 0x3d4   : > { %4056 = vst.msk [vmem:[%s6593_s29 + $0x150] sm:$0xff] %vm4013_vm3, %v4007_v41  ;;  %v4392_v54 = vmul.f32 %v4323_v9, %v4007_v41 }
 0x3d5   : > { %v3015_v5 = vpop.f32.mrf.mxu2  ;;  %v3641_v4 = vpop.f32.mrf.mxu3 }
 0x3d6   : > { %v4481_v27 = vsel %vm4013_vm3, %v4392_v54, 0.0  ;;  %v4543_v23 = vmul.f32 %v4392_v54, %v4392_v54  ;;  %v3071_v16 = vadd.f32 %v3015_v5, %v2645_v51  ;;  %v2592_v47 = vpop.f32.mrf.mxu1 }
 0x3d7   : > { %v4482_v53 = vadd.f32 %v4481_v27, %v4480_v1  ;;  %v2646_v34 = vadd.f32 %v2592_v47, %v7346_v60 }
 0x3d8   : > { %v4632_v14 = vsel %vm4013_vm3, %v4543_v23, 0.0  ;;  %v3697_v35 = vadd.f32 %v3641_v4, %v3071_v16 }
 0x3d9   : > { %v4633_v15 = vadd.f32 %v4632_v14, %v4631_v0 }
 0x3da   : > { %v4008_v7 = vadd.f32 %v3952_v32, %v3697_v35  ;;  %v3955_v33 = vpop.f32.mrf.mxu0  ;;  %v4343_v32 = vpop.permute.xlu1 %4342 }
 0x3dc   : > { %4057 = vst.msk [vmem:[%s6593_s29 + $0x158] sm:$0xff] %vm4013_vm3, %v4008_v7  ;;  %v4393_v45 = vmul.f32 %v4328_v6, %v4008_v7 }
 0x3dd   : > { %v3018_v26 = vpop.f32.mrf.mxu2  ;;  %v3644_v2 = vpop.f32.mrf.mxu3 }
 0x3de   : > { %v4483_v62 = vsel %vm4013_vm3, %v4393_v45, 0.0  ;;  %v4544_v39 = vmul.f32 %v4393_v45, %v4393_v45  ;;  %v3072_v25 = vadd.f32 %v3018_v26, %v2646_v34  ;;  %v2594_v48 = vpop.f32.mrf.mxu1 }
 0x3df   : > { %v4484_v31 = vadd.f32 %v4483_v62, %v4482_v53  ;;  %v2647_v57 = vadd.f32 %v2594_v48, %v7347_v42 }
 0x3e0   : > { %v4634_v20 = vsel %vm4013_vm3, %v4544_v39, 0.0  ;;  %v3698_v28 = vadd.f32 %v3644_v2, %v3072_v25 }
 0x3e1   : > { %v4635_v21 = vadd.f32 %v4634_v20, %v4633_v15  ;;  %v4348_v15 = vpop.permute.xlu2 %4347 }
 0x3e2   : > { %v4009_v59 = vadd.f32 %v3955_v33, %v3698_v28  ;;  %v3957_v61 = vpop.f32.mrf.mxu0 }
 0x3e4   : > { %4058 = vst.msk [vmem:[%s6593_s29 + $0x160] sm:$0xff] %vm4013_vm3, %v4009_v59  ;;  %v4394_v30 = vmul.f32 %v4333_v38, %v4009_v59 }
 0x3e5   : > { %v3020_v40 = vpop.f32.mrf.mxu2  ;;  %v3646_v43 = vpop.f32.mrf.mxu3 }
 0x3e6   : > { %v4485_v46 = vsel %vm4013_vm3, %v4394_v30, 0.0  ;;  %v4545_v8 = vmul.f32 %v4394_v30, %v4394_v30  ;;  %v3073_v36 = vadd.f32 %v3020_v40, %v2647_v57  ;;  %v2597_v29 = vpop.f32.mrf.mxu1 }
 0x3e7   : > { %v4486_v44 = vadd.f32 %v4485_v46, %v4484_v31  ;;  %v2648_v3 = vadd.f32 %v2597_v29, %v6565_v37  ;;  %v7348_v37 = vld [vmem:[#allocation5_spill] sm:$0xff] }
 0x3e8   : > { %v4636_v17 = vsel %vm4013_vm3, %v4545_v8, 0.0  ;;  %v3699_v13 = vadd.f32 %v3646_v43, %v3073_v36 }
 0x3e9   : > { %v4637_v18 = vadd.f32 %v4636_v17, %v4635_v21 }
 0x3ea   : > { %v4010_v11 = vadd.f32 %v3957_v61, %v3699_v13  ;;  %v3960_v1 = vpop.f32.mrf.mxu0 }
 0x3ec   : > { %4059 = vst.msk [vmem:[%s6593_s29 + $0x168] sm:$0xff] %vm4013_vm3, %v4010_v11  ;;  %v4395_v50 = vmul.f32 %v4338_v55, %v4010_v11 }
 0x3ed   : > { %v3023_v56 = vpop.f32.mrf.mxu2  ;;  %v3649_v52 = vpop.f32.mrf.mxu3 }
 0x3ee   : > { %v4487_v22 = vsel %vm4013_vm3, %v4395_v50, 0.0  ;;  %v4546_v19 = vmul.f32 %v4395_v50, %v4395_v50  ;;  %v3074_v24 = vadd.f32 %v3023_v56, %v2648_v3  ;;  %v2599_v0 = vpop.f32.mrf.mxu1 }
 0x3ef   : > { %v4488_v10 = vadd.f32 %v4487_v22, %v4486_v44  ;;  %v2649_v54 = vadd.f32 %v2599_v0, %v7348_v37 }
 0x3f0   : > { %v4638_v58 = vsel %vm4013_vm3, %v4546_v19, 0.0  ;;  %v3700_v49 = vadd.f32 %v3649_v52, %v3074_v24 }
 0x3f1   : > { %v4639_v12 = vadd.f32 %v4638_v58, %v4637_v18 }
 0x3f2   : > { %v4011_v41 = vadd.f32 %v3960_v1, %v3700_v49  ;;  %v3962_v14 = vpop.f32.mrf.mxu0 }
 0x3f4   : > { %4060 = vst.msk [vmem:[%s6593_s29 + $0x170] sm:$0xff] %vm4013_vm3, %v4011_v41  ;;  %v4396_v9 = vmul.f32 %v4343_v32, %v4011_v41 }
 0x3f5   : > { %v3025_v63 = vpop.f32.mrf.mxu2  ;;  %v3651_v16 = vpop.f32.mrf.mxu3 }
 0x3f6   : > { %v4489_v51 = vsel %vm4013_vm3, %v4396_v9, 0.0  ;;  %v4547_v5 = vmul.f32 %v4396_v9, %v4396_v9  ;;  %v3075_v27 = vadd.f32 %v3025_v63, %v2649_v54 }
 0x3f7   : > { %v4490_v23 = vadd.f32 %v4489_v51, %v4488_v10 }
 0x3f8   : > { %v4640_v4 = vsel %vm4013_vm3, %v4547_v5, 0.0  ;;  %v3701_v53 = vadd.f32 %v3651_v16, %v3075_v27 }
 0x3f9   : > { %v4641_v47 = vadd.f32 %v4640_v4, %v4639_v12 }
 0x3fa   : > { %v4012_v35 = vadd.f32 %v3962_v14, %v3701_v53 }
 0x3fc   : > { %4061 = vst.msk [vmem:[%s6593_s29 + $0x178] sm:$0xff] %vm4013_vm3, %v4012_v35  ;;  %v4397_v7 = vmul.f32 %v4348_v15, %v4012_v35 }
 0x3fe   : > { %v4491_v6 = vsel %vm4013_vm3, %v4397_v7, 0.0  ;;  %v4548_v33 = vmul.f32 %v4397_v7, %v4397_v7 }
 0x3ff   : > { %v4492_v45 = vadd.f32 %v4491_v6, %v4490_v23 }
 0x400   : > { %v4642_v60 = vsel %vm4013_vm3, %v4548_v33, 0.0 }
 0x401   : > { %v4493_v34 = vrot.slane %v4492_v45, 4  ;;  %v4643_v26 = vadd.f32 %v4642_v60, %v4641_v47 }
 0x403   : > { %v4494_v62 = vadd.f32 %v4493_v34, %v4492_v45  ;;  %v4644_v39 = vrot.slane %v4643_v26, 4 }
 0x405   : > { %v4495_v25 = vrot.slane %v4494_v62, 2  ;;  %v4645_v2 = vadd.f32 %v4644_v39, %v4643_v26 }
 0x407   : > { %v4496_v31 = vadd.f32 %v4495_v25, %v4494_v62  ;;  %v4646_v48 = vrot.slane %v4645_v2, 2 }
 0x409   : > { %v4497_v20 = vrot.slane %v4496_v31, 1  ;;  %v4647_v28 = vadd.f32 %v4646_v48, %v4645_v2 }
 0x40b   : > { %v4498_v21 = vadd.f32 %v4497_v20, %v4496_v31  ;;  %v4648_v59 = vrot.slane %v4647_v28, 1 }
 0x40d   : > { %4500 = vst.msk [vmem:[%s208_s26] sm:$0x1] %vm4499_vm4, %v4498_v21  ;;  %v4649_v38 = vadd.f32 %v4648_v59, %v4647_v28 }
 0x40f   : > { %4650 = vst.msk [vmem:[%s208_s26 + $0x1] sm:$0x1] %vm4499_vm4, %v4649_v38 }
 0x410 PF: > { %s15_s15 = sadd.s32 1, %s5679_s15  }
 0x411   : > { %p12_p4 = scmp.ge.s32.totalorder %s15_s15, 4  }
 0x413   :  { %14 = sbr.rel (!%p12_p4) target bundleno = 1 (0x1), region = 82 }

</bundles_post_ra>
